<compile_context>
chip_gen: v6e
topology: v6e:2x2x1
jax: 0.10.0
libtpu: 0.0.40
codegen_flags: <defaults>
</compile_context>

<pallas_src>
import jax
import jax.numpy as jnp
from jax.experimental import pallas as pl
from jax.experimental.pallas import tpu as pltpu

# ---- model dimensions (small but module-consistent) -------------------------
INPUT_DIM = 768        # emotion2vec frame feature dim (input_dim=768)
HIDDEN_DIM = 256       # encoder.hidden_dim exposed to the heads
ATTN_DIM = 128         # attention-MLP bottleneck
NUM_SEGMENTS = 8       # hierarchy level 2 (segments per utterance)
FRAMES_PER_SEG = 8     # hierarchy level 1 (frames per segment)
SEQ_LEN = NUM_SEGMENTS * FRAMES_PER_SEG   # 64 frames per utterance
NUM_CLASSES = 4        # num_classes=4 emotion head
UTTER_TILE = 32        # utterances per grid step -> 32*64 = 2048 matmul rows


# ---- Pallas kernel: full forward for one tile of U utterances ----------------
def _hier_multitask_kernel(
    x_ref,                              # (U*T, Din)          f32 (cast in-kernel)
    wp_ref, bp_ref,                     # input projection    bf16 / f32
    wf_ref, bf_ref, vfb_ref,            # frame attention     bf16 / f32 / bf16 (A,H) broadcast
    ws_ref, bs_ref, vsb_ref,            # segment attention   bf16 / f32 / bf16 (A,H) broadcast
    w1_ref, b1_ref, w2_ref, b2_ref,     # task head           bf16 / f32 / bf16(pad) / f32(pad)
    feat_ref, logits_ref, frame_attn_ref, seg_attn_ref,
):
    S, F, T, H = NUM_SEGMENTS, FRAMES_PER_SEG, SEQ_LEN, HIDDEN_DIM
    rows = x_ref.shape[0]
    U = rows // T                       # utterances in this tile (static)

    # --- encoder: input projection (big MXU matmul over the whole tile) ------
    x = x_ref[...].astype(jnp.bfloat16)                             # cast in VMEM
    h = jnp.tanh(jnp.dot(x, wp_ref[...],
                         preferred_element_type=jnp.float32)
                 + bp_ref[...])                                     # (rows, H) f32
    hb = h.astype(jnp.bfloat16)

    # --- level 1: frame attention within each segment -------------------------
    u = jnp.tanh(jnp.dot(hb, wf_ref[...],
                         preferred_element_type=jnp.float32)
                 + bf_ref[...])                                     # (rows, A) f32
    # rank-1 MXU matmul broadcasts the scalar score across all H lanes
    sb = jnp.dot(u.astype(jnp.bfloat16), vfb_ref[...],
                 preferred_element_type=jnp.float32)                # (rows, H) lane-dense

    hf = h.reshape(U * S, F, H)                                     # (U*S, F, H)
    sf = sb.reshape(U * S, F, H)
    m1 = jnp.max(sf, axis=1, keepdims=True)
    e1 = jnp.exp(sf - m1)
    inv1 = pl.reciprocal(jnp.sum(e1, axis=1, keepdims=True), approx=True)
    a1 = e1 * inv1                                                  # frame attn (lane-dense)
    seg = jnp.sum(a1 * hf, axis=1)                                  # (U*S, H)

    # --- level 2: segment attention -------------------------------------------
    u2 = jnp.tanh(jnp.dot(seg.astype(jnp.bfloat16), ws_ref[...],
                          preferred_element_type=jnp.float32)
                  + bs_ref[...])                                    # (U*S, A)
    s2 = jnp.dot(u2.astype(jnp.bfloat16), vsb_ref[...],
                 preferred_element_type=jnp.float32).reshape(U, S, H)
    m2 = jnp.max(s2, axis=1, keepdims=True)
    e2 = jnp.exp(s2 - m2)
    inv2 = pl.reciprocal(jnp.sum(e2, axis=1, keepdims=True), approx=True)
    a2 = e2 * inv2                                                  # segment attn (lane-dense)
    feat = jnp.sum(a2 * seg.reshape(U, S, H), axis=1)               # (U, H)
    # encoder.classifier == nn.Identity() -> feat is the returned feature

    # --- task head, batched over the U utterances of the tile -----------------
    z = jnp.maximum(
        jnp.dot(feat.astype(jnp.bfloat16), w1_ref[...],
                preferred_element_type=jnp.float32) + b1_ref[...], 0.0)   # (U, H)
    # TODO(synk): Dropout(p=0.2) is a no-op in eval mode; training-mode RNG
    # masking (pltpu.prng_*) is not implemented here.
    logits = (jnp.dot(z.astype(jnp.bfloat16), w2_ref[...],
                      preferred_element_type=jnp.float32)
              + b2_ref[...])                                        # (U, CP) lane-dense

    feat_ref[...] = feat
    logits_ref[...] = logits
    # all lanes hold the same attention value -> lane reduce picks it out,
    # stores stay lane-dense (U, S*F) / (U, S)
    frame_attn_ref[...] = jnp.max(a1, axis=-1).reshape(U, S * F)
    seg_attn_ref[...] = jnp.max(a2, axis=-1)


# ---- one-time weight preparation (outside the per-call path) ------------------
def prepare_task_weights(params, task_name):
    """Pre-cast matrices to bf16, build lane-broadcast attention vectors and
    pad the final head to 128 output lanes. Do this ONCE per task."""
    bf16 = jnp.bfloat16
    head = params["heads"][task_name]
    C = head["w2"].shape[1]
    CP = ((C + 127) // 128) * 128

    ones_h = jnp.ones((1, HIDDEN_DIM), jnp.float32)
    vfb = (params["vf"].reshape(ATTN_DIM, 1) * ones_h).astype(bf16)   # (A, H)
    vsb = (params["vs"].reshape(ATTN_DIM, 1) * ones_h).astype(bf16)   # (A, H)

    w2p = jnp.zeros((HIDDEN_DIM, CP), bf16).at[:, :C].set(head["w2"].astype(bf16))
    b2p = jnp.zeros((1, CP), jnp.float32).at[:, :C].set(head["b2"])

    weights = (params["wp"].astype(bf16), params["bp"],
               params["wf"].astype(bf16), params["bf"], vfb,
               params["ws"].astype(bf16), params["bs"], vsb,
               head["w1"].astype(bf16), head["b1"], w2p, b2p)
    return weights, C, CP


def _choose_utterance_tile(B, utter_tile=UTTER_TILE):
    """Tile of U utterances: multiple of 8 when B allows (8,128 tiling), and
    clamped so the grid keeps >= 2 steps (v7x megacore) when B is large."""
    if B < 8:
        return max(B, 1)
    if B < 16:
        return 8
    half = (B // 2) // 8 * 8
    return max(8, min(utter_tile, half))


# ---- wrapper ------------------------------------------------------------------
def multitask_hierarchical_forward(x, prepared, utter_tile=UTTER_TILE):
    """Returns (logits, attn_info) where attn_info = (features, frame_attn, seg_attn).

    `prepared` is the tuple returned by prepare_task_weights."""
    weights, C, CP = prepared
    B, T, Din = x.shape
    assert T == SEQ_LEN and Din == INPUT_DIM
    S, F, H = NUM_SEGMENTS, FRAMES_PER_SEG, HIDDEN_DIM

    U = _choose_utterance_tile(B, utter_tile)
    grid = (pl.cdiv(B, U),)
    x2d = x.reshape(B * T, Din)            # free reshape; dtype untouched (f32)

    def full_spec(shape):
        return pl.BlockSpec(shape, lambda i, n=len(shape): (0,) * n)

    in_specs = ([pl.BlockSpec((U * T, Din), lambda i: (i, 0))]
                + [full_spec(w.shape) for w in weights])

    out_shape = (
        jax.ShapeDtypeStruct((B, H), jnp.float32),        # features   (lane-dense)
        jax.ShapeDtypeStruct((B, CP), jnp.float32),       # padded logits (lane-dense)
        jax.ShapeDtypeStruct((B, S * F), jnp.float32),    # frame attention (lane-dense)
        jax.ShapeDtypeStruct((B, S), jnp.float32),        # segment attention
    )
    out_specs = (
        pl.BlockSpec((U, H), lambda i: (i, 0)),
        pl.BlockSpec((U, CP), lambda i: (i, 0)),
        pl.BlockSpec((U, S * F), lambda i: (i, 0)),
        pl.BlockSpec((U, S), lambda i: (i, 0)),
    )

    rows = B * T
    flops = (2 * rows * (INPUT_DIM * H + H * ATTN_DIM + ATTN_DIM * H)
             + 2 * B * S * (H * ATTN_DIM + ATTN_DIM * H)
             + 2 * B * (H * H + H * CP))
    transcendentals = rows * (2 * H + ATTN_DIM) + B * S * (ATTN_DIM + H)
    bytes_accessed = (4 * rows * Din
                      + sum(int(w.size) * w.dtype.itemsize for w in weights)
                      + 4 * B * (H + CP + S * F + S))

    fn = pl.pallas_call(
        _hier_multitask_kernel,
        out_shape=out_shape,
        grid=grid,
        in_specs=in_specs,
        out_specs=out_specs,
        compiler_params=pltpu.CompilerParams(
            dimension_semantics=("parallel",),
            vmem_limit_bytes=48 * 1024 * 1024),
        cost_estimate=pl.CostEstimate(flops=flops,
                                      transcendentals=transcendentals,
                                      bytes_accessed=bytes_accessed),
    )
    feat, logits_p, fattn, sattn = fn(x2d, *weights)

    logits = logits_p[:, :C]
    frame_attn = fattn.reshape(B, S, F, 1)
    seg_attn = sattn.reshape(B, S, 1)
    return logits, (feat, frame_attn, seg_attn)


# ---- deterministic parameter init (PyTorch nn.Linear-style uniform) -----------
def init_params(key, task_out_dims):
    def linear(k, fan_in, fan_out):
        kw, kb = jax.random.split(k)
        lim = 1.0 / jnp.sqrt(jnp.float32(fan_in))
        w = jax.random.uniform(kw, (fan_in, fan_out), jnp.float32, -lim, lim)
        b = jax.random.uniform(kb, (1, fan_out), jnp.float32, -lim, lim)
        return w, b

    ks = list(jax.random.split(key, 5 + 2 * len(task_out_dims)))
    wp, bp = linear(ks[0], INPUT_DIM, HIDDEN_DIM)
    wf, bf = linear(ks[1], HIDDEN_DIM, ATTN_DIM)
    vf = jax.random.uniform(ks[2], (1, ATTN_DIM), jnp.float32, -0.1, 0.1)
    ws, bs = linear(ks[3], HIDDEN_DIM, ATTN_DIM)
    vs = jax.random.uniform(ks[4], (1, ATTN_DIM), jnp.float32, -0.1, 0.1)

    heads = {}
    for i, (name, out_dim) in enumerate(sorted(task_out_dims.items())):
        w1, b1 = linear(ks[5 + 2 * i], HIDDEN_DIM, HIDDEN_DIM)
        w2, b2 = linear(ks[6 + 2 * i], HIDDEN_DIM, out_dim)
        heads[name] = {"w1": w1, "b1": b1, "w2": w2, "b2": b2}

    return {"wp": wp, "bp": bp, "wf": wf, "bf": bf, "vf": vf,
            "ws": ws, "bs": bs, "vs": vs, "heads": heads}


# ---- pure-JAX reference (same bf16 operand / f32 accumulation policy) ----------
def forward_reference(x, params, task_name):
    bf16, f32 = jnp.bfloat16, jnp.float32
    mm = lambda a, w: jnp.dot(a.astype(bf16), w.astype(bf16),
                              preferred_element_type=f32)
    B = x.shape[0]
    head = params["heads"][task_name]

    h = jnp.tanh(mm(x.reshape(B * SEQ_LEN, INPUT_DIM), params["wp"]) + params["bp"])
    u = jnp.tanh(mm(h, params["wf"]) + params["bf"])
    s = mm(u, params["vf"].reshape(ATTN_DIM, 1))                    # (B*T, 1)
    h4 = h.reshape(B, NUM_SEGMENTS, FRAMES_PER_SEG, HIDDEN_DIM)
    s4 = s.reshape(B, NUM_SEGMENTS, FRAMES_PER_SEG, 1)
    a1 = jax.nn.softmax(s4, axis=2)
    seg = jnp.sum(a1 * h4, axis=2)                                  # (B, S, H)
    u2 = jnp.tanh(mm(seg.reshape(B * NUM_SEGMENTS, HIDDEN_DIM), params["ws"])
                  + params["bs"])
    s2 = mm(u2, params["vs"].reshape(ATTN_DIM, 1)).reshape(B, NUM_SEGMENTS, 1)
    a2 = jax.nn.softmax(s2, axis=1)
    feat = jnp.sum(a2 * seg, axis=1)                                # (B, H)
    z = jnp.maximum(mm(feat, head["w1"]) + head["b1"], 0.0)
    logits = mm(z, head["w2"]) + head["b2"]
    return logits, feat, a1, a2


if __name__ == "__main__":
    key = jax.random.PRNGKey(0)
    kx, kp = jax.random.split(key)
    params = init_params(kp, {"emotion": NUM_CLASSES})
    prepared = prepare_task_weights(params, "emotion")

    def check(B, kxx):
        x = jax.random.normal(kxx, (B, SEQ_LEN, INPUT_DIM), dtype=jnp.float32)
        logits, (features, frame_attn, seg_attn) = multitask_hierarchical_forward(
            x, prepared)
        jax.block_until_ready((logits, features, frame_attn, seg_attn))
        r_logits, r_feat, r_a1, r_a2 = forward_reference(x, params, "emotion")
        assert logits.shape == (B, NUM_CLASSES)
        assert jnp.allclose(logits, r_logits, rtol=2e-2, atol=2e-2)
        assert jnp.allclose(features, r_feat, rtol=2e-2, atol=2e-2)
        assert jnp.allclose(frame_attn, r_a1, rtol=2e-2, atol=2e-2)
        assert jnp.allclose(seg_attn, r_a2, rtol=2e-2, atol=2e-2)

    kx1, kx2 = jax.random.split(kx)
    check(2, kx1)    # single tile (block == full dims)
    check(10, kx2)   # 2-step grid with a ragged last tile (OOB rows dropped)
    print("KERNEL_OK")
</pallas_src>

<mosaic_0001>
module attributes {stable_mosaic.version = 11 : i64} {
  func.func @_hier_multitask_kernel(%arg0: i32, %arg1: memref<128x768xf32, #tpu.memory_space<vmem>>, %arg2: memref<768x256xbf16, #tpu.memory_space<vmem>>, %arg3: memref<1x256xf32, #tpu.memory_space<vmem>>, %arg4: memref<256x128xbf16, #tpu.memory_space<vmem>>, %arg5: memref<1x128xf32, #tpu.memory_space<vmem>>, %arg6: memref<128x256xbf16, #tpu.memory_space<vmem>>, %arg7: memref<256x128xbf16, #tpu.memory_space<vmem>>, %arg8: memref<1x128xf32, #tpu.memory_space<vmem>>, %arg9: memref<128x256xbf16, #tpu.memory_space<vmem>>, %arg10: memref<256x256xbf16, #tpu.memory_space<vmem>>, %arg11: memref<1x256xf32, #tpu.memory_space<vmem>>, %arg12: memref<256x128xbf16, #tpu.memory_space<vmem>>, %arg13: memref<1x128xf32, #tpu.memory_space<vmem>>, %arg14: memref<2x256xf32, #tpu.memory_space<vmem>>, %arg15: memref<2x128xf32, #tpu.memory_space<vmem>>, %arg16: memref<2x64xf32, #tpu.memory_space<vmem>>, %arg17: memref<2x8xf32, #tpu.memory_space<vmem>>) attributes {dimension_semantics = [#tpu.dimension_semantics<parallel>], iteration_bounds = array<i64: 1>, scalar_prefetch = 0 : i64, scratch_operands = 0 : i64, tpu.core_type = #tpu.core_type<tc>, window_params = [{transform_indices = @transform_0, window_bounds = array<i64: 128, 768>}, {pipeline_mode = #tpu.pipeline_mode<synchronous>, transform_indices = @transform_1, window_bounds = array<i64: 768, 256>}, {pipeline_mode = #tpu.pipeline_mode<synchronous>, transform_indices = @transform_2, window_bounds = array<i64: 1, 256>}, {pipeline_mode = #tpu.pipeline_mode<synchronous>, transform_indices = @transform_3, window_bounds = array<i64: 256, 128>}, {pipeline_mode = #tpu.pipeline_mode<synchronous>, transform_indices = @transform_4, window_bounds = array<i64: 1, 128>}, {pipeline_mode = #tpu.pipeline_mode<synchronous>, transform_indices = @transform_5, window_bounds = array<i64: 128, 256>}, {pipeline_mode = #tpu.pipeline_mode<synchronous>, transform_indices = @transform_6, window_bounds = array<i64: 256, 128>}, {pipeline_mode = #tpu.pipeline_mode<synchronous>, transform_indices = @transform_7, window_bounds = array<i64: 1, 128>}, {pipeline_mode = #tpu.pipeline_mode<synchronous>, transform_indices = @transform_8, window_bounds = array<i64: 128, 256>}, {pipeline_mode = #tpu.pipeline_mode<synchronous>, transform_indices = @transform_9, window_bounds = array<i64: 256, 256>}, {pipeline_mode = #tpu.pipeline_mode<synchronous>, transform_indices = @transform_10, window_bounds = array<i64: 1, 256>}, {pipeline_mode = #tpu.pipeline_mode<synchronous>, transform_indices = @transform_11, window_bounds = array<i64: 256, 128>}, {pipeline_mode = #tpu.pipeline_mode<synchronous>, transform_indices = @transform_12, window_bounds = array<i64: 1, 128>}, {transform_indices = @transform_13, window_bounds = array<i64: 2, 256>}, {transform_indices = @transform_14, window_bounds = array<i64: 2, 128>}, {transform_indices = @transform_15, window_bounds = array<i64: 2, 64>}, {transform_indices = @transform_16, window_bounds = array<i64: 2, 8>}]} {
    %c0 = arith.constant 0 : index
    %c0_0 = arith.constant 0 : index
    %0 = vector.load %arg1[%c0, %c0_0] : memref<128x768xf32, #tpu.memory_space<vmem>>, vector<128x768xf32>
    %1 = arith.truncf %0 : vector<128x768xf32> to vector<128x768xbf16>
    %c0_1 = arith.constant 0 : index
    %c0_2 = arith.constant 0 : index
    %2 = vector.load %arg2[%c0_1, %c0_2] : memref<768x256xbf16, #tpu.memory_space<vmem>>, vector<768x256xbf16>
    %cst = arith.constant dense<0.000000e+00> : vector<128x256xf32>
    %3 = tpu.matmul %1, %2, %cst {dimension_numbers = #tpu.dot_dimension_numbers<[1], [0], [0], [1], [0, 0, 1, 1], [], []>} : vector<128x768xbf16>, vector<768x256xbf16>, vector<128x256xf32> -> vector<128x256xf32>
    %c0_3 = arith.constant 0 : index
    %c0_4 = arith.constant 0 : index
    %4 = vector.load %arg3[%c0_3, %c0_4] : memref<1x256xf32, #tpu.memory_space<vmem>>, vector<1x256xf32>
    %5 = vector.broadcast %4 : vector<1x256xf32> to vector<128x256xf32>
    %6 = arith.addf %3, %5 : vector<128x256xf32>
    %7 = math.tanh %6 : vector<128x256xf32>
    %8 = arith.truncf %7 : vector<128x256xf32> to vector<128x256xbf16>
    %c0_5 = arith.constant 0 : index
    %c0_6 = arith.constant 0 : index
    %9 = vector.load %arg4[%c0_5, %c0_6] : memref<256x128xbf16, #tpu.memory_space<vmem>>, vector<256x128xbf16>
    %cst_7 = arith.constant dense<0.000000e+00> : vector<128x128xf32>
    %10 = tpu.matmul %8, %9, %cst_7 {dimension_numbers = #tpu.dot_dimension_numbers<[1], [0], [0], [1], [0, 0, 1, 1], [], []>} : vector<128x256xbf16>, vector<256x128xbf16>, vector<128x128xf32> -> vector<128x128xf32>
    %c0_8 = arith.constant 0 : index
    %c0_9 = arith.constant 0 : index
    %11 = vector.load %arg5[%c0_8, %c0_9] : memref<1x128xf32, #tpu.memory_space<vmem>>, vector<1x128xf32>
    %12 = vector.broadcast %11 : vector<1x128xf32> to vector<128x128xf32>
    %13 = arith.addf %10, %12 : vector<128x128xf32>
    %14 = math.tanh %13 : vector<128x128xf32>
    %15 = arith.truncf %14 : vector<128x128xf32> to vector<128x128xbf16>
    %c0_10 = arith.constant 0 : index
    %c0_11 = arith.constant 0 : index
    %16 = vector.load %arg6[%c0_10, %c0_11] : memref<128x256xbf16, #tpu.memory_space<vmem>>, vector<128x256xbf16>
    %cst_12 = arith.constant dense<0.000000e+00> : vector<128x256xf32>
    %17 = tpu.matmul %15, %16, %cst_12 {dimension_numbers = #tpu.dot_dimension_numbers<[1], [0], [0], [1], [0, 0, 1, 1], [], []>} : vector<128x128xbf16>, vector<128x256xbf16>, vector<128x256xf32> -> vector<128x256xf32>
    %18 = vector.shape_cast %7 : vector<128x256xf32> to vector<16x8x256xf32>
    %19 = vector.shape_cast %17 : vector<128x256xf32> to vector<16x8x256xf32>
    %cst_13 = arith.constant dense<0xFF800000> : vector<16x256xf32>
    %20 = vector.multi_reduction <maximumf>, %19, %cst_13 [1] : vector<16x8x256xf32> to vector<16x256xf32>
    %21 = vector.shape_cast %20 : vector<16x256xf32> to vector<16x1x256xf32>
    %22 = vector.broadcast %21 : vector<16x1x256xf32> to vector<16x8x256xf32>
    %23 = arith.subf %19, %22 : vector<16x8x256xf32>
    %24 = math.exp %23 : vector<16x8x256xf32>
    %cst_14 = arith.constant dense<0.000000e+00> : vector<16x256xf32>
    %25 = vector.multi_reduction <add>, %24, %cst_14 [1] : vector<16x8x256xf32> to vector<16x256xf32>
    %26 = vector.shape_cast %25 : vector<16x256xf32> to vector<16x1x256xf32>
    %27 = tpu.reciprocal %26 {approx = true} : vector<16x1x256xf32> -> vector<16x1x256xf32>
    %28 = vector.broadcast %27 : vector<16x1x256xf32> to vector<16x8x256xf32>
    %29 = arith.mulf %24, %28 : vector<16x8x256xf32>
    %30 = arith.mulf %29, %18 : vector<16x8x256xf32>
    %cst_15 = arith.constant dense<0.000000e+00> : vector<16x256xf32>
    %31 = vector.multi_reduction <add>, %30, %cst_15 [1] : vector<16x8x256xf32> to vector<16x256xf32>
    %32 = arith.truncf %31 : vector<16x256xf32> to vector<16x256xbf16>
    %c0_16 = arith.constant 0 : index
    %c0_17 = arith.constant 0 : index
    %33 = vector.load %arg7[%c0_16, %c0_17] : memref<256x128xbf16, #tpu.memory_space<vmem>>, vector<256x128xbf16>
    %cst_18 = arith.constant dense<0.000000e+00> : vector<16x128xf32>
    %34 = tpu.matmul %32, %33, %cst_18 {dimension_numbers = #tpu.dot_dimension_numbers<[1], [0], [0], [1], [0, 0, 1, 1], [], []>} : vector<16x256xbf16>, vector<256x128xbf16>, vector<16x128xf32> -> vector<16x128xf32>
    %c0_19 = arith.constant 0 : index
    %c0_20 = arith.constant 0 : index
    %35 = vector.load %arg8[%c0_19, %c0_20] : memref<1x128xf32, #tpu.memory_space<vmem>>, vector<1x128xf32>
    %36 = vector.broadcast %35 : vector<1x128xf32> to vector<16x128xf32>
    %37 = arith.addf %34, %36 : vector<16x128xf32>
    %38 = math.tanh %37 : vector<16x128xf32>
    %39 = arith.truncf %38 : vector<16x128xf32> to vector<16x128xbf16>
    %c0_21 = arith.constant 0 : index
    %c0_22 = arith.constant 0 : index
    %40 = vector.load %arg9[%c0_21, %c0_22] : memref<128x256xbf16, #tpu.memory_space<vmem>>, vector<128x256xbf16>
    %cst_23 = arith.constant dense<0.000000e+00> : vector<16x256xf32>
    %41 = tpu.matmul %39, %40, %cst_23 {dimension_numbers = #tpu.dot_dimension_numbers<[1], [0], [0], [1], [0, 0, 1, 1], [], []>} : vector<16x128xbf16>, vector<128x256xbf16>, vector<16x256xf32> -> vector<16x256xf32>
    %42 = vector.shape_cast %41 : vector<16x256xf32> to vector<2x8x256xf32>
    %cst_24 = arith.constant dense<0xFF800000> : vector<2x256xf32>
    %43 = vector.multi_reduction <maximumf>, %42, %cst_24 [1] : vector<2x8x256xf32> to vector<2x256xf32>
    %44 = vector.shape_cast %43 : vector<2x256xf32> to vector<2x1x256xf32>
    %45 = vector.broadcast %44 : vector<2x1x256xf32> to vector<2x8x256xf32>
    %46 = arith.subf %42, %45 : vector<2x8x256xf32>
    %47 = math.exp %46 : vector<2x8x256xf32>
    %cst_25 = arith.constant dense<0.000000e+00> : vector<2x256xf32>
    %48 = vector.multi_reduction <add>, %47, %cst_25 [1] : vector<2x8x256xf32> to vector<2x256xf32>
    %49 = vector.shape_cast %48 : vector<2x256xf32> to vector<2x1x256xf32>
    %50 = tpu.reciprocal %49 {approx = true} : vector<2x1x256xf32> -> vector<2x1x256xf32>
    %51 = vector.broadcast %50 : vector<2x1x256xf32> to vector<2x8x256xf32>
    %52 = arith.mulf %47, %51 : vector<2x8x256xf32>
    %53 = vector.shape_cast %31 : vector<16x256xf32> to vector<2x8x256xf32>
    %54 = arith.mulf %52, %53 : vector<2x8x256xf32>
    %cst_26 = arith.constant dense<0.000000e+00> : vector<2x256xf32>
    %55 = vector.multi_reduction <add>, %54, %cst_26 [1] : vector<2x8x256xf32> to vector<2x256xf32>
    %56 = arith.truncf %55 : vector<2x256xf32> to vector<2x256xbf16>
    %c0_27 = arith.constant 0 : index
    %c0_28 = arith.constant 0 : index
    %57 = vector.load %arg10[%c0_27, %c0_28] : memref<256x256xbf16, #tpu.memory_space<vmem>>, vector<256x256xbf16>
    %cst_29 = arith.constant dense<0.000000e+00> : vector<2x256xf32>
    %58 = tpu.matmul %56, %57, %cst_29 {dimension_numbers = #tpu.dot_dimension_numbers<[1], [0], [0], [1], [0, 0, 1, 1], [], []>} : vector<2x256xbf16>, vector<256x256xbf16>, vector<2x256xf32> -> vector<2x256xf32>
    %c0_30 = arith.constant 0 : index
    %c0_31 = arith.constant 0 : index
    %59 = vector.load %arg11[%c0_30, %c0_31] : memref<1x256xf32, #tpu.memory_space<vmem>>, vector<1x256xf32>
    %60 = vector.broadcast %59 : vector<1x256xf32> to vector<2x256xf32>
    %61 = arith.addf %58, %60 : vector<2x256xf32>
    %cst_32 = arith.constant 0.000000e+00 : f32
    %62 = vector.broadcast %cst_32 : f32 to vector<2x256xf32>
    %63 = arith.maximumf %61, %62 : vector<2x256xf32>
    %64 = arith.truncf %63 : vector<2x256xf32> to vector<2x256xbf16>
    %c0_33 = arith.constant 0 : index
    %c0_34 = arith.constant 0 : index
    %65 = vector.load %arg12[%c0_33, %c0_34] : memref<256x128xbf16, #tpu.memory_space<vmem>>, vector<256x128xbf16>
    %cst_35 = arith.constant dense<0.000000e+00> : vector<2x128xf32>
    %66 = tpu.matmul %64, %65, %cst_35 {dimension_numbers = #tpu.dot_dimension_numbers<[1], [0], [0], [1], [0, 0, 1, 1], [], []>} : vector<2x256xbf16>, vector<256x128xbf16>, vector<2x128xf32> -> vector<2x128xf32>
    %c0_36 = arith.constant 0 : index
    %c0_37 = arith.constant 0 : index
    %67 = vector.load %arg13[%c0_36, %c0_37] : memref<1x128xf32, #tpu.memory_space<vmem>>, vector<1x128xf32>
    %68 = vector.broadcast %67 : vector<1x128xf32> to vector<2x128xf32>
    %69 = arith.addf %66, %68 : vector<2x128xf32>
    %c0_38 = arith.constant 0 : index
    %c0_39 = arith.constant 0 : index
    %70 = vector.load %arg14[%c0_38, %c0_39] : memref<2x256xf32, #tpu.memory_space<vmem>>, vector<2x256xf32>
    tpu.vector_store %arg14[%c0_38, %c0_39], %55 {strides = array<i32>} : memref<2x256xf32, #tpu.memory_space<vmem>>, vector<2x256xf32>,
    %c0_40 = arith.constant 0 : index
    %c0_41 = arith.constant 0 : index
    %71 = vector.load %arg15[%c0_40, %c0_41] : memref<2x128xf32, #tpu.memory_space<vmem>>, vector<2x128xf32>
    tpu.vector_store %arg15[%c0_40, %c0_41], %69 {strides = array<i32>} : memref<2x128xf32, #tpu.memory_space<vmem>>, vector<2x128xf32>,
    %cst_42 = arith.constant dense<0xFF800000> : vector<16x8xf32>
    %72 = vector.multi_reduction <maximumf>, %29, %cst_42 [2] : vector<16x8x256xf32> to vector<16x8xf32>
    %73 = vector.shape_cast %72 : vector<16x8xf32> to vector<2x64xf32>
    %c0_43 = arith.constant 0 : index
    %c0_44 = arith.constant 0 : index
    %74 = vector.load %arg16[%c0_43, %c0_44] : memref<2x64xf32, #tpu.memory_space<vmem>>, vector<2x64xf32>
    tpu.vector_store %arg16[%c0_43, %c0_44], %73 {strides = array<i32>} : memref<2x64xf32, #tpu.memory_space<vmem>>, vector<2x64xf32>,
    %cst_45 = arith.constant dense<0xFF800000> : vector<2x8xf32>
    %75 = vector.multi_reduction <maximumf>, %52, %cst_45 [2] : vector<2x8x256xf32> to vector<2x8xf32>
    %c0_46 = arith.constant 0 : index
    %c0_47 = arith.constant 0 : index
    %76 = vector.load %arg17[%c0_46, %c0_47] : memref<2x8xf32, #tpu.memory_space<vmem>>, vector<2x8xf32>
    tpu.vector_store %arg17[%c0_46, %c0_47], %75 {strides = array<i32>} : memref<2x8xf32, #tpu.memory_space<vmem>>, vector<2x8xf32>,
    return
  }
  func.func @transform_0(%arg0: i32) -> (i32, i32) {
    %c0_i32 = arith.constant 0 : i32
    %c0_i32_0 = arith.constant 0 : i32
    return %arg0, %c0_i32 : i32, i32
  }
  func.func @transform_1(%arg0: i32) -> (i32, i32) {
    %c0_i32 = arith.constant 0 : i32
    %c0_i32_0 = arith.constant 0 : i32
    %c0_i32_1 = arith.constant 0 : i32
    return %c0_i32, %c0_i32_0 : i32, i32
  }
  func.func @transform_2(%arg0: i32) -> (i32, i32) {
    %c0_i32 = arith.constant 0 : i32
    %c0_i32_0 = arith.constant 0 : i32
    %c0_i32_1 = arith.constant 0 : i32
    return %c0_i32, %c0_i32_0 : i32, i32
  }
  func.func @transform_3(%arg0: i32) -> (i32, i32) {
    %c0_i32 = arith.constant 0 : i32
    %c0_i32_0 = arith.constant 0 : i32
    %c0_i32_1 = arith.constant 0 : i32
    return %c0_i32, %c0_i32_0 : i32, i32
  }
  func.func @transform_4(%arg0: i32) -> (i32, i32) {
    %c0_i32 = arith.constant 0 : i32
    %c0_i32_0 = arith.constant 0 : i32
    %c0_i32_1 = arith.constant 0 : i32
    return %c0_i32, %c0_i32_0 : i32, i32
  }
  func.func @transform_5(%arg0: i32) -> (i32, i32) {
    %c0_i32 = arith.constant 0 : i32
    %c0_i32_0 = arith.constant 0 : i32
    %c0_i32_1 = arith.constant 0 : i32
    return %c0_i32, %c0_i32_0 : i32, i32
  }
  func.func @transform_6(%arg0: i32) -> (i32, i32) {
    %c0_i32 = arith.constant 0 : i32
    %c0_i32_0 = arith.constant 0 : i32
    %c0_i32_1 = arith.constant 0 : i32
    return %c0_i32, %c0_i32_0 : i32, i32
  }
  func.func @transform_7(%arg0: i32) -> (i32, i32) {
    %c0_i32 = arith.constant 0 : i32
    %c0_i32_0 = arith.constant 0 : i32
    %c0_i32_1 = arith.constant 0 : i32
    return %c0_i32, %c0_i32_0 : i32, i32
  }
  func.func @transform_8(%arg0: i32) -> (i32, i32) {
    %c0_i32 = arith.constant 0 : i32
    %c0_i32_0 = arith.constant 0 : i32
    %c0_i32_1 = arith.constant 0 : i32
    return %c0_i32, %c0_i32_0 : i32, i32
  }
  func.func @transform_9(%arg0: i32) -> (i32, i32) {
    %c0_i32 = arith.constant 0 : i32
    %c0_i32_0 = arith.constant 0 : i32
    %c0_i32_1 = arith.constant 0 : i32
    return %c0_i32, %c0_i32_0 : i32, i32
  }
  func.func @transform_10(%arg0: i32) -> (i32, i32) {
    %c0_i32 = arith.constant 0 : i32
    %c0_i32_0 = arith.constant 0 : i32
    %c0_i32_1 = arith.constant 0 : i32
    return %c0_i32, %c0_i32_0 : i32, i32
  }
  func.func @transform_11(%arg0: i32) -> (i32, i32) {
    %c0_i32 = arith.constant 0 : i32
    %c0_i32_0 = arith.constant 0 : i32
    %c0_i32_1 = arith.constant 0 : i32
    return %c0_i32, %c0_i32_0 : i32, i32
  }
  func.func @transform_12(%arg0: i32) -> (i32, i32) {
    %c0_i32 = arith.constant 0 : i32
    %c0_i32_0 = arith.constant 0 : i32
    %c0_i32_1 = arith.constant 0 : i32
    return %c0_i32, %c0_i32_0 : i32, i32
  }
  func.func @transform_13(%arg0: i32) -> (i32, i32) {
    %c0_i32 = arith.constant 0 : i32
    %c0_i32_0 = arith.constant 0 : i32
    return %arg0, %c0_i32 : i32, i32
  }
  func.func @transform_14(%arg0: i32) -> (i32, i32) {
    %c0_i32 = arith.constant 0 : i32
    %c0_i32_0 = arith.constant 0 : i32
    return %arg0, %c0_i32 : i32, i32
  }
  func.func @transform_15(%arg0: i32) -> (i32, i32) {
    %c0_i32 = arith.constant 0 : i32
    %c0_i32_0 = arith.constant 0 : i32
    return %arg0, %c0_i32 : i32, i32
  }
  func.func @transform_16(%arg0: i32) -> (i32, i32) {
    %c0_i32 = arith.constant 0 : i32
    %c0_i32_0 = arith.constant 0 : i32
    return %arg0, %c0_i32 : i32, i32
  }
}

</mosaic_0001>

<bundles_post_ra>
// kernel: tpu_custom_call.1
= control target key start
LH: loop header
LB: loop body
LE: loop exit
PB: predicated region body
PF: predicated region fallthrough
CT: control target
= control target key end

     0   :  { %s6236_s0 = inlined_call_operand.hbm [shape: f32[128,768], index: 0, kind: input, shape index: {}]   ;;  %s6237_s1 = inlined_call_operand.hbm [shape: bf16[768,256], index: 1, kind: input, shape index: {}]   ;;  %s6238_s2 = inlined_call_operand.vmem [shape: f32[1,256], index: 2, kind: input, shape index: {}]   ;;  %s6239_s3 = inlined_call_operand.hbm [shape: bf16[256,128], index: 3, kind: input, shape index: {}]   ;;  %s6240_s4 = inlined_call_operand.vmem [shape: f32[1,128], index: 4, kind: input, shape index: {}]   ;;  %s6241_s5 = inlined_call_operand.hbm [shape: bf16[128,256], index: 5, kind: input, shape index: {}]   ;;  %s6242_s6 = inlined_call_operand.hbm [shape: bf16[256,128], index: 6, kind: input, shape index: {}]   ;;  %s6243_s7 = inlined_call_operand.vmem [shape: f32[1,128], index: 7, kind: input, shape index: {}]   ;;  %s6244_s8 = inlined_call_operand.hbm [shape: bf16[128,256], index: 8, kind: input, shape index: {}]   ;;  %s6245_s9 = inlined_call_operand.hbm [shape: bf16[256,256], index: 9, kind: input, shape index: {}]   ;;  %s6246_s10 = inlined_call_operand.vmem [shape: f32[1,256], index: 10, kind: input, shape index: {}]   ;;  %s6247_s11 = inlined_call_operand.hbm [shape: bf16[256,128], index: 11, kind: input, shape index: {}]   ;;  %s6248_s12 = inlined_call_operand.vmem [shape: f32[1,128], index: 12, kind: input, shape index: {}]   ;;  %s6249_s13 = inlined_call_operand.hbm [shape: f32[2,256], index: 13, kind: output, shape index: {0}]   ;;  %s6250_s14 = inlined_call_operand.hbm [shape: f32[2,128], index: 14, kind: output, shape index: {1}]   ;;  %s6251_s15 = inlined_call_operand.hbm [shape: f32[2,64], index: 15, kind: output, shape index: {2}]   ;;  %s6252_s16 = inlined_call_operand.hbm [shape: f32[2,8], index: 16, kind: output, shape index: {3}]  }
   0x1   :  { %6290 = sst [smem:[#allocation62_spill]] %s6236_s0 }
   0x2   :  { %22 = vsyncpa [#allocation3], 0 }
   0x3   :  { %23 = vsyncpa [#allocation6], 0 }
   0x4   :  { %24 = vsyncpa [#allocation9], 0 }
   0x5   :  { %25 = vsyncpa [#allocation12], 0 }
   0x6   :  { %26 = vsyncpa [#allocation15], 0 }
   0x7   :  { %27 = vsyncpa [#allocation4], 0 }
   0x8   :  { %28 = vsyncpa [#allocation18], 0 }
   0x9   :  { %29 = vsyncpa [#allocation21], 0  ;;  %s4967_s21 = smov [#allocation5]  }
   0xa   :  { %s47_s22 = sshll.u32 %s4967_s21, 4  ;;  %s48_s22 = int_to_ptr.vmem [resolvable:$true] %s47_s22 }
   0xb   :  { %s4719_s23 = scalar_lea.vmem %s48_s22, 12288  ;;  %p4724_p1 = scmp.lt.s32.totalorder %s48_s22, %s48_s22 }
   0xc   :  { %p4720_p0 = scmp.ne.s32.totalorder %s48_s22, %s4719_s23  ;;  %p4725_p2 = scmp.lt.s32.totalorder %s4719_s23, %s4719_s23 }
   0xe   :  { %p4726_p3 = por %p4725_p2, %p4724_p1 }
  0x10   :  { %p4727_p4 = pnand %p4726_p3, %p4720_p0 }
  0x12   :  { %4730 = shalt.err (!%p4727_p4)
}
  0x13   :  { %s4968_s24 = smov 128   ;;  %s4969_s25 = smov 8  }
  0x14   :  { %53 = dma.hbm_to_vmem [thread:$0]  %s6237_s1, 12288, %s48_s22, [#allocation6], %s4968_s24, %s4968_s24, %s4969_s25  }
  0x15   :  { %s4970_s28 = smov [#allocation8]   ;;  %s4971_s30 = smov [#allocation11]  }
  0x16   :  { %s75_s29 = sshll.u32 %s4970_s28, 4  ;;  %s101_s0 = sshll.u32 %s4971_s30, 4  ;;  %s76_s29 = int_to_ptr.vmem [resolvable:$true] %s75_s29  ;;  %s102_s0 = int_to_ptr.vmem [resolvable:$true] %s101_s0 }
  0x17   :  { %s4739_s17 = scalar_lea.vmem %s76_s29, 2048  ;;  %p4744_p6 = scmp.lt.s32.totalorder %s76_s29, %s76_s29 }
  0x18   :  { %p4740_p5 = scmp.ne.s32.totalorder %s76_s29, %s4739_s17  ;;  %p4745_p7 = scmp.lt.s32.totalorder %s4739_s17, %s4739_s17 }
  0x1a   :  { %p4746_p8 = por %p4745_p7, %p4744_p6 }
  0x1c   :  { %p4747_p9 = pnand %p4746_p8, %p4740_p5 }
  0x1e   :  { %4750 = shalt.err (!%p4747_p9)
}
  0x1f   :  { %81 = dma.hbm_to_vmem [thread:$0]  %s6241_s5, 2048, %s76_s29, [#allocation9], %s4968_s24, %s4968_s24, %s4969_s25  }
  0x20   :  { %s4759_s1 = scalar_lea.vmem %s102_s0, 2048  ;;  %p4764_p11 = scmp.lt.s32.totalorder %s102_s0, %s102_s0 }
  0x21   :  { %p4760_p10 = scmp.ne.s32.totalorder %s102_s0, %s4759_s1  ;;  %p4765_p12 = scmp.lt.s32.totalorder %s4759_s1, %s4759_s1 }
  0x23   :  { %p4766_p13 = por %p4765_p12, %p4764_p11 }
  0x25   :  { %p4767_p0 = pnand %p4766_p13, %p4760_p10 }
  0x27   :  { %4770 = shalt.err (!%p4767_p0)
}
  0x28   :  { %107 = dma.hbm_to_vmem [thread:$0]  %s6244_s8, 2048, %s102_s0, [#allocation12], %s4968_s24, %s4968_s24, %s4969_s25  }
  0x29   :  { %s4972_s22 = smov [#allocation2]  }
  0x2a   :  { %s35_s23 = sshll.u32 %s4972_s22, 4  ;;  %s36_s23 = int_to_ptr.vmem [resolvable:$true] %s35_s23 }
  0x2b   :  { %s4779_s26 = scalar_lea.vmem %s36_s23, 12288  ;;  %p4784_p2 = scmp.lt.s32.totalorder %s36_s23, %s36_s23 }
  0x2c   :  { %p4780_p1 = scmp.ne.s32.totalorder %s36_s23, %s4779_s26  ;;  %p4785_p3 = scmp.lt.s32.totalorder %s4779_s26, %s4779_s26 }
  0x2e   :  { %p4786_p4 = por %p4785_p3, %p4784_p2 }
  0x30   :  { %p4787_p5 = pnand %p4786_p4, %p4780_p1 }
  0x32   :  { %4790 = shalt.err (!%p4787_p5)
}
  0x33   :  { %s4973_s5 = smov 768   ;;  %s4974_s27 = smov 48  }
  0x34   :  { %s6291_s30 = sld [smem:[#allocation62_spill]]  ;;  %s4975_s17 = smov [#allocation7]  }
  0x35   :  { %s61_s18 = sshll.u32 %s4975_s17, 4  ;;  %s62_s18 = int_to_ptr.vmem [resolvable:$true] %s61_s18 }
  0x36   :  { %s4799_s8 = scalar_lea.vmem %s62_s18, 2048  ;;  %p4804_p7 = scmp.lt.s32.totalorder %s62_s18, %s62_s18 }
  0x37   :  { %p4800_p6 = scmp.ne.s32.totalorder %s62_s18, %s4799_s8  ;;  %p4805_p8 = scmp.lt.s32.totalorder %s4799_s8, %s4799_s8 }
  0x39   :  { %p4806_p9 = por %p4805_p8, %p4804_p7 }
  0x3a   :  { %41 = dma.hbm_to_vmem [thread:$0]  %s6291_s30, 12288, %s36_s23, [#allocation3], %s4973_s5, %s4973_s5, %s4974_s27  }
  0x3b   :  { %p4807_p10 = pnand %p4806_p9, %p4800_p6 }
  0x3d   :  { %4810 = shalt.err (!%p4807_p10)
}
  0x3e   :  { %s4976_s0 = smov 64   ;;  %s4977_s19 = smov 4  }
  0x3f   :  { %67 = dma.hbm_to_vmem [thread:$0]  %s6239_s3, 2048, %s62_s18, [#allocation6], %s4976_s0, %s4976_s0, %s4977_s19  }
  0x40   :  { %s4978_s21 = smov [#allocation10]   ;;  %s4979_s23 = smov [#allocation13]  }
  0x41   :  { %s87_s22 = sshll.u32 %s4978_s21, 4  ;;  %s113_s26 = sshll.u32 %s4979_s23, 4  ;;  %s88_s22 = int_to_ptr.vmem [resolvable:$true] %s87_s22  ;;  %s114_s26 = int_to_ptr.vmem [resolvable:$true] %s113_s26 }
  0x42   :  { %s4819_s5 = scalar_lea.vmem %s88_s22, 2048  ;;  %p4824_p12 = scmp.lt.s32.totalorder %s88_s22, %s88_s22 }
  0x43   :  { %p4820_p11 = scmp.ne.s32.totalorder %s88_s22, %s4819_s5  ;;  %p4825_p13 = scmp.lt.s32.totalorder %s4819_s5, %s4819_s5 }
  0x45   :  { %p4826_p0 = por %p4825_p13, %p4824_p12 }
  0x47   :  { %p4827_p1 = pnand %p4826_p0, %p4820_p11 }
  0x49   :  { %4830 = shalt.err (!%p4827_p1)
}
  0x4a   :  { %93 = dma.hbm_to_vmem [thread:$0]  %s6242_s6, 2048, %s88_s22, [#allocation9], %s4976_s0, %s4976_s0, %s4977_s19  }
  0x4b   :  { %s4839_s3 = scalar_lea.vmem %s114_s26, 4096  ;;  %p4844_p3 = scmp.lt.s32.totalorder %s114_s26, %s114_s26 }
  0x4c   :  { %p4840_p2 = scmp.ne.s32.totalorder %s114_s26, %s4839_s3  ;;  %p4845_p4 = scmp.lt.s32.totalorder %s4839_s3, %s4839_s3 }
  0x4e   :  { %p4846_p5 = por %p4845_p4, %p4844_p3 }
  0x50   :  { %p4847_p6 = pnand %p4846_p5, %p4840_p2 }
  0x52   :  { %4850 = shalt.err (!%p4847_p6)
}
  0x53   :  { %119 = dma.hbm_to_vmem [thread:$0]  %s6245_s9, 4096, %s114_s26, [#allocation12], %s4968_s24, %s4968_s24, %s4969_s25  }
  0x54   :  { %s4980_s17 = smov [#allocation14]  }
  0x55   :  { %s127_s18 = sshll.u32 %s4980_s17, 4  ;;  %s128_s18 = int_to_ptr.vmem [resolvable:$true] %s127_s18 }
  0x56   :  { %s4859_s8 = scalar_lea.vmem %s128_s18, 2048  ;;  %p4864_p8 = scmp.lt.s32.totalorder %s128_s18, %s128_s18 }
  0x57   :  { %p4860_p7 = scmp.ne.s32.totalorder %s128_s18, %s4859_s8  ;;  %p4865_p9 = scmp.lt.s32.totalorder %s4859_s8, %s4859_s8 }
  0x59   :  { %p4866_p10 = por %p4865_p9, %p4864_p8 }
  0x5b   :  { %p4867_p11 = pnand %p4866_p10, %p4860_p7 }
  0x5d   :  { %4870 = shalt.err (!%p4867_p11)
}
  0x5e   :  { %133 = dma.hbm_to_vmem [thread:$0]  %s6247_s11, 2048, %s128_s18, [#allocation15], %s4976_s0, %s4976_s0, %s4977_s19  }
  0x5f   :  { %4951 = dma.done.wait [#allocation3], 12288  }
  0x60   :  { %4952 = vsyncadd [#allocation3], 4294955008 }
  0x61   :  { %4953 = dma.done.wait [#allocation6], 14336  }
  0x62   :  { %4954 = vsyncadd [#allocation6], 4294952960 }
  0x63   :  { %4955 = dma.done.wait [#allocation9], 4096  }
  0x64   :  { %4956 = vsyncadd [#allocation9], 4294963200 }
  0x65   :  { %4957 = dma.done.wait [#allocation12], 6144  }
  0x66   :  { %4958 = vsyncadd [#allocation12], 4294961152 }
  0x67   :  { %4959 = dma.done.wait [#allocation15], 2048  }
  0x68   :  { %4960 = vsyncadd [#allocation15], 4294965248  ;;  %v4179_v0 = vld [vmem:[#allocation5 + $0x74] ss:$8 sps:$4 sm:$0xff]   ;;  %v4181_v1 = vld [vmem:[#allocation5 + $0x70] ss:$8 sps:$4 sm:$0xff]  }
  0x69   :  { %893 = vmatprep.subr.bf16.mxu0 %v4179_v0  ;;  %v4182_v2 = vld [vmem:[#allocation5 + $0x174] ss:$8 sps:$4 sm:$0xff]   ;;  %v4184_v3 = vld [vmem:[#allocation5 + $0x170] ss:$8 sps:$4 sm:$0xff]   ;;  %v4185_v4 = vld [vmem:[#allocation5 + $0x64] ss:$8 sps:$4 sm:$0xff]  }
  0x6a   :  { %894 = vmatpush1.bf16.msra.mxu0 %v4181_v1  ;;  %v4187_v5 = vld [vmem:[#allocation5 + $0x60] ss:$8 sps:$4 sm:$0xff]   ;;  %1006 = vmatprep.subr.bf16.mxu1 %v4182_v2  ;;  %v4188_v6 = vld [vmem:[#allocation5 + $0x164] ss:$8 sps:$4 sm:$0xff]   ;;  %v4191_v8 = vld [vmem:[#allocation5 + $0x54] ss:$8 sps:$4 sm:$0xff]  }
  0x6b   :  { %1007 = vmatpush1.bf16.msra.mxu1 %v4184_v3  ;;  %895 = vmatprep.subr.bf16.mxu0 %v4185_v4  ;;  %v4190_v7 = vld [vmem:[#allocation5 + $0x160] ss:$8 sps:$4 sm:$0xff]   ;;  %v4193_v9 = vld [vmem:[#allocation5 + $0x50] ss:$8 sps:$4 sm:$0xff]   ;;  %v4194_v10 = vld [vmem:[#allocation5 + $0x154] ss:$8 sps:$4 sm:$0xff]  }
  0x6c   :  { %1008 = vmatprep.subr.bf16.mxu1 %v4188_v6  ;;  %v4197_v11 = vld [vmem:[#allocation5 + $0x44] ss:$8 sps:$4 sm:$0xff]   ;;  %v4196_v12 = vld [vmem:[#allocation5 + $0x150] ss:$8 sps:$4 sm:$0xff]   ;;  %v4199_v14 = vld [vmem:[#allocation5 + $0x40] ss:$8 sps:$4 sm:$0xff]  }
  0x6d   :  { %v4200_v13 = vld [vmem:[#allocation5 + $0x144] ss:$8 sps:$4 sm:$0xff]   ;;  %v4203_v15 = vld [vmem:[#allocation5 + $0x34] ss:$8 sps:$4 sm:$0xff]   ;;  %v4202_v16 = vld [vmem:[#allocation5 + $0x140] ss:$8 sps:$4 sm:$0xff]  }
  0x6e   :  { %896 = vmatpush1.bf16.msra.mxu0 %v4187_v5  ;;  %v4206_v17 = vld [vmem:[#allocation5 + $0x134] ss:$8 sps:$4 sm:$0xff]   ;;  %v4205_v18 = vld [vmem:[#allocation5 + $0x30] ss:$8 sps:$4 sm:$0xff]   ;;  %v4209_v19 = vld [vmem:[#allocation5 + $0x24] ss:$8 sps:$4 sm:$0xff]  }
  0x6f   :  { %897 = vmatprep.subr.bf16.mxu0 %v4191_v8  ;;  %1009 = vmatpush1.bf16.msra.mxu1 %v4190_v7  ;;  %v4208_v20 = vld [vmem:[#allocation5 + $0x130] ss:$8 sps:$4 sm:$0xff]   ;;  %v4212_v21 = vld [vmem:[#allocation5 + $0x124] ss:$8 sps:$4 sm:$0xff]   ;;  %v4211_v22 = vld [vmem:[#allocation5 + $0x20] ss:$8 sps:$4 sm:$0xff]  }
  0x70   :  { %1010 = vmatprep.subr.bf16.mxu1 %v4194_v10  ;;  %v4215_v23 = vld [vmem:[#allocation5 + $0x14] ss:$8 sps:$4 sm:$0xff]   ;;  %v4214_v24 = vld [vmem:[#allocation5 + $0x120] ss:$8 sps:$4 sm:$0xff]   ;;  %v4217_v26 = vld [vmem:[#allocation5 + $0x10] ss:$8 sps:$4 sm:$0xff]  }
  0x71   :  { %v4218_v25 = vld [vmem:[#allocation5 + $0x114] ss:$8 sps:$4 sm:$0xff]   ;;  %v4221_v27 = vld [vmem:[#allocation5 + $0x4] ss:$8 sps:$4 sm:$0xff]   ;;  %v4220_v28 = vld [vmem:[#allocation5 + $0x110] ss:$8 sps:$4 sm:$0xff]  }
  0x72   :  { %898 = vmatpush1.bf16.msra.mxu0 %v4193_v9  ;;  %v4224_v29 = vld [vmem:[#allocation5 + $0x104] ss:$8 sps:$4 sm:$0xff]   ;;  %v4223_v30 = vld [vmem:[#allocation5] ss:$8 sps:$4 sm:$0xff]   ;;  %v4227_v31 = vld [vmem:[#allocation5 + $0xf4] ss:$8 sps:$4 sm:$0xff]  }
  0x73   :  { %899 = vmatprep.subr.bf16.mxu0 %v4197_v11  ;;  %1011 = vmatpush1.bf16.msra.mxu1 %v4196_v12  ;;  %v4226_v32 = vld [vmem:[#allocation5 + $0x100] ss:$8 sps:$4 sm:$0xff]   ;;  %v4230_v33 = vld [vmem:[#allocation5 + $0x1f4] ss:$8 sps:$4 sm:$0xff]   ;;  %v4229_v34 = vld [vmem:[#allocation5 + $0xf0] ss:$8 sps:$4 sm:$0xff]  }
  0x74   :  { %1012 = vmatprep.subr.bf16.mxu1 %v4200_v13  ;;  %v4233_v35 = vld [vmem:[#allocation5 + $0xe4] ss:$8 sps:$4 sm:$0xff]   ;;  %v4232_v36 = vld [vmem:[#allocation5 + $0x1f0] ss:$8 sps:$4 sm:$0xff]   ;;  %v4235_v38 = vld [vmem:[#allocation5 + $0xe0] ss:$8 sps:$4 sm:$0xff]  }
  0x75   :  { %v4236_v37 = vld [vmem:[#allocation5 + $0x1e4] ss:$8 sps:$4 sm:$0xff]   ;;  %v4239_v39 = vld [vmem:[#allocation5 + $0xd4] ss:$8 sps:$4 sm:$0xff]   ;;  %v4238_v40 = vld [vmem:[#allocation5 + $0x1e0] ss:$8 sps:$4 sm:$0xff]  }
  0x76   :  { %900 = vmatpush1.bf16.msra.mxu0 %v4199_v14  ;;  %v4242_v41 = vld [vmem:[#allocation5 + $0x1d4] ss:$8 sps:$4 sm:$0xff]   ;;  %v4241_v42 = vld [vmem:[#allocation5 + $0xd0] ss:$8 sps:$4 sm:$0xff]   ;;  %v4245_v43 = vld [vmem:[#allocation5 + $0xc4] ss:$8 sps:$4 sm:$0xff]  }
  0x77   :  { %901 = vmatprep.subr.bf16.mxu0 %v4203_v15  ;;  %1013 = vmatpush1.bf16.msra.mxu1 %v4202_v16  ;;  %v4244_v44 = vld [vmem:[#allocation5 + $0x1d0] ss:$8 sps:$4 sm:$0xff]   ;;  %v4248_v45 = vld [vmem:[#allocation5 + $0x1c4] ss:$8 sps:$4 sm:$0xff]   ;;  %v4247_v48 = vld [vmem:[#allocation5 + $0xc0] ss:$8 sps:$4 sm:$0xff]  }
  0x78   :  { %1014 = vmatprep.subr.bf16.mxu1 %v4206_v17  ;;  %v162_v46 = vld [vmem:[#allocation2 + $0x8] sm:$0xff]  ;;  %v168_v47 = vld [vmem:[#allocation2 + $0x38] sm:$0xff]  ;;  %v161_v5 = vld [vmem:[#allocation2] sm:$0xff]  ;;  %vm2648_vm0 = vcmask 1041409   ;;  %vm2650_vm1 = vcmask 1042434   ;;  %vm2652_vm2 = vcmask 1043459  }
  0x79   :  { %v258_v49 = vpack.c.bf16 %v168_v47, %v162_v46  ;;  %v4251_v50 = vld [vmem:[#allocation5 + $0xb4] ss:$8 sps:$4 sm:$0xff]   ;;  %v4250_v51 = vld [vmem:[#allocation5 + $0x1c0] ss:$8 sps:$4 sm:$0xff]   ;;  %v4253_v56 = vld [vmem:[#allocation5 + $0xb0] ss:$8 sps:$4 sm:$0xff]  }
  0x7a   :  { %902 = vmatpush1.bf16.msra.mxu0 %v4205_v18  ;;  %v164_v52 = vld [vmem:[#allocation2 + $0x18] sm:$0xff]  ;;  %v170_v53 = vld [vmem:[#allocation2 + $0x48] sm:$0xff]  ;;  %v167_v6 = vld [vmem:[#allocation2 + $0x30] sm:$0xff]  ;;  %vm2654_vm3 = vcmask 1044484   ;;  %vm2656_vm4 = vcmask 1045509   ;;  %vm2658_vm5 = vcmask 1046534  }
  0x7b   :  { %903 = vmatprep.subr.bf16.mxu0 %v4209_v19  ;;  %1015 = vmatpush1.bf16.msra.mxu1 %v4208_v20  ;;  %v4254_v54 = vld [vmem:[#allocation5 + $0x1b4] ss:$8 sps:$4 sm:$0xff]   ;;  %v260_v55 = vpack.c.bf16 %v170_v53, %v164_v52  ;;  %v4257_v57 = vld [vmem:[#allocation5 + $0xa4] ss:$8 sps:$4 sm:$0xff]   ;;  %v4256_v58 = vld [vmem:[#allocation5 + $0x1b0] ss:$8 sps:$4 sm:$0xff]   ;;  %v257_v13 = vpack.c.bf16 %v167_v6, %v161_v5 }
  0x7c   :  { %1016 = vmatprep.subr.bf16.mxu1 %v4212_v21  ;;  %925 = vmatprep.mubr.bf16.mxu0 %v258_v49  ;;  %v4260_v59 = vld [vmem:[#allocation5 + $0x1a4] ss:$8 sps:$4 sm:$0xff]   ;;  %v4259_v60 = vld [vmem:[#allocation5 + $0xa0] ss:$8 sps:$4 sm:$0xff]   ;;  %v4263_v61 = vld [vmem:[#allocation5 + $0x94] ss:$8 sps:$4 sm:$0xff]  }
  0x7d   :  { %1038 = vmatprep.mubr.bf16.mxu1 %v260_v55  ;;  %v4262_v62 = vld [vmem:[#allocation5 + $0x1a0] ss:$8 sps:$4 sm:$0xff]   ;;  %v4266_v63 = vld [vmem:[#allocation5 + $0x194] ss:$8 sps:$4 sm:$0xff]   ;;  %v4265_v0 = vld [vmem:[#allocation5 + $0x90] ss:$8 sps:$4 sm:$0xff]  }
  0x7e   :  { %904 = vmatpush1.bf16.msra.mxu0 %v4211_v22  ;;  %v4269_v1 = vld [vmem:[#allocation5 + $0x84] ss:$8 sps:$4 sm:$0xff]   ;;  %v4268_v2 = vld [vmem:[#allocation5 + $0x190] ss:$8 sps:$4 sm:$0xff]   ;;  %v4271_v3 = vld [vmem:[#allocation5 + $0x80] ss:$8 sps:$4 sm:$0xff]  }
  0x7f   :  { %905 = vmatprep.subr.bf16.mxu0 %v4215_v23  ;;  %1017 = vmatpush1.bf16.msra.mxu1 %v4214_v24  ;;  %v4272_v4 = vld [vmem:[#allocation5 + $0x184] ss:$8 sps:$4 sm:$0xff]   ;;  %v4277_v7 = vld [vmem:[#allocation5 + $0x274] ss:$8 sps:$4 sm:$0xff]   ;;  %v4274_v10 = vld [vmem:[#allocation5 + $0x180] ss:$8 sps:$4 sm:$0xff]  }
  0x80   :  { %1018 = vmatprep.subr.bf16.mxu1 %v4218_v25  ;;  %v174_v8 = vld [vmem:[#allocation2 + $0x68] sm:$0xff]  ;;  %v180_v9 = vld [vmem:[#allocation2 + $0x98] sm:$0xff]  ;;  %v163_v11 = vld [vmem:[#allocation2 + $0x10] sm:$0xff]  ;;  %vm2660_vm6 = vcmask 1047559   ;;  %vm3673_vm7 = vcmask 130112   ;;  %vm3680_vm8 = vcmask 195712  }
  0x81   :  { %v169_v12 = vld [vmem:[#allocation2 + $0x40] sm:$0xff]  ;;  %v176_v14 = vld [vmem:[#allocation2 + $0x78] sm:$0xff]  ;;  %v182_v15 = vld [vmem:[#allocation2 + $0xa8] sm:$0xff]  ;;  %v264_v17 = vpack.c.bf16 %v180_v9, %v174_v8  ;;  %vm3687_vm9 = vcmask 261312   ;;  %vm3694_vm10 = vcmask 326912   ;;  %vm3701_vm11 = vcmask 392512  }
  0x82   :  { %906 = vmatpush1.bf16.msra.mxu0 %v4217_v26  ;;  %v4275_v16 = vld [vmem:[#allocation5 + $0x270] ss:$8 sps:$4 sm:$0xff]   ;;  %v259_v18 = vpack.c.bf16 %v169_v12, %v163_v11  ;;  %v4280_v19 = vld [vmem:[#allocation5 + $0x264] ss:$8 sps:$4 sm:$0xff]   ;;  %v266_v20 = vpack.c.bf16 %v182_v15, %v176_v14  ;;  %v4278_v21 = vld [vmem:[#allocation5 + $0x260] ss:$8 sps:$4 sm:$0xff]  }
  0x83   :  { %907 = vmatprep.subr.bf16.mxu0 %v4221_v27  ;;  %1019 = vmatpush1.bf16.msra.mxu1 %v4220_v28  ;;  %v173_v22 = vld [vmem:[#allocation2 + $0x60] sm:$0xff]  ;;  %v179_v23 = vld [vmem:[#allocation2 + $0x90] sm:$0xff]  ;;  %v186_v25 = vld [vmem:[#allocation2 + $0xc8] sm:$0xff]  ;;  %vm3708_vm12 = vcmask 458112   ;;  %vm3715_vm13 = vcmask 523712   ;;  %vm3758_vm14 = vcmask 517120  }
  0x84   :  { %1020 = vmatprep.subr.bf16.mxu1 %v4224_v29  ;;  %v4283_v24 = vld [vmem:[#allocation5 + $0x254] ss:$8 sps:$4 sm:$0xff]   ;;  %v181_v28 = vld [vmem:[#allocation2 + $0xa0] sm:$0xff]  ;;  %v263_v29 = vpack.c.bf16 %v179_v23, %v173_v22  ;;  %v206_v47 = vld [vmem:[#allocation2 + $0x168] sm:$0xff]  ;;  %vm3778_vm15 = vcmask 58368   ;;  %s4983_s19 = smov [#allocation16]  }
  0x85   :  { %v192_v26 = vld [vmem:[#allocation2 + $0xf8] sm:$0xff]  ;;  %v175_v27 = vld [vmem:[#allocation2 + $0x70] sm:$0xff]  ;;  %v4290_v53 = vld [vmem:[#allocation5 + $0x220] ss:$8 sps:$4 sm:$0xff]  }
  0x86   :  { %908 = vmatpush1.bf16.msra.mxu0 %v4223_v30  ;;  %v188_v30 = vld [vmem:[#allocation2 + $0xd8] sm:$0xff]  ;;  %v203_v55 = vld [vmem:[#allocation2 + $0x150] sm:$0xff]  ;;  %v4296_v5 = vld [vmem:[#allocation5 + $0x200] ss:$8 sps:$4 sm:$0xff]  }
  0x87   :  { %909 = vmatprep.subr.bf16.mxu0 %v4227_v31  ;;  %1021 = vmatpush1.bf16.msra.mxu1 %v4226_v32  ;;  %v194_v31 = vld [vmem:[#allocation2 + $0x108] sm:$0xff]  ;;  %v4281_v32 = vld [vmem:[#allocation5 + $0x250] ss:$8 sps:$4 sm:$0xff]   ;;  %v209_v6 = vld [vmem:[#allocation2 + $0x180] sm:$0xff] }
  0x88   :  { %1022 = vmatprep.subr.bf16.mxu1 %v4230_v33  ;;  %v270_v33 = vpack.c.bf16 %v192_v26, %v186_v25  ;;  %v200_v46 = vld [vmem:[#allocation2 + $0x138] sm:$0xff]  ;;  %v222_v9 = vld [vmem:[#allocation2 + $0x1e8] sm:$0xff]  ;;  %v211_v11 = vld [vmem:[#allocation2 + $0x190] sm:$0xff] }
  0x89   :  { %v278_v52 = vpack.c.bf16 %v206_v47, %v200_v46  ;;  %v4301_v8 = vld [vmem:[#allocation5 + $0x2f4] ss:$8 sps:$4 sm:$0xff]   ;;  %v217_v12 = vld [vmem:[#allocation2 + $0x1c0] sm:$0xff]  ;;  %v230_v15 = vld [vmem:[#allocation2 + $0x228] sm:$0xff] }
  0x8a   :  { %910 = vmatpush2.bf16.msra.mxu0 %v4229_v34  ;;  %v265_v34 = vpack.c.bf16 %v181_v28, %v175_v27  ;;  %v224_v14 = vld [vmem:[#allocation2 + $0x1f8] sm:$0xff]  ;;  %v227_v22 = vld [vmem:[#allocation2 + $0x210] sm:$0xff]  ;;  %v234_v25 = vld [vmem:[#allocation2 + $0x248] sm:$0xff] }
  0x8b   :  { %911 = vmatprep.subr.bf16.mxu0 %v4233_v35  ;;  %1023 = vmatpush2.bf16.msra.mxu1 %v4232_v36  ;;  %v4286_v35 = vld [vmem:[#allocation5 + $0x244] ss:$8 sps:$4 sm:$0xff]   ;;  %v272_v36 = vpack.c.bf16 %v194_v31, %v188_v30  ;;  %v290_v23 = vpack.c.bf16 %v230_v15, %v224_v14  ;;  %v240_v26 = vld [vmem:[#allocation2 + $0x278] sm:$0xff]  ;;  %v223_v27 = vld [vmem:[#allocation2 + $0x1f0] sm:$0xff] }
  0x8c   :  { %1024 = vmatprep.subr.bf16.mxu1 %v4236_v37  ;;  %v4284_v37 = vld [vmem:[#allocation5 + $0x240] ss:$8 sps:$4 sm:$0xff]   ;;  %v4305_v31 = vld [vmem:[#allocation5 + $0x2d0] ss:$8 sps:$4 sm:$0xff]  }
  0x8d   :  { %v229_v28 = vld [vmem:[#allocation2 + $0x220] sm:$0xff]  ;;  %v242_v30 = vld [vmem:[#allocation2 + $0x288] sm:$0xff]  ;;  %v4311_v47 = vld [vmem:[#allocation5 + $0x2b0] ss:$8 sps:$4 sm:$0xff]  }
  0x8e   :  { %912 = vmatpush2.bf16.msra.mxu0 %v4235_v38  ;;  %v185_v38 = vld [vmem:[#allocation2 + $0xc0] sm:$0xff]  ;;  %v254_v46 = vld [vmem:[#allocation2 + $0x2e8] sm:$0xff] }
  0x8f   :  { %913 = vmatprep.subr.bf16.mxu0 %v4239_v39  ;;  %1025 = vmatpush2.bf16.msra.mxu1 %v4238_v40  ;;  %v191_v39 = vld [vmem:[#allocation2 + $0xf0] sm:$0xff]  ;;  %v189_v15 = vld [vmem:[#allocation2 + $0xe0] sm:$0xff] }
  0x90   :  { %1026 = vmatprep.subr.bf16.mxu1 %v4242_v41  ;;  %v4289_v40 = vld [vmem:[#allocation5 + $0x234] ss:$8 sps:$4 sm:$0xff]   ;;  %v198_v41 = vld [vmem:[#allocation2 + $0x128] sm:$0xff] }
  0x92   :  { %914 = vmatpush2.bf16.msra.mxu0 %v4241_v42  ;;  %v204_v42 = vld [vmem:[#allocation2 + $0x158] sm:$0xff] }
  0x93   :  { %915 = vmatprep.subr.bf16.mxu0 %v4245_v43  ;;  %1027 = vmatpush2.bf16.msra.mxu1 %v4244_v44  ;;  %v187_v43 = vld [vmem:[#allocation2 + $0xd0] sm:$0xff]  ;;  %v193_v44 = vld [vmem:[#allocation2 + $0x100] sm:$0xff]  ;;  %v276_v49 = vpack.c.bf16 %v204_v42, %v198_v41  ;;  %v246_v41 = vld [vmem:[#allocation2 + $0x2a8] sm:$0xff] }
  0x94   :  { %1028 = vmatprep.subr.bf16.mxu1 %v4248_v45  ;;  %v269_v45 = vpack.c.bf16 %v191_v39, %v185_v38  ;;  %v239_v38 = vld [vmem:[#allocation2 + $0x270] sm:$0xff]  ;;  %v252_v42 = vld [vmem:[#allocation2 + $0x2d8] sm:$0xff] }
  0x96   :  { %916 = vmatpush2.bf16.msra.mxu0 %v4247_v48  ;;  %v4287_v48 = vld [vmem:[#allocation5 + $0x230] ss:$8 sps:$4 sm:$0xff]  }
  0x97   :  { %917 = vmatprep.subr.bf16.mxu0 %v4251_v50  ;;  %1029 = vmatpush2.bf16.msra.mxu1 %v4250_v51  ;;  %v271_v50 = vpack.c.bf16 %v193_v44, %v187_v43  ;;  %v4292_v51 = vld [vmem:[#allocation5 + $0x224] ss:$8 sps:$4 sm:$0xff]   ;;  %v235_v43 = vld [vmem:[#allocation2 + $0x250] sm:$0xff] }
  0x98   :  { %1030 = vmatprep.subr.bf16.mxu1 %v4254_v54  ;;  %v197_v54 = vld [vmem:[#allocation2 + $0x120] sm:$0xff] }
  0x99   :  { %v241_v44 = vld [vmem:[#allocation2 + $0x280] sm:$0xff] }
  0x9a   :  { %918 = vmatpush2.bf16.msra.mxu0 %v4253_v56  ;;  %v4295_v56 = vld [vmem:[#allocation5 + $0x214] ss:$8 sps:$4 sm:$0xff]  }
  0x9b   :  { %919 = vmatprep.subr.bf16.mxu0 %v4257_v57  ;;  %1031 = vmatpush2.bf16.msra.mxu1 %v4256_v58  ;;  %v210_v57 = vld [vmem:[#allocation2 + $0x188] sm:$0xff]  ;;  %v216_v58 = vld [vmem:[#allocation2 + $0x1b8] sm:$0xff] }
  0x9c   :  { %1032 = vmatprep.subr.bf16.mxu1 %v4260_v59  ;;  %v199_v59 = vld [vmem:[#allocation2 + $0x130] sm:$0xff] }
  0x9e   :  { %920 = vmatpush2.bf16.msra.mxu0 %v4259_v60  ;;  %v205_v60 = vld [vmem:[#allocation2 + $0x160] sm:$0xff] }
  0x9f   :  { %921 = vmatprep.subr.bf16.mxu0 %v4263_v61  ;;  %1033 = vmatpush2.bf16.msra.mxu1 %v4262_v62  ;;  %v275_v61 = vpack.c.bf16 %v203_v55, %v197_v54  ;;  %v212_v62 = vld [vmem:[#allocation2 + $0x198] sm:$0xff]  ;;  %v251_v54 = vld [vmem:[#allocation2 + $0x2d0] sm:$0xff] }
  0xa0   :  { %1034 = vmatprep.subr.bf16.mxu1 %v4266_v63  ;;  %v218_v63 = vld [vmem:[#allocation2 + $0x1c8] sm:$0xff] }
  0xa2   :  { %922 = vmatpush2.bf16.msra.mxu0 %v4265_v0  ;;  %v4293_v0 = vld [vmem:[#allocation5 + $0x210] ss:$8 sps:$4 sm:$0xff]  }
  0xa3   :  { %923 = vmatprep.subr.bf16.mxu0 %v4269_v1  ;;  %1035 = vmatpush2.bf16.msra.mxu1 %v4268_v2  ;;  %v282_v1 = vpack.c.bf16 %v216_v58, %v210_v57  ;;  %v277_v2 = vpack.c.bf16 %v205_v60, %v199_v59  ;;  %v166_v57 = vld [vmem:[#allocation2 + $0x28] sm:$0xff]  ;;  %v172_v58 = vld [vmem:[#allocation2 + $0x58] sm:$0xff]  ;;  %v247_v59 = vld [vmem:[#allocation2 + $0x2b0] sm:$0xff] }
  0xa4   :  { %1036 = vmatprep.subr.bf16.mxu1 %v4272_v4  ;;  %v284_v4 = vpack.c.bf16 %v218_v63, %v212_v62  ;;  %v253_v60 = vld [vmem:[#allocation2 + $0x2e0] sm:$0xff] }
  0xa5   :  { %v4322_v63 = vld [vmem:[#allocation5 + $0x284] ss:$8 sps:$4 sm:$0xff]  }
  0xa6   :  { %924 = vmatpush2.bf16.msra.mxu0 %v4271_v3  ;;  %v4298_v3 = vld [vmem:[#allocation5 + $0x204] ss:$8 sps:$4 sm:$0xff]  }
  0xa7   :  { %1119 = vmatprep.subr.bf16.mxu0 %v4277_v7  ;;  %1037 = vmatpush2.bf16.msra.mxu1 %v4274_v10  ;;  %v215_v7 = vld [vmem:[#allocation2 + $0x1b0] sm:$0xff]  ;;  %v228_v10 = vld [vmem:[#allocation2 + $0x218] sm:$0xff] }
  0xa9   :  { %926 = vmatmul.mubr.bf16.vlgmr.msra.gmra.mxu0 %v257_v13  ;;  %v281_v13 = vpack.c.bf16 %v215_v7, %v209_v6  ;;  %v184_v6 = vld [vmem:[#allocation2 + $0xb8] sm:$0xff] }
  0xaa   :  { %1120 = vmatpush1.bf16.msra.mxu0 %v4275_v16  ;;  %935 = vmatprep.mubr.bf16.mxu0 %v264_v17  ;;  %v4299_v16 = vld [vmem:[#allocation5 + $0x2f0] ss:$8 sps:$4 sm:$0xff]   ;;  %v288_v17 = vpack.c.bf16 %v228_v10, %v222_v9  ;;  %v177_v9 = vld [vmem:[#allocation2 + $0x80] sm:$0xff] }
  0xab   :  { %1039 = vmatmul.mubr.bf16.vlgmr.msra.gmra.mxu1 %v259_v18  ;;  %1121 = vmatprep.subr.bf16.mxu0 %v4280_v19  ;;  %v283_v18 = vpack.c.bf16 %v217_v12, %v211_v11  ;;  %v4304_v19 = vld [vmem:[#allocation5 + $0x2e4] ss:$8 sps:$4 sm:$0xff]   ;;  %v183_v10 = vld [vmem:[#allocation2 + $0xb0] sm:$0xff]  ;;  %v196_v12 = vld [vmem:[#allocation2 + $0x118] sm:$0xff] }
  0xac   :  { %1048 = vmatprep.mubr.bf16.mxu1 %v266_v20  ;;  %v4302_v20 = vld [vmem:[#allocation5 + $0x2e0] ss:$8 sps:$4 sm:$0xff]  }
  0xad   :  { %v190_v11 = vld [vmem:[#allocation2 + $0xe8] sm:$0xff] }
  0xae   :  { %1122 = vmatpush1.bf16.msra.mxu0 %v4278_v21  ;;  %v221_v21 = vld [vmem:[#allocation2 + $0x1e0] sm:$0xff]  ;;  %v274_v14 = vpack.c.bf16 %v196_v12, %v190_v11 }
  0xaf   :  { %1123 = vmatprep.subr.bf16.mxu0 %v4283_v24  ;;  %v4307_v24 = vld [vmem:[#allocation5 + $0x2d4] ss:$8 sps:$4 sm:$0xff]  }
  0xb1   :  { %936 = vmatmul.mubr.bf16.gmra.mxu0 %v263_v29  ;;  %v236_v29 = vld [vmem:[#allocation2 + $0x258] sm:$0xff] }
  0xb2   :  { %1124 = vmatpush1.bf16.msra.mxu0 %v4281_v32  ;;  %945 = vmatprep.mubr.bf16.mxu0 %v270_v33  ;;  %v287_v32 = vpack.c.bf16 %v227_v22, %v221_v21  ;;  %v4310_v33 = vld [vmem:[#allocation5 + $0x2c4] ss:$8 sps:$4 sm:$0xff]   ;;  %v296_v39 = vpack.c.bf16 %v242_v30, %v236_v29  ;;  %v207_v22 = vld [vmem:[#allocation2 + $0x170] sm:$0xff]  ;;  %v232_v30 = vld [vmem:[#allocation2 + $0x238] sm:$0xff] }
  0xb3   :  { %1049 = vmatmul.mubr.bf16.gmra.mxu1 %v265_v34  ;;  %1125 = vmatprep.subr.bf16.mxu0 %v4286_v35  ;;  %v294_v34 = vpack.c.bf16 %v240_v26, %v234_v25  ;;  %v289_v35 = vpack.c.bf16 %v229_v28, %v223_v27  ;;  %v201_v21 = vld [vmem:[#allocation2 + $0x140] sm:$0xff]  ;;  %v219_v28 = vld [vmem:[#allocation2 + $0x1d0] sm:$0xff]  ;;  %v226_v29 = vld [vmem:[#allocation2 + $0x208] sm:$0xff] }
  0xb4   :  { %1058 = vmatprep.mubr.bf16.mxu1 %v272_v36  ;;  %v4308_v36 = vld [vmem:[#allocation5 + $0x2c0] ss:$8 sps:$4 sm:$0xff]   ;;  %v279_v25 = vpack.c.bf16 %v207_v22, %v201_v21 }
  0xb5   :  { %v213_v27 = vld [vmem:[#allocation2 + $0x1a0] sm:$0xff] }
  0xb6   :  { %1126 = vmatpush1.bf16.msra.mxu0 %v4284_v37  ;;  %v233_v37 = vld [vmem:[#allocation2 + $0x240] sm:$0xff] }
  0xb7   :  { %1127 = vmatprep.subr.bf16.mxu0 %v4289_v40  ;;  %v4313_v40 = vld [vmem:[#allocation5 + $0x2b4] ss:$8 sps:$4 sm:$0xff]  }
  0xb9   :  { %946 = vmatmul.mubr.bf16.gmra.mxu0 %v269_v45  ;;  %v248_v45 = vld [vmem:[#allocation2 + $0x2b8] sm:$0xff] }
  0xba   :  { %1128 = vmatpush1.bf16.msra.mxu0 %v4287_v48  ;;  %955 = vmatprep.mubr.bf16.mxu0 %v276_v49  ;;  %v293_v48 = vpack.c.bf16 %v239_v38, %v233_v37  ;;  %v4316_v49 = vld [vmem:[#allocation5 + $0x2a4] ss:$8 sps:$4 sm:$0xff]   ;;  %v302_v55 = vpack.c.bf16 %v254_v46, %v248_v45  ;;  %v244_v38 = vld [vmem:[#allocation2 + $0x298] sm:$0xff] }
  0xbb   :  { %1059 = vmatmul.mubr.bf16.gmra.mxu1 %v271_v50  ;;  %1129 = vmatprep.subr.bf16.mxu0 %v4292_v51  ;;  %v300_v50 = vpack.c.bf16 %v252_v42, %v246_v41  ;;  %v295_v51 = vpack.c.bf16 %v241_v44, %v235_v43  ;;  %v238_v37 = vld [vmem:[#allocation2 + $0x268] sm:$0xff]  ;;  %v237_v43 = vld [vmem:[#allocation2 + $0x260] sm:$0xff]  ;;  %v243_v44 = vld [vmem:[#allocation2 + $0x290] sm:$0xff] }
  0xbc   :  { %1068 = vmatprep.mubr.bf16.mxu1 %v278_v52  ;;  %v4314_v52 = vld [vmem:[#allocation5 + $0x2a0] ss:$8 sps:$4 sm:$0xff]   ;;  %v298_v42 = vpack.c.bf16 %v244_v38, %v238_v37  ;;  %v256_v46 = vld [vmem:[#allocation2 + $0x2f8] sm:$0xff] }
  0xbd   :  { %v250_v45 = vld [vmem:[#allocation2 + $0x2c8] sm:$0xff] }
  0xbe   :  { %1130 = vmatpush1.bf16.msra.mxu0 %v4290_v53  ;;  %v245_v53 = vld [vmem:[#allocation2 + $0x2a0] sm:$0xff] }
  0xbf   :  { %1131 = vmatprep.subr.bf16.mxu0 %v4295_v56  ;;  %v4319_v56 = vld [vmem:[#allocation5 + $0x294] ss:$8 sps:$4 sm:$0xff]   ;;  %v299_v62 = vpack.c.bf16 %v251_v54, %v245_v53  ;;  %v4329_v53 = vld [vmem:[#allocation7 + $0x60] sm:$0xff]  }
  0xc0   :  { %v4330_v54 = vld [vmem:[#allocation7 + $0x20] sm:$0xff]  }
  0xc1   :  { %956 = vmatmul.mubr.bf16.gmra.mxu0 %v275_v61  ;;  %v4317_v61 = vld [vmem:[#allocation5 + $0x290] ss:$8 sps:$4 sm:$0xff]  }
  0xc2   :  { %1132 = vmatpush1.bf16.msra.mxu0 %v4293_v0  ;;  %965 = vmatprep.mubr.bf16.mxu0 %v282_v1  ;;  %v262_v0 = vpack.c.bf16 %v172_v58, %v166_v57  ;;  %v301_v1 = vpack.c.bf16 %v253_v60, %v247_v59  ;;  %v4332_v57 = vld [vmem:[#allocation7 + $0x18] sm:$0xff]   ;;  %v4333_v58 = vld [vmem:[#allocation7 + $0x50] sm:$0xff]   ;;  %v4335_v60 = vld [vmem:[#allocation7 + $0x48] sm:$0xff]  }
  0xc3   :  { %1069 = vmatmul.mubr.bf16.gmra.mxu1 %v277_v2  ;;  %1133 = vmatprep.subr.bf16.mxu0 %v4298_v3  ;;  %v4320_v2 = vld [vmem:[#allocation5 + $0x280] ss:$8 sps:$4 sm:$0xff]   ;;  %v4334_v59 = vld [vmem:[#allocation7 + $0x10] sm:$0xff]  }
  0xc4   :  { %1078 = vmatprep.mubr.bf16.mxu1 %v284_v4  ;;  %v165_v3 = vld [vmem:[#allocation2 + $0x20] sm:$0xff]  ;;  %v171_v4 = vld [vmem:[#allocation2 + $0x50] sm:$0xff] }
  0xc5   :  { %v261_v7 = vpack.c.bf16 %v171_v4, %v165_v3 }
  0xc6   :  { %1134 = vmatpush1.bf16.msra.mxu0 %v4296_v5  ;;  %v178_v5 = vld [vmem:[#allocation2 + $0x88] sm:$0xff] }
  0xc7   :  { %1135 = vmatprep.subr.bf16.mxu0 %v4301_v8  ;;  %v268_v8 = vpack.c.bf16 %v184_v6, %v178_v5 }
  0xc9   :  { %966 = vmatmul.mubr.bf16.gmra.mxu0 %v281_v13  ;;  %v267_v13 = vpack.c.bf16 %v183_v10, %v177_v9 }
  0xca   :  { %1136 = vmatpush2.bf16.msra.mxu0 %v4299_v16  ;;  %975 = vmatprep.mubr.bf16.mxu0 %v288_v17  ;;  %v195_v16 = vld [vmem:[#allocation2 + $0x110] sm:$0xff]  ;;  %v202_v17 = vld [vmem:[#allocation2 + $0x148] sm:$0xff] }
  0xcb   :  { %1079 = vmatmul.mubr.bf16.gmra.mxu1 %v283_v18  ;;  %1137 = vmatprep.subr.bf16.mxu0 %v4304_v19  ;;  %v208_v18 = vld [vmem:[#allocation2 + $0x178] sm:$0xff]  ;;  %v273_v19 = vpack.c.bf16 %v195_v16, %v189_v15 }
  0xcc   :  { %1088 = vmatprep.mubr.bf16.mxu1 %v290_v23  ;;  %v214_v23 = vld [vmem:[#allocation2 + $0x1a8] sm:$0xff]  ;;  %v4339_v16 = vld [vmem:[#allocation8 + $0x70] ss:$8 sps:$4 sm:$0xff]  }
  0xce   :  { %1138 = vmatpush2.bf16.msra.mxu0 %v4302_v20  ;;  %v280_v20 = vpack.c.bf16 %v208_v18, %v202_v17  ;;  %v4341_v17 = vld [vmem:[#allocation8 + $0x74] ss:$8 sps:$4 sm:$0xff]   ;;  %v4344_v18 = vld [vmem:[#allocation8 + $0x64] ss:$8 sps:$4 sm:$0xff]  }
  0xcf   :  { %1139 = vmatprep.subr.bf16.mxu0 %v4307_v24  ;;  %v220_v24 = vld [vmem:[#allocation2 + $0x1d8] sm:$0xff] }
  0xd0   :  { %v286_v26 = vpack.c.bf16 %v220_v24, %v214_v23  ;;  %v4347_v23 = vld [vmem:[#allocation8 + $0x54] ss:$8 sps:$4 sm:$0xff]  }
  0xd1   :  { %976 = vmatmul.mubr.bf16.gmra.mxu0 %v287_v32  ;;  %v4324_v32 = vld [vmem:[#allocation7 + $0x38] sm:$0xff]  }
  0xd2   :  { %1140 = vmatpush2.bf16.msra.mxu0 %v4305_v31  ;;  %985 = vmatprep.mubr.bf16.mxu0 %v294_v34  ;;  %v4323_v31 = vld [vmem:[#allocation7 + $0x78] sm:$0xff]   ;;  %v292_v34 = vpack.c.bf16 %v232_v30, %v226_v29  ;;  %v4348_v30 = vld [vmem:[#allocation8 + $0x40] ss:$8 sps:$4 sm:$0xff]  }
  0xd3   :  { %1089 = vmatmul.mubr.bf16.gmra.mxu1 %v289_v35  ;;  %1141 = vmatprep.subr.bf16.mxu0 %v4310_v33  ;;  %v285_v33 = vpack.c.bf16 %v219_v28, %v213_v27  ;;  %v225_v35 = vld [vmem:[#allocation2 + $0x200] sm:$0xff] }
  0xd4   :  { %1098 = vmatprep.mubr.bf16.mxu1 %v296_v39  ;;  %4051 = vmatprep.subr.bf16.mxu1 %v4323_v31  ;;  %v4325_v39 = vld [vmem:[#allocation7 + $0x70] sm:$0xff]   ;;  %v4350_v28 = vld [vmem:[#allocation8 + $0x44] ss:$8 sps:$4 sm:$0xff]  }
  0xd5   :  { %4052 = vmatpush3.bf16.msra.mxu1 %v4324_v32 }
  0xd6   :  { %1142 = vmatpush2.bf16.msra.mxu0 %v4308_v36  ;;  %v231_v36 = vld [vmem:[#allocation2 + $0x230] sm:$0xff]  ;;  %4053 = vmatprep.subr.bf16.mxu1 %v4325_v39 }
  0xd7   :  { %1143 = vmatprep.subr.bf16.mxu0 %v4313_v40  ;;  %v4326_v40 = vld [vmem:[#allocation7 + $0x30] sm:$0xff]   ;;  %v291_v41 = vpack.c.bf16 %v231_v36, %v225_v35 }
  0xd8   :  { %v4351_v35 = vld [vmem:[#allocation8 + $0x30] ss:$8 sps:$4 sm:$0xff]  }
  0xd9   :  { %986 = vmatmul.mubr.bf16.gmra.mxu0 %v293_v48  ;;  %4054 = vmatpush3.bf16.msra.mxu1 %v4326_v40  ;;  %v4328_v48 = vld [vmem:[#allocation7 + $0x28] sm:$0xff]  }
  0xda   :  { %1144 = vmatpush2.bf16.msra.mxu0 %v4311_v47  ;;  %995 = vmatprep.mubr.bf16.mxu0 %v300_v50  ;;  %v4327_v47 = vld [vmem:[#allocation7 + $0x68] sm:$0xff]   ;;  %v304_v50 = vpack.c.bf16 %v256_v46, %v250_v45 }
  0xdb   :  { %1099 = vmatmul.mubr.bf16.gmra.mxu1 %v295_v51  ;;  %1145 = vmatprep.subr.bf16.mxu0 %v4316_v49  ;;  %v297_v49 = vpack.c.bf16 %v243_v44, %v237_v43  ;;  %v249_v51 = vld [vmem:[#allocation2 + $0x2c0] sm:$0xff] }
  0xdc   :  { %1108 = vmatprep.mubr.bf16.mxu1 %v302_v55  ;;  %4055 = vmatprep.subr.bf16.mxu1 %v4327_v47  ;;  %v6255_v47 = vlaneseq }
  0xdd   :  { %4056 = vmatpush3.bf16.msra.mxu1 %v4328_v48 }
  0xde   :  { %1146 = vmatpush2.bf16.msra.mxu0 %v4314_v52  ;;  %v255_v52 = vld [vmem:[#allocation2 + $0x2f0] sm:$0xff]  ;;  %4057 = vmatprep.subr.bf16.mxu1 %v4329_v53 }
  0xdf   :  { %1147 = vmatprep.subr.bf16.mxu0 %v4319_v56  ;;  %v303_v55 = vpack.c.bf16 %v255_v52, %v249_v51  ;;  %v4331_v56 = vld [vmem:[#allocation7 + $0x58] sm:$0xff]   ;;  %v5198_v51 = vshrl.u32 %v6255_v47, 7 }
  0xe1   :  { %996 = vmatmul.mubr.bf16.gmra.mxu0 %v299_v62  ;;  %4058 = vmatpush3.bf16.msra.mxu1 %v4330_v54  ;;  %v4337_v62 = vld [vmem:[#allocation7 + $0x40] sm:$0xff]   ;;  %6292 = vst [vmem:[#allocation30_spill] sm:$0xff] %v5198_v51  ;;  %v6253_v53 = vsub.s32 1, %v5198_v51 }
  0xe2   :  { %1148 = vmatpush2.bf16.msra.mxu0 %v4317_v61  ;;  %1151 = vmatprep.mubr.bf16.mxu0 %v262_v0  ;;  %v4336_v61 = vld [vmem:[#allocation7 + $0x8] sm:$0xff]  }
  0xe3   :  { %1109 = vmatmul.mubr.bf16.gmra.mxu1 %v301_v1  ;;  %1149 = vmatprep.subr.bf16.mxu0 %v4322_v63  ;;  %v4338_v63 = vld [vmem:[#allocation7] sm:$0xff]  }
  0xe4   :  { %4059 = vmatprep.subr.bf16.mxu1 %v4331_v56  ;;  %v401_v56 = vld [vmem:[%s6238_s2] sm:$0x3] }
  0xe5   :  { %4060 = vmatpush3.bf16.msra.mxu1 %v4332_v57  ;;  %v6254_v57 = vsub.s32 0, %v5198_v51 }
  0xe6   :  { %1150 = vmatpush2.bf16.msra.mxu0 %v4320_v2  ;;  %4061 = vmatprep.subr.bf16.mxu1 %v4333_v58 }
  0xe7   :  { %1632 = vmatprep.subr.bf16.mxu0 %v4341_v17 }
  0xe9   :  { %1152 = vmatmul.mubr.bf16.vlgmr.msra.gmra.mxu0 %v261_v7  ;;  %4062 = vmatpush3.bf16.msra.mxu1 %v4334_v59  ;;  %v5215_v59 = vrot.slane %v401_v56, %v6253_v53 }
  0xea   :  { %1161 = vmatprep.mubr.bf16.mxu0 %v268_v8  ;;  %4063 = vmatprep.subr.bf16.mxu1 %v4335_v60 }
  0xeb   :  { %1633 = vmatpush1.bf16.msra.mxu0 %v4339_v16 }
  0xec   :  { %1634 = vmatprep.subr.bf16.mxu0 %v4344_v18 }
  0xed   :  { %4064 = vmatpush3.bf16.msra.mxu1 %v4336_v61 }
  0xee   :  { %4065 = vmatprep.subr.bf16.mxu1 %v4337_v62  ;;  %v5223_v62 = vrot.slane %v401_v56, %v6254_v57 }
  0xf1   :  { %1162 = vmatmul.mubr.bf16.gmra.mxu0 %v267_v13  ;;  %4066 = vmatpush3.bf16.msra.mxu1 %v4338_v63 }
  0xf2   :  { %1171 = vmatprep.mubr.bf16.mxu0 %v274_v14 }
  0xf9   :  { %1172 = vmatmul.mubr.bf16.gmra.mxu0 %v273_v19 }
  0xfa   :  { %1181 = vmatprep.mubr.bf16.mxu0 %v280_v20  ;;  %v4342_v20 = vld [vmem:[#allocation8 + $0x60] ss:$8 sps:$4 sm:$0xff]  }
  0xfb   :  { %1635 = vmatpush1.bf16.msra.mxu0 %v4342_v20 }
  0xfc   :  { %1636 = vmatprep.subr.bf16.mxu0 %v4347_v23 }
 0x101   :  { %1182 = vmatmul.mubr.bf16.gmra.mxu0 %v279_v25  ;;  %v4345_v25 = vld [vmem:[#allocation8 + $0x50] ss:$8 sps:$4 sm:$0xff]  }
 0x102   :  { %1191 = vmatprep.mubr.bf16.mxu0 %v286_v26  ;;  %1637 = vmatpush1.bf16.msra.mxu0 %v4345_v25 }
 0x103   :  { %1638 = vmatprep.subr.bf16.mxu0 %v4350_v28 }
 0x106   :  { %1639 = vmatpush1.bf16.msra.mxu0 %v4348_v30 }
 0x109   :  { %1192 = vmatmul.mubr.bf16.gmra.mxu0 %v285_v33  ;;  %v4353_v33 = vld [vmem:[#allocation8 + $0x34] ss:$8 sps:$4 sm:$0xff]  }
 0x10a   :  { %1201 = vmatprep.mubr.bf16.mxu0 %v292_v34  ;;  %1640 = vmatprep.subr.bf16.mxu0 %v4353_v33 }
 0x10b   :  { %1641 = vmatpush1.bf16.msra.mxu0 %v4351_v35 }
 0x111   :  { %1202 = vmatmul.mubr.bf16.gmra.mxu0 %v291_v41 }
 0x112   :  { %1211 = vmatprep.mubr.bf16.mxu0 %v298_v42 }
 0x119   :  { %1212 = vmatmul.mubr.bf16.gmra.mxu0 %v297_v49 }
 0x11a   :  { %1221 = vmatprep.mubr.bf16.mxu0 %v304_v50 }
 0x121   :  { %1222 = vmatmul.mubr.bf16.gmra.mxu0 %v303_v55 }
 0x169   :  { %v5117_v0 = vpop.f32.mrf.mxu0 }
 0x16a   :  { %v928_v23 = vadd.f32 %v5117_v0, %v5223_v62 }
 0x16b   :  { %v5119_v1 = vpop.f32.mrf.mxu0  ;;  %v5121_v2 = vpop.f32.mrf.mxu1 }
 0x16c   :  { %v930_v16 = vadd.f32 %v5119_v1, %v5215_v59  ;;  %v1041_v53 = vadd.f32 %v5121_v2, %v928_v23 }
 0x16d   :  { %v5123_v3 = vpop.f32.mrf.mxu0  ;;  %v5125_v4 = vpop.f32.mrf.mxu1 }
 0x16e   :  { %v932_v20 = vadd.f32 %v5123_v3, %v5223_v62  ;;  %v1043_v28 = vadd.f32 %v5125_v4, %v930_v16 }
 0x16f   :  { %v5127_v5 = vpop.f32.mrf.mxu0  ;;  %v5129_v6 = vpop.f32.mrf.mxu1 }
 0x170   :  { %v934_v30 = vadd.f32 %v5127_v5, %v5215_v59  ;;  %v1045_v1 = vadd.f32 %v5129_v6, %v932_v20 }
 0x171   :  { %v5131_v7 = vpop.f32.mrf.mxu0  ;;  %v5133_v8 = vpop.f32.mrf.mxu1 }
 0x172   :  { %v1047_v3 = vadd.f32 %v5133_v8, %v934_v30  ;;  %v938_v6 = vadd.f32 %v5131_v7, %v5223_v62 }
 0x173   :  { %v5135_v9 = vpop.f32.mrf.mxu0  ;;  %v5139_v11 = vpop.f32.mrf.mxu1 }
 0x174   :  { %v940_v0 = vadd.f32 %v5135_v9, %v5215_v59  ;;  %v1051_v23 = vadd.f32 %v5139_v11, %v938_v6 }
 0x175   :  { %v5137_v10 = vpop.f32.mrf.mxu0  ;;  %v5145_v14 = vpop.f32.mrf.mxu1 }
 0x176   :  { %v942_v5 = vadd.f32 %v5137_v10, %v5223_v62  ;;  %v1053_v8 = vadd.f32 %v5145_v14, %v940_v0 }
 0x177   :  { %v5141_v12 = vpop.f32.mrf.mxu0  ;;  %v5151_v21 = vpop.f32.mrf.mxu1 }
 0x178   :  { %v944_v9 = vadd.f32 %v5141_v12, %v5215_v59  ;;  %v1055_v20 = vadd.f32 %v5151_v21, %v942_v5 }
 0x179   :  { %v5143_v13 = vpop.f32.mrf.mxu0  ;;  %v5157_v26 = vpop.f32.mrf.mxu1 }
 0x17a   :  { %v1057_v7 = vadd.f32 %v5157_v26, %v944_v9  ;;  %v948_v21 = vadd.f32 %v5143_v13, %v5223_v62 }
 0x17b   :  { %v5147_v15 = vpop.f32.mrf.mxu0  ;;  %v5163_v31 = vpop.f32.mrf.mxu1 }
 0x17d   :  { %v5149_v19 = vpop.f32.mrf.mxu0  ;;  %v5169_v36 = vpop.f32.mrf.mxu1 }
 0x17e   :  { %v952_v30 = vadd.f32 %v5149_v19, %v5223_v62 }
 0x17f   :  { %v5153_v22 = vpop.f32.mrf.mxu0  ;;  %v5175_v39 = vpop.f32.mrf.mxu1 }
 0x181   :  { %v5155_v24 = vpop.f32.mrf.mxu0  ;;  %v5181_v42 = vpop.f32.mrf.mxu1 }
 0x183   :  { %v5159_v27 = vpop.f32.mrf.mxu0  ;;  %v5187_v45 = vpop.f32.mrf.mxu1 }
 0x185   :  { %v5161_v29 = vpop.f32.mrf.mxu0  ;;  %v5193_v49 = vpop.f32.mrf.mxu1 }
 0x187   :  { %v5165_v32 = vpop.f32.mrf.mxu0  ;;  %v5203_v54 = vpop.f32.mrf.mxu1 }
 0x189   :  { %v5167_v34 = vpop.f32.mrf.mxu0  ;;  %v5217_v60 = vpop.f32.mrf.mxu1 }
 0x18b   :  { %v5171_v37 = vpop.f32.mrf.mxu0  ;;  %v5229_v17 = vpop.f32.mrf.mxu1 }
 0x18d   :  { %v5173_v38 = vpop.f32.mrf.mxu0  ;;  %v5240_v33 = vpop.f32.mrf.mxu1 }
 0x18f   :  { %v5177_v40 = vpop.f32.mrf.mxu0  ;;  %v5247_v51 = vpop.f32.mrf.mxu1 }
 0x191   :  { %v5179_v41 = vpop.f32.mrf.mxu0 }
 0x193   :  { %v5183_v43 = vpop.f32.mrf.mxu0 }
 0x195   :  { %v5185_v44 = vpop.f32.mrf.mxu0 }
 0x197   :  { %v5189_v46 = vpop.f32.mrf.mxu0 }
 0x199   :  { %v5191_v48 = vpop.f32.mrf.mxu0 }
 0x19b   :  { %v5195_v50 = vpop.f32.mrf.mxu0 }
 0x19d   :  { %v5200_v52 = vpop.f32.mrf.mxu0 }
 0x19f   :  { %v5205_v55 = vpop.f32.mrf.mxu0 }
 0x1a1   :  { %v5211_v58 = vpop.f32.mrf.mxu0 }
 0x1a3   :  { %v5219_v61 = vpop.f32.mrf.mxu0 }
 0x1a5   :  { %v5225_v63 = vpop.f32.mrf.mxu0 }
 0x1a7   :  { %v5231_v18 = vpop.f32.mrf.mxu0 }
 0x1a8   :  { %6293 = vst [vmem:[#allocation31_spill] sm:$0xff] %v5231_v18 }
 0x1a9   :  { %v1153_v25 = vpop.f32.mrf.mxu0 }
 0x1aa   :  { %v1154_v4 = vadd.f32 %v1153_v25, %v1041_v53 }
 0x1ab   :  { %v1155_v35 = vpop.f32.mrf.mxu0 }
 0x1ac   :  { %v1156_v56 = vadd.f32 %v1155_v35, %v1043_v28 }
 0x1ad   :  { %v1157_v57 = vpop.f32.mrf.mxu0 }
 0x1ae   :  { %v1158_v47 = vadd.f32 %v1157_v57, %v1045_v1  ;;  %4467 = vtanh.f32 %v1156_v56  ;;  %v5256_v57 = vpop.f32.mrf.mxu1 }
 0x1af   :  { %v1159_v16 = vpop.f32.mrf.mxu0 }
 0x1b0   :  { %v1160_v18 = vadd.f32 %v1159_v16, %v1047_v3  ;;  %4469 = vtanh.f32 %v1158_v47  ;;  %v950_v47 = vadd.f32 %v5147_v15, %v5215_v59  ;;  %v5263_v28 = vpop.f32.mrf.mxu1  ;;  %v954_v15 = vadd.f32 %v5153_v22, %v5215_v59 }
 0x1b1   :  { %v1163_v2 = vpop.f32.mrf.mxu0  ;;  %v1065_v3 = vadd.f32 %v5175_v39, %v952_v30  ;;  %v960_v22 = vadd.f32 %v5159_v27, %v5215_v59  ;;  %v958_v27 = vadd.f32 %v5155_v24, %v5223_v62 }
 0x1b2   :  { %4471 = vtanh.f32 %v1160_v18  ;;  %v1164_v12 = vadd.f32 %v1163_v2, %v1051_v23  ;;  %v1063_v26 = vadd.f32 %v5169_v36, %v950_v47  ;;  %v5272_v1 = vpop.f32.mrf.mxu1  ;;  %v1067_v36 = vadd.f32 %v5181_v42, %v954_v15 }
 0x1b3   :  { %4473 = vtanh.f32 %v1154_v4  ;;  %v1165_v53 = vpop.f32.mrf.mxu0  ;;  %v1061_v4 = vadd.f32 %v5163_v31, %v948_v21  ;;  %v962_v31 = vadd.f32 %v5161_v29, %v5223_v62  ;;  %v1073_v23 = vadd.f32 %v5193_v49, %v960_v22 }
 0x1b4   :  { %v1166_v10 = vadd.f32 %v1165_v53, %v1053_v8  ;;  %v5285_v2 = vpop.f32.mrf.mxu1 }
 0x1b5   :  { %v1167_v25 = vpop.f32.mrf.mxu0  ;;  %v1075_v47 = vadd.f32 %v5203_v54, %v962_v31 }
 0x1b6   :  { %v1168_v14 = vadd.f32 %v1167_v25, %v1055_v20  ;;  %4475 = vtanh.f32 %v1166_v10  ;;  %v964_v25 = vadd.f32 %v5165_v32, %v5215_v59  ;;  %v5300_v29 = vpop.f32.mrf.mxu1  ;;  %v970_v32 = vadd.f32 %v5171_v37, %v5215_v59 }
 0x1b7   :  { %v1169_v18 = vpop.f32.mrf.mxu0  ;;  %v968_v37 = vadd.f32 %v5167_v34, %v5223_v62 }
 0x1b8   :  { %v1170_v35 = vadd.f32 %v1169_v18, %v1057_v7  ;;  %4477 = vtanh.f32 %v1168_v14  ;;  %v1077_v49 = vadd.f32 %v5217_v60, %v964_v25 }
 0x1b9   :  { %v1173_v11 = vpop.f32.mrf.mxu0 }
 0x1ba   :  { %4479 = vtanh.f32 %v1170_v35  ;;  %v1174_v8 = vadd.f32 %v1173_v11, %v1061_v4  ;;  %v5313_v11 = vpop.f32.mrf.mxu1  ;;  %v1083_v4 = vadd.f32 %v5240_v33, %v970_v32 }
 0x1bb   :  { %4481 = vtanh.f32 %v1164_v12  ;;  %v1175_v56 = vpop.f32.mrf.mxu0  ;;  %v5275_v0 = vpop.eup %4467  ;;  %v1071_v12 = vadd.f32 %v5187_v45, %v958_v27  ;;  %v972_v45 = vadd.f32 %v5173_v38, %v5223_v62 }
 0x1bc   :  { %v1176_v19 = vadd.f32 %v1175_v56, %v1063_v26  ;;  %v1102_v38 = vpop.f32.mrf.mxu1 }
 0x1bd   :  { %v1177_v13 = vpop.f32.mrf.mxu0  ;;  %v5278_v16 = vpop.eup %4469  ;;  %v1085_v22 = vadd.f32 %v5247_v51, %v972_v45 }
 0x1be   :  { %v1178_v5 = vadd.f32 %v1177_v13, %v1065_v3  ;;  %4483 = vtanh.f32 %v1176_v19  ;;  %v974_v13 = vadd.f32 %v5177_v40, %v5215_v59  ;;  %v980_v40 = vadd.f32 %v5183_v43, %v5215_v59  ;;  %v1104_v27 = vpop.f32.mrf.mxu1 }
 0x1bf   :  { %v5283_v6 = vpop.eup %4471  ;;  %v1179_v39 = vpop.f32.mrf.mxu0 }
 0x1c0   :  { %v5287_v9 = vpop.eup %4473  ;;  %v1180_v53 = vadd.f32 %v1179_v39, %v1067_v36  ;;  %v1265_v42 = vpack.c.bf16 %v5283_v6, %v5275_v0  ;;  %4485 = vtanh.f32 %v1178_v5  ;;  %v1087_v33 = vadd.f32 %v5256_v57, %v974_v13 }
 0x1c1   :  { %v1183_v20 = vpop.f32.mrf.mxu0  ;;  %v1264_v10 = vpack.c.bf16 %v5278_v16, %v5287_v9  ;;  %v978_v57 = vadd.f32 %v5179_v41, %v5223_v62 }
 0x1c2   :  { %4487 = vtanh.f32 %v1180_v53  ;;  %1447 = vmatprep.mubr.bf16.mxu1 %v1265_v42  ;;  %v1184_v26 = vadd.f32 %v1183_v20, %v1071_v12 }
 0x1c3   :  { %4489 = vtanh.f32 %v1174_v8  ;;  %v1185_v7 = vpop.f32.mrf.mxu0  ;;  %1448 = vmatmul.mubr.bf16.vlgmr.msra.gmra.mxu1 %v1264_v10  ;;  %v5303_v14 = vpop.eup %4475  ;;  %v1081_v8 = vadd.f32 %v5229_v17, %v968_v37  ;;  %v1091_v32 = vadd.f32 %v5263_v28, %v978_v57 }
 0x1c4   :  { %v1186_v24 = vadd.f32 %v1185_v7, %v1073_v23  ;;  %v982_v23 = vadd.f32 %v5185_v44, %v5223_v62  ;;  %v1106_v44 = vpop.f32.mrf.mxu1 }
 0x1c5   :  { %v1187_v18 = vpop.f32.mrf.mxu0  ;;  %v5306_v30 = vpop.eup %4477 }
 0x1c6   :  { %v1188_v35 = vadd.f32 %v1187_v18, %v1075_v47  ;;  %4491 = vtanh.f32 %v1186_v24  ;;  %v1093_v47 = vadd.f32 %v5272_v1, %v980_v40  ;;  %v984_v24 = vadd.f32 %v5189_v46, %v5215_v59 }
 0x1c7   :  { %v5311_v21 = vpop.eup %4479  ;;  %v1189_v54 = vpop.f32.mrf.mxu0  ;;  %v1095_v18 = vadd.f32 %v5285_v2, %v982_v23  ;;  %v990_v46 = vadd.f32 %v5195_v50, %v5215_v59 }
 0x1c8   :  { %v5315_v15 = vpop.eup %4481  ;;  %v1190_v56 = vadd.f32 %v1189_v54, %v1077_v49  ;;  %v1267_v60 = vpack.c.bf16 %v5311_v21, %v5303_v14  ;;  %4493 = vtanh.f32 %v1188_v35  ;;  %v1097_v1 = vadd.f32 %v5300_v29, %v984_v24  ;;  %v6304_v24 = vld [vmem:[#allocation31_spill] sm:$0xff] }
 0x1c9   :  { %v1193_v3 = vpop.f32.mrf.mxu0  ;;  %v1266_v19 = vpack.c.bf16 %v5306_v30, %v5315_v15  ;;  %v988_v29 = vadd.f32 %v5191_v48, %v5223_v62  ;;  %v1103_v13 = vadd.f32 %v1102_v38, %v990_v46  ;;  %v1000_v38 = vadd.f32 %v5219_v61, %v5215_v59 }
 0x1ca   :  { %4495 = vtanh.f32 %v1190_v56  ;;  %1455 = vmatprep.mubr.bf16.mxu1 %v1267_v60  ;;  %v1194_v20 = vadd.f32 %v1193_v3, %v1081_v8  ;;  %v1110_v56 = vpop.f32.mrf.mxu1  ;;  %v992_v3 = vadd.f32 %v5200_v52, %v5223_v62 }
 0x1cb   :  { %4497 = vtanh.f32 %v1184_v26  ;;  %v1195_v36 = vpop.f32.mrf.mxu0  ;;  %1456 = vmatmul.mubr.bf16.gmra.mxu1 %v1266_v19  ;;  %v5329_v34 = vpop.eup %4483  ;;  %v1101_v48 = vadd.f32 %v5313_v11, %v988_v29 }
 0x1cc   :  { %v1196_v5 = vadd.f32 %v1195_v36, %v1083_v4  ;;  %v994_v36 = vadd.f32 %v5205_v55, %v5215_v59  ;;  %v1112_v52 = vpop.f32.mrf.mxu1 }
 0x1cd   :  { %v1197_v39 = vpop.f32.mrf.mxu0  ;;  %v5332_v31 = vpop.eup %4485 }
 0x1ce   :  { %6294 = vst [vmem:[#allocation32_spill] sm:$0xff] %v5332_v31  ;;  %v1198_v53 = vadd.f32 %v1197_v39, %v1085_v22  ;;  %4499 = vtanh.f32 %v1196_v5  ;;  %v1105_v5 = vadd.f32 %v1104_v27, %v992_v3  ;;  %v1002_v27 = vadd.f32 %v5225_v63, %v5223_v62 }
 0x1cf   :  { %v5337_v42 = vpop.eup %4487  ;;  %v1199_v10 = vpop.f32.mrf.mxu0 }
 0x1d0   :  { %6295 = vst [vmem:[#allocation33_spill] sm:$0xff] %v5337_v42  ;;  %v5339_v51 = vpop.eup %4489  ;;  %v1200_v17 = vadd.f32 %v1199_v10, %v1087_v33  ;;  %v1269_v25 = vpack.c.bf16 %v5337_v42, %v5329_v34  ;;  %4501 = vtanh.f32 %v1198_v53  ;;  %v1107_v53 = vadd.f32 %v1106_v44, %v994_v36  ;;  %v1114_v10 = vpop.f32.mrf.mxu1 }
 0x1d1   :  { %v1203_v43 = vpop.f32.mrf.mxu0  ;;  %v1268_v7 = vpack.c.bf16 %v5332_v31, %v5339_v51  ;;  %v1004_v44 = vadd.f32 %v6304_v24, %v5215_v59 }
 0x1d2   :  { %4503 = vtanh.f32 %v1200_v17  ;;  %1463 = vmatprep.mubr.bf16.mxu1 %v1269_v25  ;;  %v1204_v60 = vadd.f32 %v1203_v43, %v1091_v32  ;;  %v998_v43 = vadd.f32 %v5211_v58, %v5223_v62  ;;  %v1116_v63 = vpop.f32.mrf.mxu1 }
 0x1d3   :  { %4505 = vtanh.f32 %v1194_v20  ;;  %v1205_v12 = vpop.f32.mrf.mxu0  ;;  %1464 = vmatmul.mubr.bf16.gmra.mxu1 %v1268_v7  ;;  %v5353_v41 = vpop.eup %4491 }
 0x1d4   :  { %v1206_v49 = vadd.f32 %v1205_v12, %v1093_v47  ;;  %6296 = vst [vmem:[#allocation34_spill] sm:$0xff] %v5353_v41  ;;  %v1113_v47 = vadd.f32 %v1112_v52, %v1000_v38  ;;  %v1111_v58 = vadd.f32 %v1110_v56, %v998_v43  ;;  %v4356_v38 = vld [vmem:[#allocation8 + $0x24] ss:$8 sps:$4 sm:$0xff]   ;;  %v5436_v43 = vld [vmem:[%s6240_s4] ss:$0 sm:$0xff] }
 0x1d5   :  { %v1207_v35 = vpop.f32.mrf.mxu0  ;;  %v5356_v26 = vpop.eup %4493  ;;  %1642 = vmatprep.subr.bf16.mxu0 %v4356_v38 }
 0x1d6   :  { %6297 = vst [vmem:[#allocation35_spill] sm:$0xff] %v5356_v26  ;;  %v1208_v54 = vadd.f32 %v1207_v35, %v1095_v18  ;;  %4507 = vtanh.f32 %v1206_v49  ;;  %v1115_v18 = vadd.f32 %v1114_v10, %v1002_v27  ;;  %v4359_v10 = vld [vmem:[#allocation8 + $0x14] ss:$8 sps:$4 sm:$0xff]   ;;  %v6258_v27 = vmov 0  }
 0x1d7   :  { %v5361_v45 = vpop.eup %4495  ;;  %v1209_v37 = vpop.f32.mrf.mxu0  ;;  %1664 = vmatprep.mubr.bf16.mxu0 %v6258_v27 }
 0x1d8   :  { %6298 = vst [vmem:[#allocation36_spill] sm:$0xff] %v5361_v45  ;;  %v5363_v2 = vpop.eup %4497  ;;  %v1210_v28 = vadd.f32 %v1209_v37, %v1097_v1  ;;  %v1271_v19 = vpack.c.bf16 %v5361_v45, %v5353_v41  ;;  %4509 = vtanh.f32 %v1208_v54  ;;  %v1117_v1 = vadd.f32 %v1116_v63, %v1004_v44 }
 0x1d9   :  { %6299 = vst [vmem:[#allocation37_spill] sm:$0xff] %v5363_v2  ;;  %v1213_v50 = vpop.f32.mrf.mxu0  ;;  %v1270_v4 = vpack.c.bf16 %v5356_v26, %v5363_v2 }
 0x1da   :  { %4511 = vtanh.f32 %v1210_v28  ;;  %1471 = vmatprep.mubr.bf16.mxu1 %v1271_v19  ;;  %v1214_v23 = vadd.f32 %v1213_v50, %v1101_v48 }
 0x1db   :  { %4513 = vtanh.f32 %v1204_v60  ;;  %v1215_v22 = vpop.f32.mrf.mxu0  ;;  %1472 = vmatmul.mubr.bf16.gmra.mxu1 %v1270_v4  ;;  %v5375_v39 = vpop.eup %4499 }
 0x1dc   :  { %v1216_v8 = vadd.f32 %v1215_v22, %v1103_v13  ;;  %6300 = vst [vmem:[#allocation38_spill] sm:$0xff] %v5375_v39 }
 0x1dd   :  { %v1217_v33 = vpop.f32.mrf.mxu0  ;;  %v5378_v40 = vpop.eup %4501 }
 0x1de   :  { %6301 = vst [vmem:[#allocation39_spill] sm:$0xff] %v5378_v40  ;;  %v1218_v55 = vadd.f32 %v1217_v33, %v1105_v5  ;;  %4515 = vtanh.f32 %v1216_v8 }
 0x1df   :  { %v5382_v20 = vpop.eup %4503  ;;  %v1219_v17 = vpop.f32.mrf.mxu0 }
 0x1e0   :  { %6302 = vst [vmem:[#allocation40_spill] sm:$0xff] %v5382_v20  ;;  %v5384_v25 = vpop.eup %4505  ;;  %v1220_v11 = vadd.f32 %v1219_v17, %v1107_v53  ;;  %v1273_v57 = vpack.c.bf16 %v5382_v20, %v5375_v39  ;;  %4517 = vtanh.f32 %v1218_v55  ;;  %v4354_v53 = vld [vmem:[#allocation8 + $0x20] ss:$8 sps:$4 sm:$0xff]   ;;  %v4357_v55 = vld [vmem:[#allocation8 + $0x10] ss:$8 sps:$4 sm:$0xff]  }
 0x1e1   :  { %6303 = vst [vmem:[#allocation41_spill] sm:$0xff] %v5384_v25  ;;  %v1223_v61 = vpop.f32.mrf.mxu0  ;;  %v1272_v7 = vpack.c.bf16 %v5378_v40, %v5384_v25  ;;  %1643 = vmatpush1.bf16.msra.mxu0 %v4354_v53  ;;  %v4360_v17 = vld [vmem:[#allocation8] ss:$8 sps:$4 sm:$0xff]  }
 0x1e2   :  { %4519 = vtanh.f32 %v1220_v11  ;;  %1479 = vmatprep.mubr.bf16.mxu1 %v1273_v57  ;;  %v1224_v60 = vadd.f32 %v1223_v61, %v1111_v58  ;;  %1644 = vmatprep.subr.bf16.mxu0 %v4359_v10 }
 0x1e3   :  { %4521 = vtanh.f32 %v1214_v23  ;;  %v1225_v12 = vpop.f32.mrf.mxu0  ;;  %1480 = vmatmul.mubr.bf16.gmra.mxu1 %v1272_v7  ;;  %v5396_v32 = vpop.eup %4507  ;;  %v4362_v23 = vld [vmem:[#allocation8 + $0x4] ss:$8 sps:$4 sm:$0xff]  }
 0x1e4   :  { %v1226_v49 = vadd.f32 %v1225_v12, %v1113_v47  ;;  %6305 = vst [vmem:[#allocation31_spill] sm:$0xff] %v5396_v32 }
 0x1e5   :  { %v1227_v62 = vpop.f32.mrf.mxu0  ;;  %v5398_v35 = vpop.eup %4509  ;;  %1645 = vmatpush1.bf16.msra.mxu0 %v4357_v55 }
 0x1e6   :  { %6306 = vst [vmem:[#allocation42_spill] sm:$0xff] %v5398_v35  ;;  %v1228_v46 = vadd.f32 %v1227_v62, %v1115_v18  ;;  %4523 = vtanh.f32 %v1226_v49  ;;  %1646 = vmatprep.subr.bf16.mxu0 %v4362_v23 }
 0x1e7   :  { %v5400_v54 = vpop.eup %4511  ;;  %v1229_v59 = vpop.f32.mrf.mxu0 }
 0x1e8   :  { %6307 = vst [vmem:[#allocation43_spill] sm:$0xff] %v5400_v54  ;;  %v5402_v37 = vpop.eup %4513  ;;  %v1230_v3 = vadd.f32 %v1229_v59, %v1117_v1  ;;  %v1275_v28 = vpack.c.bf16 %v5400_v54, %v5396_v32  ;;  %4525 = vtanh.f32 %v1228_v46 }
 0x1e9   :  { %6308 = vst [vmem:[#allocation44_spill] sm:$0xff] %v5402_v37  ;;  %v1274_v56 = vpack.c.bf16 %v5398_v35, %v5402_v37  ;;  %1647 = vmatpush1.bf16.msra.mxu0 %v4360_v17 }
 0x1ea   :  { %4527 = vtanh.f32 %v1230_v3  ;;  %1487 = vmatprep.mubr.bf16.mxu1 %v1275_v28 }
 0x1eb   :  { %4529 = vtanh.f32 %v1224_v60  ;;  %1488 = vmatmul.mubr.bf16.gmra.mxu1 %v1274_v56  ;;  %v5408_v19 = vpop.eup %4515 }
 0x1ec   :  { %6309 = vst [vmem:[#allocation45_spill] sm:$0xff] %v5408_v19 }
 0x1ed   :  { %v5410_v29 = vpop.eup %4517 }
 0x1ee   :  { %6310 = vst [vmem:[#allocation46_spill] sm:$0xff] %v5410_v29 }
 0x1ef   :  { %v5412_v50 = vpop.eup %4519 }
 0x1f0   :  { %6311 = vst [vmem:[#allocation47_spill] sm:$0xff] %v5412_v50  ;;  %v5414_v4 = vpop.eup %4521  ;;  %v1277_v13 = vpack.c.bf16 %v5412_v50, %v5408_v19 }
 0x1f1   :  { %6312 = vst [vmem:[#allocation48_spill] sm:$0xff] %v5414_v4  ;;  %v1276_v36 = vpack.c.bf16 %v5410_v29, %v5414_v4 }
 0x1f2   :  { %1495 = vmatprep.mubr.bf16.mxu1 %v1277_v13 }
 0x1f3   :  { %1496 = vmatmul.mubr.bf16.gmra.mxu1 %v1276_v36  ;;  %v5420_v52 = vpop.eup %4523 }
 0x1f4   :  { %6313 = vst [vmem:[#allocation49_spill] sm:$0xff] %v5420_v52 }
 0x1f5   :  { %v5422_v22 = vpop.eup %4525 }
 0x1f6   :  { %6314 = vst [vmem:[#allocation50_spill] sm:$0xff] %v5422_v22 }
 0x1f7   :  { %v5424_v5 = vpop.eup %4527 }
 0x1f8   :  { %6315 = vst [vmem:[#allocation51_spill] sm:$0xff] %v5424_v5  ;;  %v5426_v8 = vpop.eup %4529  ;;  %v1279_v48 = vpack.c.bf16 %v5424_v5, %v5420_v52 }
 0x1f9   :  { %6316 = vst [vmem:[#allocation52_spill] sm:$0xff] %v5426_v8  ;;  %v1278_v33 = vpack.c.bf16 %v5422_v22, %v5426_v8  ;;  %v4366_v22 = vld [vmem:[#allocation10 + $0x30] sm:$0xff]  }
 0x1fa   :  { %1503 = vmatprep.mubr.bf16.mxu1 %v1279_v48 }
 0x1fb   :  { %1504 = vmatmul.mubr.bf16.gmra.mxu1 %v1278_v33 }
 0x283   :  { %v4067_v11 = vpop.f32.mrf.mxu1 }
 0x285   :  { %v4068_v57 = vpop.f32.mrf.mxu1 }
 0x286   :  { %v4069_v61 = vadd.f32 %v4068_v57, %v4067_v11 }
 0x287   :  { %v4070_v7 = vpop.f32.mrf.mxu1 }
 0x288   :  { %v1450_v47 = vadd.f32 %v4069_v61, %v5436_v43 }
 0x289   :  { %v4071_v24 = vpop.f32.mrf.mxu1 }
 0x28a   :  { %v4072_v44 = vadd.f32 %v4071_v24, %v4070_v7  ;;  %4531 = vtanh.f32 %v1450_v47 }
 0x28b   :  { %v4073_v63 = vpop.f32.mrf.mxu1 }
 0x28c   :  { %v1453_v12 = vadd.f32 %v4072_v44, %v5436_v43 }
 0x28d   :  { %v4074_v18 = vpop.f32.mrf.mxu1 }
 0x28e   :  { %4533 = vtanh.f32 %v1453_v12  ;;  %v4075_v49 = vadd.f32 %v4074_v18, %v4073_v63 }
 0x28f   :  { %v4076_v58 = vpop.f32.mrf.mxu1 }
 0x290   :  { %v1458_v62 = vadd.f32 %v4075_v49, %v5436_v43 }
 0x291   :  { %v4077_v1 = vpop.f32.mrf.mxu1 }
 0x292   :  { %v4078_v46 = vadd.f32 %v4077_v1, %v4076_v58  ;;  %4535 = vtanh.f32 %v1458_v62 }
 0x293   :  { %v4079_v60 = vpop.f32.mrf.mxu1 }
 0x294   :  { %v1461_v59 = vadd.f32 %v4078_v46, %v5436_v43 }
 0x295   :  { %v4080_v3 = vpop.f32.mrf.mxu1 }
 0x296   :  { %4537 = vtanh.f32 %v1461_v59  ;;  %v4081_v28 = vadd.f32 %v4080_v3, %v4079_v60 }
 0x297   :  { %v4082_v56 = vpop.f32.mrf.mxu1  ;;  %v4532_v48 = vpop.eup %4531 }
 0x298   :  { %v1466_v13 = vadd.f32 %v4081_v28, %v5436_v43 }
 0x299   :  { %v4083_v36 = vpop.f32.mrf.mxu1 }
 0x29a   :  { %v4084_v33 = vadd.f32 %v4083_v36, %v4082_v56  ;;  %4539 = vtanh.f32 %v1466_v13 }
 0x29b   :  { %v4534_v53 = vpop.eup %4533  ;;  %v4085_v38 = vpop.f32.mrf.mxu1 }
 0x29c   :  { %v1469_v55 = vadd.f32 %v4084_v33, %v5436_v43  ;;  %v1528_v10 = vpack.c.bf16 %v4534_v53, %v4532_v48 }
 0x29d   :  { %v4086_v23 = vpop.f32.mrf.mxu1 }
 0x29e   :  { %4541 = vtanh.f32 %v1469_v55  ;;  %v4087_v17 = vadd.f32 %v4086_v23, %v4085_v38  ;;  %1665 = vmatmul.mubr.bf16.vlgmr.msra.gmra.mxu0 %v1528_v10 }
 0x29f   :  { %v4088_v11 = vpop.f32.mrf.mxu1  ;;  %1674 = vmatprep.mubr.bf16.mxu0 %v6258_v27  ;;  %v4536_v7 = vpop.eup %4535 }
 0x2a0   :  { %v1474_v57 = vadd.f32 %v4087_v17, %v5436_v43 }
 0x2a1   :  { %v4089_v61 = vpop.f32.mrf.mxu1 }
 0x2a2   :  { %v4090_v47 = vadd.f32 %v4089_v61, %v4088_v11  ;;  %4543 = vtanh.f32 %v1474_v57 }
 0x2a3   :  { %v4538_v24 = vpop.eup %4537  ;;  %v4091_v44 = vpop.f32.mrf.mxu1 }
 0x2a4   :  { %v1477_v63 = vadd.f32 %v4090_v47, %v5436_v43  ;;  %v1529_v12 = vpack.c.bf16 %v4538_v24, %v4536_v7 }
 0x2a5   :  { %v4092_v18 = vpop.f32.mrf.mxu1 }
 0x2a6   :  { %4545 = vtanh.f32 %v1477_v63  ;;  %v4093_v49 = vadd.f32 %v4092_v18, %v4091_v44  ;;  %1675 = vmatmul.mubr.bf16.gmra.mxu0 %v1529_v12 }
 0x2a7   :  { %v4094_v58 = vpop.f32.mrf.mxu1  ;;  %1684 = vmatprep.mubr.bf16.mxu0 %v6258_v27  ;;  %v4540_v46 = vpop.eup %4539 }
 0x2a8   :  { %v1482_v62 = vadd.f32 %v4093_v49, %v5436_v43 }
 0x2a9   :  { %v4095_v1 = vpop.f32.mrf.mxu1 }
 0x2aa   :  { %v4096_v60 = vadd.f32 %v4095_v1, %v4094_v58  ;;  %4547 = vtanh.f32 %v1482_v62 }
 0x2ab   :  { %v4542_v59 = vpop.eup %4541  ;;  %v4097_v3 = vpop.f32.mrf.mxu1 }
 0x2ac   :  { %v1485_v28 = vadd.f32 %v4096_v60, %v5436_v43  ;;  %v1530_v56 = vpack.c.bf16 %v4542_v59, %v4540_v46 }
 0x2ad   :  { %v4098_v13 = vpop.f32.mrf.mxu1 }
 0x2ae   :  { %4549 = vtanh.f32 %v1485_v28  ;;  %v4099_v36 = vadd.f32 %v4098_v13, %v4097_v3  ;;  %1685 = vmatmul.mubr.bf16.gmra.mxu0 %v1530_v56 }
 0x2af   :  { %v4100_v48 = vpop.f32.mrf.mxu1  ;;  %1694 = vmatprep.mubr.bf16.mxu0 %v6258_v27  ;;  %v4544_v38 = vpop.eup %4543 }
 0x2b0   :  { %v1490_v33 = vadd.f32 %v4099_v36, %v5436_v43 }
 0x2b1   :  { %v4101_v53 = vpop.f32.mrf.mxu1 }
 0x2b2   :  { %v4102_v55 = vadd.f32 %v4101_v53, %v4100_v48  ;;  %4551 = vtanh.f32 %v1490_v33 }
 0x2b3   :  { %v4546_v10 = vpop.eup %4545  ;;  %v4103_v23 = vpop.f32.mrf.mxu1 }
 0x2b4   :  { %v1493_v17 = vadd.f32 %v4102_v55, %v5436_v43  ;;  %v1531_v11 = vpack.c.bf16 %v4546_v10, %v4544_v38 }
 0x2b5   :  { %v4104_v57 = vpop.f32.mrf.mxu1 }
 0x2b6   :  { %4553 = vtanh.f32 %v1493_v17  ;;  %v4105_v61 = vadd.f32 %v4104_v57, %v4103_v23  ;;  %1695 = vmatmul.mubr.bf16.gmra.mxu0 %v1531_v11 }
 0x2b7   :  { %v4106_v7 = vpop.f32.mrf.mxu1  ;;  %1704 = vmatprep.mubr.bf16.mxu0 %v6258_v27  ;;  %v4548_v44 = vpop.eup %4547 }
 0x2b8   :  { %v1498_v47 = vadd.f32 %v4105_v61, %v5436_v43 }
 0x2b9   :  { %v4107_v24 = vpop.f32.mrf.mxu1 }
 0x2ba   :  { %v4108_v63 = vadd.f32 %v4107_v24, %v4106_v7  ;;  %4555 = vtanh.f32 %v1498_v47 }
 0x2bb   :  { %v4550_v12 = vpop.eup %4549  ;;  %v4109_v18 = vpop.f32.mrf.mxu1 }
 0x2bc   :  { %v1501_v49 = vadd.f32 %v4108_v63, %v5436_v43  ;;  %v1532_v58 = vpack.c.bf16 %v4550_v12, %v4548_v44  ;;  %v4363_v63 = vld [vmem:[#allocation10 + $0x78] sm:$0xff]  }
 0x2bd   :  { %v4110_v62 = vpop.f32.mrf.mxu1  ;;  %4115 = vmatprep.subr.bf16.mxu1 %v4363_v63 }
 0x2be   :  { %4557 = vtanh.f32 %v1501_v49  ;;  %v4111_v1 = vadd.f32 %v4110_v62, %v4109_v18  ;;  %1705 = vmatmul.mubr.bf16.gmra.mxu0 %v1532_v58 }
 0x2bf   :  { %v4112_v46 = vpop.f32.mrf.mxu1  ;;  %1714 = vmatprep.mubr.bf16.mxu0 %v6258_v27  ;;  %v4552_v3 = vpop.eup %4551 }
 0x2c0   :  { %v1506_v60 = vadd.f32 %v4111_v1, %v5436_v43 }
 0x2c1   :  { %v4113_v59 = vpop.f32.mrf.mxu1 }
 0x2c2   :  { %v4114_v28 = vadd.f32 %v4113_v59, %v4112_v46  ;;  %4559 = vtanh.f32 %v1506_v60 }
 0x2c3   :  { %v4554_v56 = vpop.eup %4553 }
 0x2c4   :  { %v1509_v13 = vadd.f32 %v4114_v28, %v5436_v43  ;;  %v1533_v36 = vpack.c.bf16 %v4554_v56, %v4552_v3 }
 0x2c6   :  { %4561 = vtanh.f32 %v1509_v13  ;;  %1715 = vmatmul.mubr.bf16.gmra.mxu0 %v1533_v36 }
 0x2c7   :  { %1724 = vmatprep.mubr.bf16.mxu0 %v6258_v27  ;;  %v4556_v48 = vpop.eup %4555 }
 0x2cb   :  { %v4558_v33 = vpop.eup %4557 }
 0x2cc   :  { %v1534_v53 = vpack.c.bf16 %v4558_v33, %v4556_v48 }
 0x2ce   :  { %1725 = vmatmul.mubr.bf16.gmra.mxu0 %v1534_v53 }
 0x2cf   :  { %1734 = vmatprep.mubr.bf16.mxu0 %v6258_v27  ;;  %v4560_v38 = vpop.eup %4559 }
 0x2d3   :  { %v4562_v55 = vpop.eup %4561 }
 0x2d4   :  { %v1535_v10 = vpack.c.bf16 %v4562_v55, %v4560_v38  ;;  %v4364_v38 = vld [vmem:[#allocation10 + $0x38] sm:$0xff]  }
 0x2d5   :  { %4116 = vmatpush3.bf16.msra.mxu1 %v4364_v38 }
 0x2d6   :  { %1735 = vmatmul.mubr.bf16.gmra.mxu0 %v1535_v10 }
 0x35e   :  { %v5461_v23 = vpop.f32.mrf.mxu0 }
 0x35f   :  { %v1745_v43 = vrot.slane %v5461_v23, 4 }
 0x360   :  { %v5464_v17 = vpop.f32.mrf.mxu0 }
 0x361   :  { %v1751_v11 = vrot.slane %v5464_v17, 4  ;;  %v1746_v61 = vmax.f32 %v5461_v23, %v1745_v43 }
 0x362   :  { %v5467_v57 = vpop.f32.mrf.mxu0 }
 0x363   :  { %v1757_v7 = vrot.slane %v5467_v57, 4  ;;  %v1752_v47 = vmax.f32 %v5464_v17, %v1751_v11  ;;  %v1747_v49 = vrot.slane %v1746_v61, 2 }
 0x364   :  { %v5472_v24 = vpop.f32.mrf.mxu0 }
 0x365   :  { %v1763_v44 = vrot.slane %v5472_v24, 4  ;;  %v1758_v12 = vmax.f32 %v5467_v57, %v1757_v7  ;;  %v1753_v58 = vrot.slane %v1752_v47, 2  ;;  %v1748_v56 = vmax.f32 %v1746_v61, %v1747_v49 }
 0x366   :  { %v5476_v18 = vpop.f32.mrf.mxu0 }
 0x367   :  { %v1764_v62 = vmax.f32 %v5472_v24, %v1763_v44  ;;  %v1769_v1 = vrot.slane %v5476_v18, 4  ;;  %v1759_v60 = vrot.slane %v1758_v12, 2  ;;  %v1754_v13 = vmax.f32 %v1752_v47, %v1753_v58  ;;  %v4365_v47 = vld [vmem:[#allocation10 + $0x70] sm:$0xff]  }
 0x368   :  { %v5480_v46 = vpop.f32.mrf.mxu0  ;;  %v1749_v61 = vrot.slane %v1748_v56, 1  ;;  %4117 = vmatprep.subr.bf16.mxu1 %v4365_v47 }
 0x369   :  { %v1770_v59 = vmax.f32 %v5476_v18, %v1769_v1  ;;  %v1775_v3 = vrot.slane %v5480_v46, 4  ;;  %v1765_v36 = vrot.slane %v1764_v62, 2  ;;  %v1760_v10 = vmax.f32 %v1758_v12, %v1759_v60  ;;  %4118 = vmatpush3.bf16.msra.mxu1 %v4366_v22 }
 0x36a   :  { %v5484_v28 = vpop.f32.mrf.mxu0  ;;  %v1755_v63 = vrot.slane %v1754_v13, 1  ;;  %v1750_v52 = vmax.f32 %v1748_v56, %v1749_v61 }
 0x36b   :  { %v1776_v48 = vmax.f32 %v5480_v46, %v1775_v3  ;;  %v1781_v33 = vrot.slane %v5484_v28, 4  ;;  %v1771_v55 = vrot.slane %v1770_v59, 2  ;;  %v1766_v49 = vmax.f32 %v1764_v62, %v1765_v36 }
 0x36c   :  { %v5488_v53 = vpop.f32.mrf.mxu0  ;;  %v1761_v12 = vrot.slane %v1760_v10, 1  ;;  %v1756_v62 = vmax.f32 %v1754_v13, %v1755_v63 }
 0x36d   :  { %v1777_v43 = vrot.slane %v1776_v48, 2  ;;  %v1782_v11 = vmax.f32 %v5484_v28, %v1781_v33  ;;  %v1787_v7 = vrot.slane %v5488_v53, 4  ;;  %v1772_v3 = vmax.f32 %v1770_v59, %v1771_v55 }
 0x36e   :  { %v5492_v44 = vpop.f32.mrf.mxu0  ;;  %v1767_v36 = vrot.slane %v1766_v49, 1  ;;  %v1938_v35 = vsub.f32 %v5464_v17, %v1756_v62 }
 0x36f   :  { %v1788_v58 = vmax.f32 %v5488_v53, %v1787_v7  ;;  %v1793_v27 = vrot.slane %v5492_v44, 4  ;;  %v1778_v60 = vmax.f32 %v1776_v48, %v1777_v43  ;;  %v1783_v33 = vrot.slane %v1782_v11, 2 }
 0x370   :  { %v5495_v1 = vpop.f32.mrf.mxu0  ;;  %v1773_v59 = vrot.slane %v1772_v3, 1  ;;  %v1762_v43 = vmax.f32 %v1760_v10, %v1761_v12  ;;  %v1768_v63 = vmax.f32 %v1766_v49, %v1767_v36  ;;  %v1971_v17 = vmul.f32 1.442695, %v1938_v35 }
 0x371   :  { %v1794_v38 = vmax.f32 %v5492_v44, %v1793_v27  ;;  %v1799_v8 = vrot.slane %v5495_v1, 4  ;;  %v1789_v7 = vrot.slane %v1788_v58, 2  ;;  %v1779_v29 = vrot.slane %v1778_v60, 1 }
 0x372   :  { %v5498_v5 = vpop.f32.mrf.mxu0  ;;  %v1784_v19 = vmax.f32 %v1782_v11, %v1783_v33  ;;  %v1937_v27 = vsub.f32 %v5461_v23, %v1750_v52  ;;  %v1939_v32 = vsub.f32 %v5467_v57, %v1762_v43 }
 0x373   :  { %v1795_v55 = vrot.slane %v1794_v38, 2  ;;  %v1800_v47 = vmax.f32 %v5495_v1, %v1799_v8  ;;  %v1805_v48 = vrot.slane %v5498_v5, 4  ;;  %v1790_v4 = vmax.f32 %v1788_v58, %v1789_v7 }
 0x374   :  { %v5502_v50 = vpop.f32.mrf.mxu0  ;;  %v1774_v8 = vmax.f32 %v1772_v3, %v1773_v59  ;;  %v1780_v10 = vmax.f32 %v1778_v60, %v1779_v29  ;;  %v1785_v12 = vrot.slane %v1784_v19, 1  ;;  %v1969_v52 = vmul.f32 1.442695, %v1937_v27 }
 0x375   :  { %v1801_v61 = vrot.slane %v1800_v47, 2  ;;  %v1806_v13 = vmax.f32 %v5498_v5, %v1805_v48  ;;  %v1796_v54 = vmax.f32 %v1794_v38, %v1795_v55  ;;  %v1811_v11 = vrot.slane %v5502_v50, 4 }
 0x376   :  { %v5506_v56 = vpop.f32.mrf.mxu0  ;;  %v1940_v58 = vsub.f32 %v5472_v24, %v1768_v63  ;;  %v1791_v38 = vrot.slane %v1790_v4, 1  ;;  %v1941_v57 = vsub.f32 %v5476_v18, %v1774_v8  ;;  %v1973_v3 = vmul.f32 1.442695, %v1939_v32 }
 0x377   :  { %v1802_v23 = vmax.f32 %v1800_v47, %v1801_v61  ;;  %v1807_v37 = vrot.slane %v1806_v13, 2  ;;  %v1817_v49 = vrot.slane %v5506_v56, 4  ;;  %v1797_v36 = vrot.slane %v1796_v54, 1 }
 0x378   :  { %v5510_v22 = vpop.f32.mrf.mxu0  ;;  %v1942_v60 = vsub.f32 %v5480_v46, %v1780_v10  ;;  %v1786_v62 = vmax.f32 %v1784_v19, %v1785_v12  ;;  %v1812_v59 = vmax.f32 %v5502_v50, %v1811_v11  ;;  %4563 = vpow2.f32 %v1969_v52 }
 0x379   :  { %v1823_v29 = vrot.slane %v5510_v22, 4  ;;  %v1803_v47 = vrot.slane %v1802_v23, 1  ;;  %v1808_v24 = vmax.f32 %v1806_v13, %v1807_v37  ;;  %v1818_v48 = vmax.f32 %v5506_v56, %v1817_v49 }
 0x37a   :  { %v5515_v33 = vpop.f32.mrf.mxu0  ;;  %v1975_v43 = vmul.f32 1.442695, %v1940_v58  ;;  %v1792_v27 = vmax.f32 %v1790_v4, %v1791_v38  ;;  %v1798_v35 = vmax.f32 %v1796_v54, %v1797_v36  ;;  %4565 = vpow2.f32 %v1971_v17 }
 0x37b   :  { %v1829_v18 = vrot.slane %v5515_v33, 4  ;;  %v1977_v32 = vmul.f32 1.442695, %v1941_v57  ;;  %v1824_v19 = vmax.f32 %v5510_v22, %v1823_v29  ;;  %4567 = vpow2.f32 %v1973_v3 }
 0x37c   :  { %v5519_v7 = vpop.f32.mrf.mxu0  ;;  %v1979_v63 = vmul.f32 1.442695, %v1942_v60  ;;  %v1943_v8 = vsub.f32 %v5484_v28, %v1786_v62  ;;  %v1813_v37 = vrot.slane %v1812_v59, 2  ;;  %v1804_v10 = vmax.f32 %v1802_v23, %v1803_v47 }
 0x37d   :  { %v1835_v46 = vrot.slane %v5519_v7, 4  ;;  %v1809_v4 = vrot.slane %v1808_v24, 1  ;;  %v1819_v54 = vrot.slane %v1818_v48, 2  ;;  %4569 = vpow2.f32 %v1975_v43 }
 0x37e   :  { %v5525_v55 = vpop.f32.mrf.mxu0  ;;  %v1944_v11 = vsub.f32 %v5488_v53, %v1792_v27  ;;  %v1945_v52 = vsub.f32 %v5492_v44, %v1798_v35  ;;  %v1830_v49 = vmax.f32 %v5515_v33, %v1829_v18  ;;  %4571 = vpow2.f32 %v1977_v32 }
 0x37f   :  { %v1841_v12 = vrot.slane %v5525_v55, 4  ;;  %v1825_v38 = vrot.slane %v1824_v19, 2  ;;  %v1836_v28 = vmax.f32 %v5519_v7, %v1835_v46  ;;  %4573 = vpow2.f32 %v1979_v63 }
 0x380   :  { %v5529_v61 = vpop.f32.mrf.mxu0  ;;  %v1981_v23 = vmul.f32 1.442695, %v1943_v8  ;;  %v1814_v17 = vmax.f32 %v1812_v59, %v1813_v37  ;;  %v1946_v53 = vsub.f32 %v5495_v1, %v1804_v10  ;;  %v1810_v44 = vmax.f32 %v1808_v24, %v1809_v4 }
 0x381   :  { %v1847_v36 = vrot.slane %v5529_v61, 4  ;;  %v1842_v57 = vmax.f32 %v5525_v55, %v1841_v12  ;;  %v1820_v3 = vmax.f32 %v1818_v48, %v1819_v54  ;;  %v1983_v62 = vmul.f32 1.442695, %v1944_v11 }
 0x382   :  { %v5534_v13 = vpop.f32.mrf.mxu0  ;;  %v1985_v47 = vmul.f32 1.442695, %v1945_v52  ;;  %v1831_v43 = vrot.slane %v1830_v49, 2  ;;  %v1826_v18 = vmax.f32 %v1824_v19, %v1825_v38  ;;  %v1837_v32 = vrot.slane %v1836_v28, 2 }
 0x383   :  { %v1853_v60 = vrot.slane %v5534_v13, 4  ;;  %v1848_v27 = vmax.f32 %v5529_v61, %v1847_v36  ;;  %4575 = vpow2.f32 %v1981_v23  ;;  %v1815_v63 = vrot.slane %v1814_v17, 1 }
 0x384   :  { %v5540_v58 = vpop.f32.mrf.mxu0  ;;  %v1843_v1 = vrot.slane %v1842_v57, 2  ;;  %v1987_v48 = vmul.f32 1.442695, %v1946_v53  ;;  %v1947_v8 = vsub.f32 %v5498_v5, %v1810_v44  ;;  %v1821_v37 = vrot.slane %v1820_v3, 1 }
 0x385   :  { %v1854_v59 = vmax.f32 %v5534_v13, %v1853_v60  ;;  %v1859_v46 = vrot.slane %v5540_v58, 4  ;;  %v5558_v4 = vpop.eup %4563  ;;  %4577 = vpow2.f32 %v1983_v62  ;;  %v1832_v19 = vmax.f32 %v1830_v49, %v1831_v43 }
 0x386   :  { %v5545_v29 = vpop.f32.mrf.mxu0  ;;  %v1849_v54 = vrot.slane %v1848_v27, 2  ;;  %4579 = vpow2.f32 %v1985_v47  ;;  %v1827_v52 = vrot.slane %v1826_v18, 1  ;;  %v1838_v38 = vmax.f32 %v1836_v28, %v1837_v32  ;;  %v4367_v47 = vld [vmem:[#allocation10 + $0x68] sm:$0xff]  }
 0x387   :  { %v1860_v10 = vmax.f32 %v5540_v58, %v1859_v46  ;;  %v1865_v12 = vrot.slane %v5545_v29, 4  ;;  %v1855_v36 = vrot.slane %v1854_v59, 2  ;;  %v5563_v23 = vpop.eup %4565  ;;  %v1816_v53 = vmax.f32 %v1814_v17, %v1815_v63  ;;  %4119 = vmatprep.subr.bf16.mxu1 %v4367_v47 }
 0x388   :  { %v5550_v35 = vpop.f32.mrf.mxu0  ;;  %v1844_v5 = vmax.f32 %v1842_v57, %v1843_v1  ;;  %v5567_v46 = vpop.eup %4567  ;;  %4581 = vpow2.f32 %v1987_v48  ;;  %v1989_v49 = vmul.f32 1.442695, %v1947_v8  ;;  %v1822_v62 = vmax.f32 %v1820_v3, %v1821_v37 }
 0x389   :  { %v1866_v44 = vmax.f32 %v5545_v29, %v1865_v12  ;;  %v1871_v60 = vrot.slane %v5550_v35, 4  ;;  %v1861_v43 = vrot.slane %v1860_v10, 2  ;;  %v1833_v40 = vrot.slane %v1832_v19, 1 }
 0x38a   :  { %v5554_v24 = vpop.f32.mrf.mxu0  ;;  %v1850_v28 = vmax.f32 %v1848_v27, %v1849_v54  ;;  %v5573_v57 = vpop.eup %4569  ;;  %v1828_v63 = vmax.f32 %v1826_v18, %v1827_v52  ;;  %v1839_v1 = vrot.slane %v1838_v38, 1  ;;  %v1856_v12 = vmax.f32 %v1854_v59, %v1855_v36 }
 0x38b   :  { %v1872_v32 = vmax.f32 %v5550_v35, %v1871_v60  ;;  %v1877_v17 = vrot.slane %v5554_v24, 4  ;;  %v1867_v39 = vrot.slane %v1866_v44, 2  ;;  %v5575_v48 = vpop.eup %4571  ;;  %v1845_v3 = vrot.slane %v1844_v5, 1 }
 0x38c   :  { %v5561_v11 = vpop.f32.mrf.mxu0  ;;  %v5579_v27 = vpop.eup %4573  ;;  %4583 = vpow2.f32 %v1989_v49  ;;  %v1948_v54 = vsub.f32 %v5502_v50, %v1816_v53  ;;  %v1949_v60 = vsub.f32 %v5506_v56, %v1822_v62  ;;  %v1862_v18 = vmax.f32 %v1860_v10, %v1861_v43 }
 0x38d   :  { %v1873_v8 = vrot.slane %v1872_v32, 2  ;;  %v1878_v37 = vmax.f32 %v5554_v24, %v1877_v17  ;;  %v1883_v45 = vrot.slane %v5561_v11, 4  ;;  %v1834_v59 = vmax.f32 %v1832_v19, %v1833_v40 }
 0x38e   :  { %v5569_v20 = vpop.f32.mrf.mxu0  ;;  %v1851_v36 = vrot.slane %v1850_v28, 1  ;;  %v1840_v26 = vmax.f32 %v1838_v38, %v1839_v1  ;;  %v1857_v41 = vrot.slane %v1856_v12, 1  ;;  %v1868_v17 = vmax.f32 %v1866_v44, %v1867_v39  ;;  %v4368_v1 = vld [vmem:[#allocation10 + $0x28] sm:$0xff]  }
 0x38f   :  { %v1879_v47 = vrot.slane %v1878_v37, 2  ;;  %v1884_v25 = vmax.f32 %v5561_v11, %v1883_v45  ;;  %v1889_v2 = vrot.slane %v5569_v20, 4  ;;  %v1950_v42 = vsub.f32 %v5510_v22, %v1828_v63  ;;  %4120 = vmatpush3.bf16.msra.mxu1 %v4368_v1 }
 0x390   :  { %v5583_v52 = vpop.f32.mrf.mxu0  ;;  %v1846_v49 = vmax.f32 %v1844_v5, %v1845_v3  ;;  %v1874_v31 = vmax.f32 %v1872_v32, %v1873_v8  ;;  %v5588_v53 = vpop.eup %4575  ;;  %v1863_v56 = vrot.slane %v1862_v18, 1  ;;  %v1991_v45 = vmul.f32 1.442695, %v1948_v54 }
 0x391   :  { %v1885_v50 = vrot.slane %v1884_v25, 2  ;;  %v1880_v10 = vmax.f32 %v1878_v37, %v1879_v47  ;;  %v1890_v40 = vmax.f32 %v5569_v20, %v1889_v2  ;;  %v1895_v19 = vrot.slane %v5583_v52, 4 }
 0x392   :  { %v5592_v62 = vpop.f32.mrf.mxu0  ;;  %v1951_v39 = vsub.f32 %v5515_v33, %v1834_v59  ;;  %v1852_v38 = vmax.f32 %v1850_v28, %v1851_v36  ;;  %v5595_v43 = vpop.eup %4577  ;;  %v1993_v22 = vmul.f32 1.442695, %v1949_v60  ;;  %v1952_v5 = vsub.f32 %v5519_v7, %v1840_v26 }
 0x393   :  { %v1886_v44 = vmax.f32 %v1884_v25, %v1885_v50  ;;  %v1858_v32 = vmax.f32 %v1856_v12, %v1857_v41  ;;  %v1869_v63 = vrot.slane %v1868_v17, 1  ;;  %v5598_v3 = vpop.eup %4579  ;;  %v1875_v2 = vrot.slane %v1874_v31, 1  ;;  %v4369_v12 = vld [vmem:[#allocation10 + $0x60] sm:$0xff]  }
 0x394   :  { %v1891_v8 = vrot.slane %v1890_v40, 2  ;;  %v1896_v37 = vmax.f32 %v5583_v52, %v1895_v19  ;;  %v1901_v54 = vrot.slane %v5592_v62, 4  ;;  %v1995_v47 = vmul.f32 1.442695, %v1950_v42  ;;  %v5607_v19 = vpop.f32.mrf.mxu0  ;;  %4121 = vmatprep.subr.bf16.mxu1 %v4369_v12 }
 0x395   :  { %v1953_v33 = vsub.f32 %v5525_v55, %v1846_v49  ;;  %v1864_v25 = vmax.f32 %v1862_v18, %v1863_v56  ;;  %v1881_v28 = vrot.slane %v1880_v10, 1  ;;  %v5603_v60 = vpop.eup %4581  ;;  %4585 = vpow2.f32 %v1991_v45 }
 0x396   :  { %v1997_v41 = vmul.f32 1.442695, %v1951_v39  ;;  %v1954_v26 = vsub.f32 %v5529_v61, %v1852_v38  ;;  %v1887_v7 = vrot.slane %v1886_v44, 1  ;;  %4587 = vpow2.f32 %v1993_v22 }
 0x397   :  { %v1999_v59 = vmul.f32 1.442695, %v1952_v5  ;;  %v1955_v36 = vsub.f32 %v5534_v13, %v1858_v32  ;;  %v1870_v50 = vmax.f32 %v1868_v17, %v1869_v63  ;;  %v1876_v42 = vmax.f32 %v1874_v31, %v1875_v2  ;;  %v4370_v5 = vld [vmem:[#allocation10 + $0x20] sm:$0xff]  }
 0x398   :  { %v1892_v55 = vmax.f32 %v1890_v40, %v1891_v8  ;;  %v1897_v18 = vrot.slane %v1896_v37, 2  ;;  %v1902_v49 = vmax.f32 %v5592_v62, %v1901_v54  ;;  %4589 = vpow2.f32 %v1995_v47  ;;  %v5615_v40 = vpop.f32.mrf.mxu0  ;;  %4122 = vmatpush3.bf16.msra.mxu1 %v4370_v5 }
 0x399   :  { %v2001_v56 = vmul.f32 1.442695, %v1953_v33  ;;  %v1956_v45 = vsub.f32 %v5540_v58, %v1864_v25  ;;  %v1882_v61 = vmax.f32 %v1880_v10, %v1881_v28  ;;  %v5611_v39 = vpop.eup %4583  ;;  %4591 = vpow2.f32 %v1997_v41  ;;  %v4371_v28 = vld [vmem:[#allocation10 + $0x58] sm:$0xff]  }
 0x39a   :  { %v2003_v38 = vmul.f32 1.442695, %v1954_v26  ;;  %v1888_v22 = vmax.f32 %v1886_v44, %v1887_v7  ;;  %v1907_v13 = vrot.slane %v5607_v19, 4  ;;  %4593 = vpow2.f32 %v1999_v59  ;;  %v5622_v47 = vpop.f32.mrf.mxu0  ;;  %4123 = vmatprep.subr.bf16.mxu1 %v4371_v28 }
 0x39b   :  { %v2005_v17 = vmul.f32 1.442695, %v1955_v36  ;;  %v1957_v31 = vsub.f32 %v5545_v29, %v1870_v50  ;;  %v1958_v32 = vsub.f32 %v5550_v35, %v1876_v42  ;;  %v1893_v63 = vrot.slane %v1892_v55, 1 }
 0x39c   :  { %v1898_v1 = vmax.f32 %v1896_v37, %v1897_v18  ;;  %v1903_v58 = vrot.slane %v1902_v49, 2  ;;  %4595 = vpow2.f32 %v2001_v56  ;;  %v2007_v10 = vmul.f32 1.442695, %v1956_v45  ;;  %v5636_v56 = vpop.f32.mrf.mxu0 }
 0x39d   :  { %v1959_v2 = vsub.f32 %v5554_v24, %v1882_v61  ;;  %4597 = vpow2.f32 %v2003_v38  ;;  %v1960_v44 = vsub.f32 %v5561_v11, %v1888_v22  ;;  %v1908_v8 = vmax.f32 %v5607_v19, %v1907_v13 }
 0x39e   :  { %v1913_v29 = vrot.slane %v5615_v40, 4  ;;  %4599 = vpow2.f32 %v2005_v17  ;;  %v2009_v54 = vmul.f32 1.442695, %v1957_v31  ;;  %v2011_v35 = vmul.f32 1.442695, %v1958_v32 }
 0x39f   :  { %v1894_v33 = vmax.f32 %v1892_v55, %v1893_v63  ;;  %v1899_v37 = vrot.slane %v1898_v1, 1  ;;  %v1904_v25 = vmax.f32 %v1902_v49, %v1903_v58  ;;  %4601 = vpow2.f32 %v2007_v10 }
 0x3a0   :  { %v2013_v41 = vmul.f32 1.442695, %v1959_v2  ;;  %v2033_v24 = vrot.slane %v5558_v4, 4  ;;  %v2015_v26 = vmul.f32 1.442695, %v1960_v44  ;;  %v1909_v7 = vrot.slane %v1908_v8, 2 }
 0x3a1   :  { %v1914_v11 = vmax.f32 %v5615_v40, %v1913_v29  ;;  %v1919_v12 = vrot.slane %v5622_v47, 4  ;;  %4603 = vpow2.f32 %v2009_v54  ;;  %v2039_v50 = vrot.slane %v5563_v23, 4  ;;  %v5658_v29 = vpop.f32.mrf.mxu0 }
 0x3a2   :  { %v5627_v59 = vpop.eup %4585  ;;  %v2034_v36 = vadd.f32 %v5558_v4, %v2033_v24  ;;  %4605 = vpow2.f32 %v2011_v35  ;;  %v1961_v55 = vsub.f32 %v5569_v20, %v1894_v33  ;;  %v5634_v18 = vmax.f32 %v1898_v1, %v1899_v37 }
 0x3a3   :  { %v5631_v42 = vpop.eup %4587  ;;  %v1905_v49 = vrot.slane %v1904_v25, 1  ;;  %4607 = vpow2.f32 %v2013_v41  ;;  %v2040_v61 = vadd.f32 %v5563_v23, %v2039_v50  ;;  %v2045_v38 = vrot.slane %v5567_v46, 4 }
 0x3a4   :  { %v2035_v45 = vrot.slane %v2034_v36, 2  ;;  %4609 = vpow2.f32 %v2015_v26  ;;  %v5642_v13 = vmax.f32 %v1908_v8, %v1909_v7  ;;  %v1915_v17 = vrot.slane %v1914_v11, 2  ;;  %v4372_v7 = vld [vmem:[#allocation10 + $0x18] sm:$0xff]  }
 0x3a5   :  { %v5640_v22 = vpop.eup %4589  ;;  %v5645_v31 = vmax.f32 %v5622_v47, %v1919_v12  ;;  %v2041_v32 = vrot.slane %v2040_v61, 2  ;;  %v2046_v63 = vadd.f32 %v5567_v46, %v2045_v38  ;;  %v2051_v1 = vrot.slane %v5573_v57, 4  ;;  %4124 = vmatpush3.bf16.msra.mxu1 %v4372_v7 }
 0x3a6   :  { %v5647_v20 = vpop.eup %4591  ;;  %v2036_v5 = vadd.f32 %v2035_v45, %v2034_v36  ;;  %v2017_v10 = vmul.f32 1.442695, %v1961_v55  ;;  %v5655_v44 = vmax.f32 %v1904_v25, %v1905_v49  ;;  %v1925_v8 = vrot.slane %v5636_v56, 4 }
 0x3a7   :  { %v5651_v58 = vpop.eup %4593  ;;  %v2042_v35 = vadd.f32 %v2041_v32, %v2040_v61  ;;  %v2047_v33 = vrot.slane %v2046_v63, 2  ;;  %v2052_v37 = vadd.f32 %v5573_v57, %v2051_v1  ;;  %v5664_v24 = vmax.f32 %v1914_v11, %v1915_v17 }
 0x3a8   :  { %6317 = vst [vmem:[#allocation53_spill] sm:$0xff] %v5651_v58  ;;  %v2037_v54 = vrot.slane %v2036_v5, 1  ;;  %v2057_v25 = vrot.slane %v5575_v48, 4  ;;  %v5673_v61 = vmax.f32 %v5636_v56, %v1925_v8  ;;  %v2063_v17 = vrot.slane %v5579_v27, 4 }
 0x3a9   :  { %v5661_v28 = vpop.eup %4595  ;;  %v2043_v50 = vrot.slane %v2042_v35, 1  ;;  %v2048_v55 = vadd.f32 %v2047_v33, %v2046_v63  ;;  %v2053_v49 = vrot.slane %v2052_v37, 2  ;;  %v2069_v8 = vrot.slane %v5588_v53, 4 }
 0x3aa   :  { %6318 = vst [vmem:[#allocation54_spill] sm:$0xff] %v5661_v28  ;;  %v5668_v12 = vpop.eup %4597  ;;  %v2038_v36 = vadd.f32 %v2037_v54, %v2036_v5  ;;  %v2058_v11 = vadd.f32 %v5575_v48, %v2057_v25  ;;  %v2064_v54 = vadd.f32 %v5579_v27, %v2063_v17  ;;  %v2075_v25 = vrot.slane %v5595_v43, 4 }
 0x3ab   :  { %6319 = vst [vmem:[#allocation55_spill] sm:$0xff] %v5668_v12  ;;  %v5670_v45 = vpop.eup %4599  ;;  %v2044_v32 = vadd.f32 %v2043_v50, %v2042_v35  ;;  %v2049_v1 = vrot.slane %v2048_v55, 1  ;;  %v2054_v26 = vadd.f32 %v2053_v49, %v2052_v37  ;;  %v2081_v37 = vrot.slane %v5598_v3, 4 }
 0x3ac   :  { %6320 = vst [vmem:[#allocation56_spill] sm:$0xff] %v5670_v45  ;;  %4611 = vrcp.f32 %v2038_v36  ;;  %v5678_v5 = vpop.eup %4601  ;;  %v2059_v63 = vrot.slane %v2058_v11, 2  ;;  %v2065_v35 = vrot.slane %v2064_v54, 2  ;;  %v2070_v36 = vadd.f32 %v5588_v53, %v2069_v8 }
 0x3ad   :  { %6321 = vst [vmem:[#allocation57_spill] sm:$0xff] %v5678_v5  ;;  %4613 = vpow2.f32 %v2017_v10  ;;  %v2050_v33 = vadd.f32 %v2049_v1, %v2048_v55  ;;  %v2055_v38 = vrot.slane %v2054_v26, 1  ;;  %v2076_v49 = vadd.f32 %v5595_v43, %v2075_v25 }
 0x3ae   :  { %4615 = vrcp.f32 %v2044_v32  ;;  %v5683_v41 = vpop.eup %4603  ;;  %v2060_v7 = vadd.f32 %v2059_v63, %v2058_v11  ;;  %v2087_v17 = vrot.slane %v5603_v60, 4  ;;  %v2066_v1 = vadd.f32 %v2065_v35, %v2064_v54 }
 0x3af   :  { %6322 = vst [vmem:[#allocation58_spill] sm:$0xff] %v5683_v41  ;;  %v5687_v50 = vpop.eup %4605  ;;  %v2056_v10 = vadd.f32 %v2055_v38, %v2054_v26  ;;  %4617 = vrcp.f32 %v2050_v33  ;;  %v2071_v2 = vrot.slane %v2070_v36, 2  ;;  %v2082_v11 = vadd.f32 %v5598_v3, %v2081_v37 }
 0x3b0   :  { %6323 = vst [vmem:[#allocation59_spill] sm:$0xff] %v5687_v50  ;;  %v5691_v55 = vpop.eup %4607  ;;  %v2061_v32 = vrot.slane %v2060_v7, 1  ;;  %v2077_v8 = vrot.slane %v2076_v49, 2  ;;  %v2088_v41 = vadd.f32 %v5603_v60, %v2087_v17  ;;  %v2093_v26 = vrot.slane %v5611_v39, 4 }
 0x3b1   :  { %6324 = vst [vmem:[#allocation60_spill] sm:$0xff] %v5691_v55  ;;  %v5694_v63 = vpop.eup %4609  ;;  %4619 = vrcp.f32 %v2056_v10  ;;  %v2067_v33 = vrot.slane %v2066_v1, 1  ;;  %v2072_v25 = vadd.f32 %v2071_v2, %v2070_v36  ;;  %v2083_v50 = vrot.slane %v2082_v11, 2  ;;  %v4373_v10 = vld [vmem:[#allocation10 + $0x50] sm:$0xff]  }
 0x3b2   :  { %6325 = vst [vmem:[#allocation61_spill] sm:$0xff] %v5694_v63  ;;  %v2062_v38 = vadd.f32 %v2061_v32, %v2060_v7  ;;  %v2078_v5 = vadd.f32 %v2077_v8, %v2076_v49  ;;  %v2089_v45 = vrot.slane %v2088_v41, 2  ;;  %v2094_v55 = vadd.f32 %v5611_v39, %v2093_v26  ;;  %4125 = vmatprep.subr.bf16.mxu1 %v4373_v10 }
 0x3b3   :  { %v2099_v54 = vrot.slane %v5627_v59, 4  ;;  %v2068_v35 = vadd.f32 %v2067_v33, %v2066_v1  ;;  %v2073_v37 = vrot.slane %v2072_v25, 1  ;;  %v2084_v63 = vadd.f32 %v2083_v50, %v2082_v11 }
 0x3b4   :  { %4621 = vrcp.f32 %v2062_v38  ;;  %v2079_v12 = vrot.slane %v2078_v5, 1  ;;  %v2090_v28 = vadd.f32 %v2089_v45, %v2088_v41  ;;  %v2095_v17 = vrot.slane %v2094_v55, 2 }
 0x3b5   :  { %v2100_v58 = vadd.f32 %v5627_v59, %v2099_v54  ;;  %4623 = vrcp.f32 %v2068_v35  ;;  %v2074_v7 = vadd.f32 %v2073_v37, %v2072_v25  ;;  %v2085_v2 = vrot.slane %v2084_v63, 1 }
 0x3b6   :  { %v2105_v36 = vrot.slane %v5631_v42, 4  ;;  %v2080_v49 = vadd.f32 %v2079_v12, %v2078_v5  ;;  %v2091_v32 = vrot.slane %v2090_v28, 1  ;;  %v2096_v8 = vadd.f32 %v2095_v17, %v2094_v55 }
 0x3b7   :  { %v2101_v26 = vrot.slane %v2100_v58, 2  ;;  %4625 = vrcp.f32 %v2074_v7  ;;  %v2086_v38 = vadd.f32 %v2085_v2, %v2084_v63  ;;  %v2111_v41 = vrot.slane %v5640_v22, 4 }
 0x3b8   :  { %v2106_v50 = vadd.f32 %v5631_v42, %v2105_v36  ;;  %v6326_v11 = vsub.f32 %v5583_v52, %v5634_v18  ;;  %4627 = vrcp.f32 %v2080_v49  ;;  %v2092_v12 = vadd.f32 %v2091_v32, %v2090_v28 }
 0x3b9   :  { %v4612_v1 = vpop.eup %4611  ;;  %v2097_v55 = vrot.slane %v2096_v8, 1  ;;  %v2102_v54 = vadd.f32 %v2101_v26, %v2100_v58  ;;  %v2112_v63 = vadd.f32 %v5640_v22, %v2111_v41  ;;  %v6327_v37 = vrot.slane %v5642_v13, 1 }
 0x3ba   :  { %v5704_v45 = vpop.eup %4613  ;;  %v5709_v33 = vmul.f32 1.442695, %v6326_v11  ;;  %v2257_v25 = vmul.f32 %v4612_v1, %v5558_v4  ;;  %v2107_v35 = vrot.slane %v2106_v50, 2  ;;  %v1917_v17 = vrot.slane %v5664_v24, 1 }
 0x3bb   :  { %v4616_v5 = vpop.eup %4615  ;;  %v5716_v10 = vmax.f32 %v5642_v13, %v6327_v37  ;;  %4629 = vrcp.f32 %v2086_v38  ;;  %v2103_v28 = vrot.slane %v2102_v54, 1  ;;  %v2113_v2 = vrot.slane %v2112_v63, 2 }
 0x3bc   :  { %v2258_v52 = vmul.f32 %v4616_v5, %v5563_v23  ;;  %v2289_v18 = vmul.f32 %v5287_v9, %v2257_v25  ;;  %v4618_v4 = vpop.eup %4617  ;;  %v2108_v7 = vadd.f32 %v2107_v35, %v2106_v50  ;;  %4631 = vrcp.f32 %v2092_v12 }
 0x3bd   :  { %v2259_v32 = vmul.f32 %v4618_v4, %v5567_v46  ;;  %v2098_v13 = vadd.f32 %v2097_v55, %v2096_v8  ;;  %v2114_v41 = vadd.f32 %v2113_v2, %v2112_v63  ;;  %v6328_v50 = vrot.slane %v5645_v31, 2 }
 0x3be   :  { %v2321_v58 = vrot.slane %v2289_v18, 4  ;;  %v3598_v36 = vmax.f32 %v2257_v25, %v2258_v52  ;;  %v2290_v49 = vmul.f32 %v5275_v0, %v2258_v52  ;;  %v4620_v26 = vpop.eup %4619  ;;  %v2109_v1 = vrot.slane %v2108_v7, 1  ;;  %v4374_v52 = vld [vmem:[#allocation10 + $0x10] sm:$0xff]  }
 0x3bf   :  { %v2260_v9 = vmul.f32 %v4620_v26, %v5573_v57  ;;  %v2291_v38 = vmul.f32 %v5278_v16, %v2259_v32  ;;  %v5728_v25 = vmax.f32 %v5645_v31, %v6328_v50  ;;  %v1927_v0 = vrot.slane %v5673_v61, 2  ;;  %4126 = vmatpush3.bf16.msra.mxu1 %v4374_v52 }
 0x3c0   :  { %v2322_v11 = vadd.f32 %v2321_v58, %v2289_v18  ;;  %3599 = vmax.xlane.f32.xlu0 %v3598_v36  ;;  %v2327_v23 = vrot.slane %v2290_v49, 4  ;;  %v2104_v46 = vadd.f32 %v2103_v28, %v2102_v54  ;;  %v2115_v5 = vrot.slane %v2114_v41, 1 }
 0x3c1   :  { %v4622_v12 = vpop.eup %4621  ;;  %v2333_v35 = vrot.slane %v2291_v38, 4  ;;  %v3601_v63 = vmax.f32 %v2259_v32, %v2260_v9  ;;  %v6329_v37 = vrot.slane %v5658_v29, 4  ;;  %v2292_v16 = vmul.f32 %v5283_v6, %v2260_v9 }
 0x3c2   :  { %v2323_v8 = vrot.slane %v2322_v11, 2  ;;  %v2328_v55 = vadd.f32 %v2327_v23, %v2290_v49  ;;  %v2261_v31 = vmul.f32 %v4622_v12, %v5575_v48  ;;  %4633 = vrcp.f32 %v2098_v13  ;;  %v4624_v18 = vpop.eup %4623 }
 0x3c3   :  { %v5734_v57 = vmax.f32 %v5658_v29, %v6329_v37  ;;  %v2334_v28 = vadd.f32 %v2333_v35, %v2291_v38  ;;  %v2110_v2 = vadd.f32 %v2109_v1, %v2108_v7  ;;  %v2339_v58 = vrot.slane %v2292_v16, 4  ;;  %v4376_v1 = vld [vmem:[#allocation10 + $0x8] sm:$0xff]  }
 0x3c4   :  { %v2324_v54 = vadd.f32 %v2323_v8, %v2322_v11  ;;  %v2329_v4 = vrot.slane %v2328_v55, 2  ;;  %3602 = vmax.xlane.f32.xlu0 %v3601_v63  ;;  %v2262_v36 = vmul.f32 %v4624_v18, %v5579_v27  ;;  %v2293_v49 = vmul.f32 %v5315_v15, %v2261_v31  ;;  %v4626_v32 = vpop.eup %4625  ;;  %v4375_v15 = vld [vmem:[#allocation10 + $0x48] sm:$0xff]   ;;  %v4378_v18 = vld [vmem:[#allocation10] sm:$0xff]  }
 0x3c5   :  { %4635 = vrcp.f32 %v2104_v46  ;;  %v2335_v23 = vrot.slane %v2334_v28, 2  ;;  %v2116_v48 = vadd.f32 %v2115_v5, %v2114_v41  ;;  %v4628_v13 = vpop.eup %4627  ;;  %v2340_v9 = vadd.f32 %v2339_v58, %v2292_v16  ;;  %v4377_v46 = vld [vmem:[#allocation10 + $0x40] sm:$0xff]   ;;  %4127 = vmatprep.subr.bf16.mxu1 %v4375_v15 }
 0x3c6   :  { %v2325_v26 = vrot.slane %v2324_v54, 1  ;;  %v2330_v6 = vadd.f32 %v2329_v4, %v2328_v55  ;;  %v2345_v50 = vrot.slane %v2293_v49, 4  ;;  %v3604_v11 = vmax.f32 %v2261_v31, %v2262_v36  ;;  %4128 = vmatpush3.bf16.msra.mxu1 %v4376_v1 }
 0x3c7   :  { %v2294_v38 = vmul.f32 %v5303_v14, %v2262_v36  ;;  %v2336_v7 = vadd.f32 %v2335_v23, %v2334_v28  ;;  %v2263_v27 = vmul.f32 %v4626_v32, %v5588_v53  ;;  %4637 = vrcp.f32 %v2110_v2  ;;  %4129 = vmatprep.subr.bf16.mxu1 %v4377_v46 }
 0x3c8   :  { %v2326_v12 = vadd.f32 %v2325_v26, %v2324_v54  ;;  %v2341_v8 = vrot.slane %v2340_v9, 2  ;;  %v2346_v35 = vadd.f32 %v2345_v50, %v2293_v49  ;;  %3605 = vmax.xlane.f32.xlu0 %v3604_v11  ;;  %v2264_v41 = vmul.f32 %v4628_v13, %v5595_v43  ;;  %v4630_v5 = vpop.eup %4629 }
 0x3c9   :  { %v2351_v55 = vrot.slane %v2294_v38, 4  ;;  %v1933_v63 = vrot.slane %v5734_v57, 2  ;;  %v2331_v37 = vrot.slane %v2330_v6, 1  ;;  %v2337_v14 = vrot.slane %v2336_v7, 1  ;;  %v4632_v54 = vpop.eup %4631 }
 0x3ca   :  { %4639 = vrcp.f32 %v2116_v48  ;;  %v2342_v16 = vadd.f32 %v2341_v8, %v2340_v9  ;;  %v2347_v31 = vrot.slane %v2346_v35, 2  ;;  %v3607_v52 = vmax.f32 %v2263_v27, %v2264_v41  ;;  %4130 = vmatpush3.bf16.msra.mxu1 %v4378_v18 }
 0x3cb   :  { %v2352_v53 = vadd.f32 %v2351_v55, %v2294_v38  ;;  %v1923_v4 = vrot.slane %v5728_v25, 1  ;;  %v1928_v28 = vmax.f32 %v5673_v61, %v1927_v0  ;;  %v2513_v2 = vpack.c.bf16 %v2326_v12, %v2326_v12 }
 0x3cc   :  { %v2338_v43 = vadd.f32 %v2337_v14, %v2336_v7  ;;  %v2343_v58 = vrot.slane %v2342_v16, 1  ;;  %v2348_v36 = vadd.f32 %v2347_v31, %v2346_v35  ;;  %v2295_v32 = vmul.f32 %v5306_v30, %v2263_v27  ;;  %3608 = vmax.xlane.f32.xlu0 %v3607_v52 }
 0x3cd   :  { %v2353_v49 = vrot.slane %v2352_v53, 2  ;;  %v1934_v26 = vmax.f32 %v5734_v57, %v1933_v63  ;;  %v2117_v13 = vrot.slane %v5647_v20, 4  ;;  %v5750_v9 = vadd.f32 %v2331_v37, %v2330_v6 }
 0x3ce   :  { %v2515_v23 = vpack.c.bf16 %v2338_v43, %v2338_v43  ;;  %v3066_v48 = vsel %vm2648_vm0, %v2338_v43, %v2326_v12  ;;  %v5752_v50 = vadd.f32 %v2343_v58, %v2342_v16  ;;  %v2349_v61 = vrot.slane %v2348_v36, 1 }
 0x3cf   :  { %v2354_v0 = vadd.f32 %v2353_v49, %v2352_v53  ;;  %v4634_v11 = vpop.eup %4633  ;;  %v2616_v38 = vunpack.c.l.b16 %v2513_v2  ;;  %v2265_v30 = vmul.f32 %v4630_v5, %v5598_v3  ;;  %v2266_v27 = vmul.f32 %v4632_v54, %v5603_v60 }
 0x3d0   :  { %v2618_v7 = vunpack.c.l.b16 %v2515_v23  ;;  %v3073_v57 = vsel %vm2648_vm0, %v5752_v50, %v5750_v9  ;;  %v2350_v12 = vadd.f32 %v2349_v61, %v2348_v36  ;;  %v2357_v6 = vrot.slane %v2295_v32, 4 }
 0x3d1   :  { %v2355_v15 = vrot.slane %v2354_v0, 1  ;;  %v1918_v46 = vmax.f32 %v5664_v24, %v1917_v17  ;;  %v1929_v8 = vrot.slane %v1928_v28, 1  ;;  %v2296_v55 = vmul.f32 %v5311_v21, %v2264_v41 }
 0x3d2   :  { %v4636_v1 = vpop.eup %4635  ;;  %v2649_v35 = vsel %vm2648_vm0, %v2618_v7, %v2616_v38  ;;  %v1935_v3 = vrot.slane %v1934_v26, 1  ;;  %v2517_v5 = vpack.c.bf16 %v2350_v12, %v2350_v12  ;;  %v5765_v60 = vsel %vm2650_vm1, %v2350_v12, %v3066_v48  ;;  %v6330_v7 = vld [vmem:[#allocation53_spill] sm:$0xff] }
 0x3d3   :  { %v5767_v63 = vadd.f32 %v2355_v15, %v2354_v0  ;;  %v1963_v37 = vsub.f32 %v5592_v62, %v5655_v44  ;;  %v1924_v14 = vmax.f32 %v5728_v25, %v1923_v4  ;;  %v2297_v16 = vmul.f32 %v5339_v51, %v2265_v30  ;;  %v6331_v15 = vld [vmem:[#allocation32_spill] sm:$0xff] }
 0x3d4   :  { %v3610_v24 = vmax.f32 %v2265_v30, %v2266_v27  ;;  %v4638_v17 = vpop.eup %4637  ;;  %v2620_v31 = vunpack.c.l.b16 %v2517_v5  ;;  %v2358_v41 = vadd.f32 %v2357_v6, %v2295_v32  ;;  %v2118_v53 = vadd.f32 %v5647_v20, %v2117_v13 }
 0x3d5   :  { %v5775_v21 = vsel %vm2650_vm1, %v5767_v63, %v3073_v57  ;;  %v1964_v52 = vsub.f32 %v5607_v19, %v5716_v10  ;;  %v1965_v18 = vsub.f32 %v5615_v40, %v1918_v46  ;;  %v1930_v62 = vmax.f32 %v1928_v28, %v1929_v8  ;;  %v6332_v8 = vld [vmem:[#allocation33_spill] sm:$0xff] }
 0x3d6   :  { %v2363_v44 = vrot.slane %v2296_v55, 4  ;;  %3611 = vmax.xlane.f32.xlu0 %v3610_v24  ;;  %v1936_v51 = vmax.f32 %v1934_v26, %v1935_v3  ;;  %v5782_v54 = vsel %vm2650_vm1, %v2620_v31, %v2649_v35  ;;  %v2267_v4 = vmul.f32 %v4634_v11, %v5611_v39  ;;  %v6333_v24 = vld [vmem:[#allocation54_spill] sm:$0xff] }
 0x3d7   :  { %v4640_v25 = vpop.eup %4639  ;;  %v2268_v2 = vmul.f32 %v4636_v1, %v5627_v59  ;;  %4641 = vpow2.f32 %v5709_v33  ;;  %v2021_v43 = vmul.f32 1.442695, %v1963_v37  ;;  %v2369_v58 = vrot.slane %v2297_v16, 4 }
 0x3d8   :  { %v1966_v19 = vsub.f32 %v5622_v47, %v1924_v14  ;;  %v2359_v10 = vrot.slane %v2358_v41, 2  ;;  %v2119_v28 = vrot.slane %v2118_v53, 2  ;;  %v2023_v36 = vmul.f32 1.442695, %v1964_v52  ;;  %v6334_v52 = vld [vmem:[#allocation55_spill] sm:$0xff] }
 0x3d9   :  { %v3613_v40 = vmax.f32 %v2267_v4, %v2268_v2  ;;  %v2025_v49 = vmul.f32 1.442695, %v1965_v18  ;;  %v1967_v32 = vsub.f32 %v5636_v56, %v1930_v62  ;;  %v2364_v26 = vadd.f32 %v2363_v44, %v2296_v55 }
 0x3da   :  { %v1968_v23 = vsub.f32 %v5658_v29, %v1936_v51  ;;  %v2298_v39 = vmul.f32 %v5329_v34, %v2266_v27  ;;  %v2269_v59 = vmul.f32 %v4638_v17, %v5631_v42  ;;  %v5793_v33 = vmul.f32 %v4640_v25, %v5640_v22  ;;  %v6335_v51 = vld [vmem:[#allocation56_spill] sm:$0xff] }
 0x3db   :  { %3614 = vmax.xlane.f32.xlu0 %v3613_v40  ;;  %4643 = vpow2.f32 %v2021_v43  ;;  %v2370_v47 = vadd.f32 %v2369_v58, %v2297_v16  ;;  %v2027_v48 = vmul.f32 1.442695, %v1966_v19  ;;  %v2360_v13 = vadd.f32 %v2359_v10, %v2358_v41  ;;  %v6336_v43 = vld [vmem:[#allocation37_spill] sm:$0xff] }
 0x3dc   :  { %v3616_v61 = vmax.f32 %v2269_v59, %v5793_v33  ;;  %v2120_v0 = vadd.f32 %v2119_v28, %v2118_v53  ;;  %4645 = vpow2.f32 %v2023_v36  ;;  %v2029_v56 = vmul.f32 1.442695, %v1967_v32 }
 0x3dd   :  { %v2365_v11 = vrot.slane %v2364_v26, 2  ;;  %4647 = vpow2.f32 %v2025_v49  ;;  %v2031_v29 = vmul.f32 1.442695, %v1968_v23  ;;  %v2375_v38 = vrot.slane %v2298_v39, 4  ;;  %v6337_v49 = vld [vmem:[#allocation57_spill] sm:$0xff] }
 0x3de   :  { %v2514_v34 = vpack.c.bf16 %v5750_v9, %v5750_v9  ;;  %v2516_v42 = vpack.c.bf16 %v5752_v50, %v5752_v50  ;;  %v2371_v22 = vrot.slane %v2370_v47, 2  ;;  %v2123_v30 = vrot.slane %v6330_v7, 4 }
 0x3df   :  { %3617 = vmax.xlane.f32.xlu0 %v3616_v61  ;;  %4649 = vpow2.f32 %v2027_v48  ;;  %v2361_v27 = vrot.slane %v2360_v13, 1  ;;  %v2121_v57 = vrot.slane %v2120_v0, 1  ;;  %v5801_v12 = vadd.f32 %v2365_v11, %v2364_v26 }
 0x3e0   :  { %4651 = vpow2.f32 %v2029_v56  ;;  %v2299_v6 = vmul.f32 %v6331_v15, %v2267_v4  ;;  %v2124_v1 = vadd.f32 %v6330_v7, %v2123_v30  ;;  %v2376_v46 = vadd.f32 %v2375_v38, %v2298_v39 }
 0x3e1   :  { %4653 = vpow2.f32 %v2031_v29  ;;  %v2300_v9 = vmul.f32 %v6332_v8, %v2268_v2  ;;  %v5806_v35 = vunpack.c.l.b16 %v2514_v34  ;;  %v5808_v50 = vunpack.c.l.b16 %v2516_v42  ;;  %v6339_v34 = vld [vmem:[#allocation59_spill] sm:$0xff] }
 0x3e2   :  { %v5810_v55 = vadd.f32 %v2371_v22, %v2370_v47  ;;  %v2125_v3 = vrot.slane %v2124_v1, 2  ;;  %v2518_v37 = vpack.c.bf16 %v5767_v63, %v5767_v63  ;;  %v5816_v14 = vadd.f32 %v2361_v27, %v2360_v13  ;;  %v6338_v47 = vld [vmem:[#allocation58_spill] sm:$0xff] }
 0x3e3   :  { %v2122_v16 = vadd.f32 %v2121_v57, %v2120_v0  ;;  %v2129_v17 = vrot.slane %v6333_v24, 4  ;;  %v2367_v31 = vrot.slane %v5801_v12, 1  ;;  %v2381_v41 = vrot.slane %v2299_v6, 4  ;;  %v6340_v57 = vld [vmem:[#allocation60_spill] sm:$0xff] }
 0x3e4   :  { %v5812_v5 = vpop.eup %4641  ;;  %v2126_v53 = vadd.f32 %v2125_v3, %v2124_v1  ;;  %v2135_v18 = vrot.slane %v6334_v52, 4  ;;  %v2377_v62 = vrot.slane %v2376_v46, 2  ;;  %v2387_v44 = vrot.slane %v2300_v9, 4  ;;  %v6341_v3 = vld [vmem:[#allocation61_spill] sm:$0xff] }
 0x3e5   :  { %v2130_v25 = vadd.f32 %v6333_v24, %v2129_v17  ;;  %v2141_v4 = vrot.slane %v6335_v51, 4  ;;  %v2373_v2 = vrot.slane %v5810_v55, 1  ;;  %v5825_v58 = vmul.f32 %v6336_v43, %v2269_v59 }
 0x3e6   :  { %v2127_v19 = vrot.slane %v2126_v53, 1  ;;  %v2136_v10 = vadd.f32 %v6334_v52, %v2135_v18  ;;  %4655 = vrcp.f32 %v2122_v16  ;;  %v2147_v32 = vrot.slane %v6337_v49, 4 }
 0x3e7   :  { %v2131_v28 = vrot.slane %v2130_v25, 2  ;;  %v2142_v36 = vadd.f32 %v6335_v51, %v2141_v4  ;;  %v5832_v26 = vadd.f32 %v2381_v41, %v2299_v6  ;;  %v2153_v48 = vrot.slane %v6338_v47, 4 }
 0x3e8   :  { %v5828_v40 = vpop.eup %4643  ;;  %v2128_v23 = vadd.f32 %v2127_v19, %v2126_v53  ;;  %v2137_v39 = vrot.slane %v2136_v10, 2  ;;  %v5837_v59 = vadd.f32 %v2377_v62, %v2376_v46  ;;  %v2148_v56 = vadd.f32 %v6337_v49, %v2147_v32 }
 0x3e9   :  { %v5835_v13 = vpop.eup %4645  ;;  %v2132_v61 = vadd.f32 %v2131_v28, %v2130_v25  ;;  %v2143_v0 = vrot.slane %v2142_v36, 2  ;;  %v2154_v38 = vadd.f32 %v6338_v47, %v2153_v48  ;;  %v2159_v42 = vrot.slane %v6339_v34, 4 }
 0x3ea   :  { %v5840_v11 = vpop.eup %4647  ;;  %4657 = vrcp.f32 %v2128_v23  ;;  %v2138_v29 = vadd.f32 %v2137_v39, %v2136_v10  ;;  %v2149_v27 = vrot.slane %v2148_v56, 2  ;;  %v2165_v15 = vrot.slane %v6340_v57, 4 }
 0x3eb   :  { %v2133_v22 = vrot.slane %v2132_v61, 1  ;;  %v2144_v30 = vadd.f32 %v2143_v0, %v2142_v36  ;;  %v2155_v46 = vrot.slane %v2154_v38, 2  ;;  %v2160_v8 = vadd.f32 %v6339_v34, %v2159_v42 }
 0x3ec   :  { %v5845_v6 = vpop.eup %4649  ;;  %v2139_v1 = vrot.slane %v2138_v29, 1  ;;  %v2171_v16 = vrot.slane %v6341_v3, 4  ;;  %v2150_v18 = vadd.f32 %v2149_v27, %v2148_v56  ;;  %v2166_v62 = vadd.f32 %v6340_v57, %v2165_v15 }
 0x3ed   :  { %v5849_v17 = vpop.eup %4651  ;;  %v2134_v41 = vadd.f32 %v2133_v22, %v2132_v61  ;;  %v2145_v53 = vrot.slane %v2144_v30, 1  ;;  %v2156_v43 = vadd.f32 %v2155_v46, %v2154_v38  ;;  %v2161_v19 = vrot.slane %v2160_v8, 2 }
 0x3ee   :  { %v5852_v25 = vpop.eup %4653  ;;  %v2140_v4 = vadd.f32 %v2139_v1, %v2138_v29  ;;  %v2172_v10 = vadd.f32 %v6341_v3, %v2171_v16  ;;  %v5855_v28 = vadd.f32 %v2387_v44, %v2300_v9  ;;  %v2151_v32 = vrot.slane %v2150_v18, 1 }
 0x3ef   :  { %4659 = vrcp.f32 %v2134_v41  ;;  %v2146_v36 = vadd.f32 %v2145_v53, %v2144_v30  ;;  %v2157_v23 = vrot.slane %v2156_v43, 1  ;;  %v2162_v39 = vadd.f32 %v2161_v19, %v2160_v8 }
 0x3f0   :  { %4661 = vrcp.f32 %v2140_v4  ;;  %v2167_v48 = vrot.slane %v2166_v62, 2  ;;  %v2393_v61 = vrot.slane %v5825_v58, 4  ;;  %v2152_v0 = vadd.f32 %v2151_v32, %v2150_v18  ;;  %v6342_v32 = vld [vmem:[#allocation34_spill] sm:$0xff] }
 0x3f1   :  { %4663 = vrcp.f32 %v2146_v36  ;;  %v2173_v56 = vrot.slane %v2172_v10, 2  ;;  %v2158_v42 = vadd.f32 %v2157_v23, %v2156_v43  ;;  %v2163_v29 = vrot.slane %v2162_v39, 1 }
 0x3f2   :  { %v2168_v38 = vadd.f32 %v2167_v48, %v2166_v62  ;;  %v2177_v22 = vrot.slane %v5704_v45, 4  ;;  %v5860_v9 = vadd.f32 %v2373_v2, %v5810_v55  ;;  %4665 = vrcp.f32 %v2152_v0 }
 0x3f3   :  { %v2174_v44 = vadd.f32 %v2173_v56, %v2172_v10  ;;  %v2183_v30 = vrot.slane %v5812_v5, 4  ;;  %v4656_v27 = vpop.eup %4655  ;;  %v2164_v15 = vadd.f32 %v2163_v29, %v2162_v39  ;;  %4667 = vrcp.f32 %v2158_v42 }
 0x3f4   :  { %v2169_v1 = vrot.slane %v2168_v38, 1  ;;  %v2178_v46 = vadd.f32 %v5704_v45, %v2177_v22  ;;  %v2383_v8 = vrot.slane %v5832_v26, 2  ;;  %v2189_v53 = vrot.slane %v5828_v40, 4  ;;  %v6343_v22 = vld [vmem:[#allocation35_spill] sm:$0xff] }
 0x3f5   :  { %v2175_v16 = vrot.slane %v2174_v44, 1  ;;  %v2184_v41 = vadd.f32 %v5812_v5, %v2183_v30  ;;  %4669 = vrcp.f32 %v2164_v15  ;;  %v2195_v18 = vrot.slane %v5835_v13, 4 }
 0x3f6   :  { %v2170_v55 = vadd.f32 %v2169_v1, %v2168_v38  ;;  %v2179_v2 = vrot.slane %v2178_v46, 2  ;;  %v2271_v4 = vmul.f32 %v4656_v27, %v5647_v20  ;;  %v2190_v10 = vadd.f32 %v5828_v40, %v2189_v53 }
 0x3f7   :  { %v4658_v62 = vpop.eup %4657  ;;  %v2176_v43 = vadd.f32 %v2175_v16, %v2174_v44  ;;  %v2185_v19 = vrot.slane %v2184_v41, 2  ;;  %v2379_v36 = vrot.slane %v5837_v59, 1  ;;  %v5873_v23 = vmul.f32 %v6342_v32, %v5793_v33 }
 0x3f8   :  { %v2272_v39 = vmul.f32 %v4658_v62, %v6330_v7  ;;  %4671 = vrcp.f32 %v2170_v55  ;;  %v2180_v48 = vadd.f32 %v2179_v2, %v2178_v46  ;;  %v2191_v56 = vrot.slane %v2190_v10, 2 }
 0x3f9   :  { %4673 = vrcp.f32 %v2176_v43  ;;  %v2186_v0 = vadd.f32 %v2185_v19, %v2184_v41  ;;  %v5879_v20 = vunpack.c.l.b16 %v2518_v37  ;;  %v2389_v42 = vrot.slane %v5855_v28, 2  ;;  %v6345_v43 = vld [vmem:[#allocation36_spill] sm:$0xff] }
 0x3fa   :  { %v3619_v29 = vmax.f32 %v2271_v4, %v2272_v39  ;;  %v2196_v38 = vadd.f32 %v5835_v13, %v2195_v18  ;;  %v2519_v33 = vpack.c.bf16 %v5816_v14, %v5816_v14  ;;  %v5886_v7 = vadd.f32 %v2393_v61, %v5825_v58  ;;  %v6344_v18 = vld [vmem:[#allocation41_spill] sm:$0xff] }
 0x3fb   :  { %v5889_v44 = vmul.f32 %v6343_v22, %v2271_v4  ;;  %v2192_v30 = vadd.f32 %v2191_v56, %v2190_v10  ;;  %v5894_v63 = vadd.f32 %v2367_v31, %v5801_v12  ;;  %v2521_v37 = vpack.c.bf16 %v5860_v9, %v5860_v9  ;;  %v6346_v10 = vld [vmem:[#allocation38_spill] sm:$0xff] }
 0x3fc   :  { %v4660_v27 = vpop.eup %4659  ;;  %v5899_v15 = vadd.f32 %v2383_v8, %v5832_v26  ;;  %3620 = vmax.xlane.f32.xlu0 %v3619_v29  ;;  %v2187_v1 = vrot.slane %v2186_v0, 1  ;;  %v5902_v61 = vadd.f32 %v2379_v36, %v5837_v59  ;;  %v2399_v46 = vrot.slane %v5873_v23, 4 }
 0x3fd   :  { %v4662_v58 = vpop.eup %4661  ;;  %v2273_v16 = vmul.f32 %v4660_v27, %v6333_v24  ;;  %v2181_v41 = vrot.slane %v2180_v48, 1  ;;  %v5907_v12 = vadd.f32 %v2389_v42, %v5855_v28  ;;  %v2193_v55 = vrot.slane %v2192_v30, 1  ;;  %v6347_v42 = vld [vmem:[#allocation39_spill] sm:$0xff] }
 0x3fe   :  { %v4664_v53 = vpop.eup %4663  ;;  %v2274_v31 = vmul.f32 %v4662_v58, %v6334_v52  ;;  %v2197_v26 = vrot.slane %v2196_v38, 2  ;;  %v2395_v8 = vrot.slane %v5886_v7, 2  ;;  %v2405_v2 = vrot.slane %v5889_v44, 4 }
 0x3ff   :  { %v2305_v59 = vmul.f32 %v6344_v18, %v2273_v16  ;;  %v2275_v62 = vmul.f32 %v4664_v53, %v6335_v51  ;;  %v4666_v4 = vpop.eup %4665  ;;  %v5915_v24 = vmul.f32 %v6345_v43, %v2272_v39  ;;  %v2188_v36 = vadd.f32 %v2187_v1, %v2186_v0 }
 0x400   :  { %v3622_v19 = vmax.f32 %v2273_v16, %v2274_v31  ;;  %v2306_v28 = vmul.f32 %v6346_v10, %v2274_v31  ;;  %v4668_v32 = vpop.eup %4667  ;;  %v2276_v56 = vmul.f32 %v4666_v4, %v6337_v49  ;;  %v2182_v22 = vadd.f32 %v2181_v41, %v2180_v48  ;;  %v6348_v31 = vld [vmem:[#allocation40_spill] sm:$0xff] }
 0x401   :  { %v2417_v52 = vrot.slane %v2305_v59, 4  ;;  %v2307_v29 = vmul.f32 %v6347_v42, %v2275_v62  ;;  %v2277_v58 = vmul.f32 %v4668_v32, %v6338_v47  ;;  %v2194_v51 = vadd.f32 %v2193_v55, %v2192_v30  ;;  %v6349_v49 = vld [vmem:[#allocation44_spill] sm:$0xff] }
 0x402   :  { %3623 = vmax.xlane.f32.xlu1 %v3622_v19  ;;  %v2423_v27 = vrot.slane %v2306_v28, 4  ;;  %v5921_v53 = vadd.f32 %v2197_v26, %v2196_v38  ;;  %v4670_v39 = vpop.eup %4669  ;;  %v3625_v43 = vmax.f32 %v2275_v62, %v2276_v56  ;;  %v2308_v0 = vmul.f32 %v6348_v31, %v2276_v56 }
 0x403   :  { %v2418_v18 = vadd.f32 %v2417_v52, %v2305_v59  ;;  %v2429_v16 = vrot.slane %v2307_v29, 4  ;;  %v2278_v10 = vmul.f32 %v4670_v39, %v6339_v34  ;;  %v2309_v4 = vmul.f32 %v6349_v49, %v2277_v58 }
 0x404   :  { %v2424_v1 = vadd.f32 %v2423_v27, %v2306_v28  ;;  %4675 = vrcp.f32 %v2188_v36  ;;  %v2435_v42 = vrot.slane %v2308_v0, 4  ;;  %v6350_v28 = vld [vmem:[#allocation31_spill] sm:$0xff]  ;;  %v2199_v49 = vrot.slane %v5921_v53, 1 }
 0x405   :  { %v4672_v48 = vpop.eup %4671  ;;  %v2419_v41 = vrot.slane %v2418_v18, 2  ;;  %v2430_v19 = vadd.f32 %v2429_v16, %v2307_v29  ;;  %4677 = vrcp.f32 %v2182_v22  ;;  %v2441_v30 = vrot.slane %v2309_v4, 4 }
 0x406   :  { %v4674_v47 = vpop.eup %4673  ;;  %v2425_v38 = vrot.slane %v2424_v1, 2  ;;  %3626 = vmax.xlane.f32.xlu1 %v3625_v43  ;;  %v3628_v55 = vmax.f32 %v2277_v58, %v2278_v10  ;;  %4679 = vrcp.f32 %v2194_v51  ;;  %v2436_v62 = vadd.f32 %v2435_v42, %v2308_v0 }
 0x407   :  { %v2420_v26 = vadd.f32 %v2419_v41, %v2418_v18  ;;  %v2431_v59 = vrot.slane %v2430_v19, 2  ;;  %v2310_v32 = vmul.f32 %v6350_v28, %v2278_v10  ;;  %v2442_v52 = vadd.f32 %v2441_v30, %v2309_v4 }
 0x408   :  { %v2426_v34 = vadd.f32 %v2425_v38, %v2424_v1  ;;  %v2279_v36 = vmul.f32 %v4672_v48, %v6340_v57  ;;  %v5929_v56 = vmul.f32 %v4674_v47, %v6341_v3  ;;  %v2437_v27 = vrot.slane %v2436_v62, 2 }
 0x409   :  { %v2421_v29 = vrot.slane %v2420_v26, 1  ;;  %v2432_v22 = vadd.f32 %v2431_v59, %v2430_v19  ;;  %v2447_v39 = vrot.slane %v2310_v32, 4  ;;  %v2400_v16 = vadd.f32 %v2399_v46, %v5873_v23 }
 0x40a   :  { %v2406_v58 = vadd.f32 %v2405_v2, %v5889_v44  ;;  %v2443_v51 = vrot.slane %v2442_v52, 2  ;;  %3629 = vmax.xlane.f32.xlu1 %v3628_v55  ;;  %v3631_v18 = vmax.f32 %v2279_v36, %v5929_v56  ;;  %v2427_v43 = vrot.slane %v2426_v34, 1 }
 0x40b   :  { %v2433_v31 = vrot.slane %v2432_v22, 1  ;;  %v2438_v0 = vadd.f32 %v2437_v27, %v2436_v62  ;;  %v2448_v1 = vadd.f32 %v2447_v39, %v2310_v32  ;;  %v2385_v57 = vrot.slane %v5899_v15, 1 }
 0x40c   :  { %v2411_v3 = vrot.slane %v5915_v24, 4  ;;  %v2444_v10 = vadd.f32 %v2443_v51, %v2442_v52  ;;  %v5937_v4 = vadd.f32 %v2421_v29, %v2420_v26  ;;  %v2391_v2 = vrot.slane %v5907_v12, 1 }
 0x40d   :  { %v5939_v23 = vadd.f32 %v2433_v31, %v2432_v22  ;;  %v2439_v44 = vrot.slane %v2438_v0, 1  ;;  %v2449_v46 = vrot.slane %v2448_v1, 2  ;;  %v2396_v48 = vadd.f32 %v2395_v8, %v5886_v7 }
 0x40e   :  { %v2401_v41 = vrot.slane %v2400_v16, 2  ;;  %v2445_v19 = vrot.slane %v2444_v10, 1  ;;  %3632 = vmax.xlane.f32.xlu1 %v3631_v18  ;;  %v2407_v42 = vrot.slane %v2406_v58, 2  ;;  %v5945_v47 = vadd.f32 %v2427_v43, %v2426_v34 }
 0x40f   :  { %v3080_v38 = vsel %vm2648_vm0, %v5939_v23, %v5937_v4  ;;  %v5950_v30 = vadd.f32 %v2439_v44, %v2438_v0  ;;  %v2622_v55 = vunpack.c.l.b16 %v2519_v33  ;;  %v2520_v26 = vpack.c.bf16 %v5894_v63, %v5894_v63 }
 0x410   :  { %v5957_v7 = vadd.f32 %v2445_v19, %v2444_v10  ;;  %v2450_v8 = vadd.f32 %v2449_v46, %v2448_v1  ;;  %v2624_v62 = vunpack.c.l.b16 %v2521_v37  ;;  %v2412_v28 = vadd.f32 %v2411_v3, %v5915_v24  ;;  %v6351_v1 = vld [vmem:[#allocation42_spill] sm:$0xff] }
 0x411   :  { %v4676_v59 = vpop.eup %4675  ;;  %v3087_v32 = vsel %vm2648_vm0, %v5950_v30, %v5945_v47  ;;  %v2200_v34 = vadd.f32 %v2199_v49, %v5921_v53  ;;  %v2522_v52 = vpack.c.bf16 %v5902_v61, %v5902_v61  ;;  %v5970_v29 = vadd.f32 %v2385_v57, %v5899_v15 }
 0x412   :  { %v4678_v33 = vpop.eup %4677  ;;  %v5974_v22 = vsel %vm2650_vm1, %v5957_v7, %v3080_v38  ;;  %v2451_v37 = vrot.slane %v2450_v8, 1  ;;  %v5977_v24 = vadd.f32 %v2391_v2, %v5907_v12  ;;  %v2397_v39 = vrot.slane %v2396_v48, 1 }
 0x413   :  { %v4680_v27 = vpop.eup %4679  ;;  %v2402_v51 = vadd.f32 %v2401_v41, %v2400_v16  ;;  %v2408_v18 = vadd.f32 %v2407_v42, %v2406_v58  ;;  %v2282_v43 = vmul.f32 %v4676_v59, %v5812_v5  ;;  %v2201_v31 = vrot.slane %v5840_v11, 4 }
 0x414   :  { %v5979_v53 = vadd.f32 %v2451_v37, %v2450_v8  ;;  %v2207_v15 = vrot.slane %v5845_v6, 4  ;;  %v2413_v0 = vrot.slane %v2412_v28, 2  ;;  %v2311_v57 = vmul.f32 %v6351_v1, %v2279_v36  ;;  %v6356_v37 = vld [vmem:[#allocation46_spill] sm:$0xff] }
 0x415   :  { %v2281_v3 = vmul.f32 %v4678_v33, %v5704_v45  ;;  %4681 = vrcp.f32 %v2200_v34  ;;  %v2653_v12 = vsel %vm2652_vm2, %v2622_v55, %v5782_v54  ;;  %v5988_v10 = vunpack.c.l.b16 %v2520_v26  ;;  %v6355_v34 = vld [vmem:[#allocation45_spill] sm:$0xff] }
 0x416   :  { %v2523_v16 = vpack.c.bf16 %v5970_v29, %v5970_v29  ;;  %v5994_v5 = vsel %vm2650_vm1, %v5979_v53, %v3087_v32  ;;  %v5997_v58 = vsel %vm2654_vm3, %v2624_v62, %v2653_v12  ;;  %v5999_v49 = vunpack.c.l.b16 %v2522_v52  ;;  %v6354_v62 = vld [vmem:[#allocation48_spill] sm:$0xff] }
 0x417   :  { %6352 = vst [vmem:[#allocation53_spill] sm:$0xff] %v5994_v5  ;;  %v6001_v36 = vadd.f32 %v2397_v39, %v2396_v48  ;;  %v3634_v45 = vmax.f32 %v2281_v3, %v2282_v43  ;;  %v2403_v44 = vrot.slane %v2402_v51, 1  ;;  %v6006_v46 = vmul.f32 %v4680_v27, %v5828_v40  ;;  %v6353_v48 = vld [vmem:[#allocation43_spill] sm:$0xff] }
 0x418   :  { %v2202_v2 = vadd.f32 %v5840_v11, %v2201_v31  ;;  %v2409_v41 = vrot.slane %v2408_v18, 1  ;;  %v2414_v19 = vadd.f32 %v2413_v0, %v2412_v28  ;;  %v2453_v42 = vrot.slane %v2311_v57, 4 }
 0x419   :  { %3635 = vmax.xlane.f32.xlu1 %v3634_v45  ;;  %v2208_v38 = vadd.f32 %v5845_v6, %v2207_v15  ;;  %v6010_v55 = vunpack.c.l.b16 %v2523_v16  ;;  %v2312_v26 = vmul.f32 %v6353_v48, %v5929_v56  ;;  %v2213_v59 = vrot.slane %v5849_v17, 4 }
 0x41a   :  { %v2203_v8 = vrot.slane %v2202_v2, 2  ;;  %v2525_v40 = vpack.c.bf16 %v6001_v36, %v6001_v36  ;;  %v2313_v32 = vmul.f32 %v6354_v62, %v2281_v3  ;;  %v2314_v33 = vmul.f32 %v6355_v34, %v2282_v43 }
 0x41b   :  { %v2209_v28 = vrot.slane %v2208_v38, 2  ;;  %v6019_v52 = vadd.f32 %v2403_v44, %v2402_v51  ;;  %v2315_v27 = vmul.f32 %v6356_v37, %v6006_v46  ;;  %v2214_v31 = vadd.f32 %v5849_v17, %v2213_v59 }
 0x41c   :  { %v2204_v39 = vadd.f32 %v2203_v8, %v2202_v2  ;;  %v6024_v56 = vadd.f32 %v2409_v41, %v2408_v18  ;;  %v2415_v15 = vrot.slane %v2414_v19, 1  ;;  %v2454_v0 = vadd.f32 %v2453_v42, %v2311_v57 }
 0x41d   :  { %v2210_v1 = vadd.f32 %v2209_v28, %v2208_v38  ;;  %v2459_v12 = vrot.slane %v2312_v26, 4  ;;  %v2215_v45 = vrot.slane %v2214_v31, 2  ;;  %v2219_v3 = vrot.slane %v5852_v25, 4 }
 0x41e   :  { %v2205_v16 = vrot.slane %v2204_v39, 1  ;;  %v2628_v43 = vunpack.c.l.b16 %v2525_v40  ;;  %v2465_v48 = vrot.slane %v2313_v32, 4  ;;  %v2471_v51 = vrot.slane %v2314_v33, 4 }
 0x41f   :  { %v2211_v44 = vrot.slane %v2210_v1, 1  ;;  %v2477_v62 = vrot.slane %v2315_v27, 4  ;;  %v2216_v37 = vadd.f32 %v2215_v45, %v2214_v31  ;;  %v2220_v2 = vadd.f32 %v5852_v25, %v2219_v3 }
 0x420   :  { %v2206_v34 = vadd.f32 %v2205_v16, %v2204_v39  ;;  %v2527_v18 = vpack.c.bf16 %v6024_v56, %v6024_v56  ;;  %v6030_v41 = vadd.f32 %v2415_v15, %v2414_v19  ;;  %v2455_v57 = vrot.slane %v2454_v0, 2 }
 0x421   :  { %v2212_v42 = vadd.f32 %v2211_v44, %v2210_v1  ;;  %v2460_v8 = vadd.f32 %v2459_v12, %v2312_v26  ;;  %v2217_v59 = vrot.slane %v2216_v37, 1  ;;  %v2221_v40 = vrot.slane %v2220_v2, 2  ;;  %v6357_v1 = vld [vmem:[#allocation47_spill] sm:$0xff] }
 0x422   :  { %v4682_v38 = vpop.eup %4681  ;;  %4683 = vrcp.f32 %v2206_v34  ;;  %v2466_v28 = vadd.f32 %v2465_v48, %v2313_v32  ;;  %v2472_v54 = vadd.f32 %v2471_v51, %v2314_v33  ;;  %v2478_v39 = vadd.f32 %v2477_v62, %v2315_v27 }
 0x423   :  { %v2284_v5 = vmul.f32 %v4682_v38, %v5835_v13  ;;  %4685 = vrcp.f32 %v2212_v42  ;;  %v2218_v31 = vadd.f32 %v2217_v59, %v2216_v37  ;;  %v2222_v16 = vadd.f32 %v2221_v40, %v2220_v2 }
 0x424   :  { %v2526_v45 = vpack.c.bf16 %v6019_v52, %v6019_v52  ;;  %v2630_v19 = vunpack.c.l.b16 %v2527_v18  ;;  %v2528_v26 = vpack.c.bf16 %v6030_v41, %v6030_v41  ;;  %v2531_v32 = vpack.c.bf16 %v5939_v23, %v5939_v23 }
 0x425   :  { %v3637_v15 = vmax.f32 %v6006_v46, %v2284_v5  ;;  %v2316_v3 = vmul.f32 %v6357_v1, %v2284_v5  ;;  %v2456_v33 = vadd.f32 %v2455_v57, %v2454_v0  ;;  %v2223_v13 = vrot.slane %v2222_v16, 1 }
 0x426   :  { %4687 = vrcp.f32 %v2218_v31  ;;  %v2461_v27 = vrot.slane %v2460_v8, 2  ;;  %v2467_v12 = vrot.slane %v2466_v28, 2  ;;  %v2473_v48 = vrot.slane %v2472_v54, 2 }
 0x427   :  { %3638 = vmax.xlane.f32.xlu1 %v3637_v15  ;;  %v2483_v51 = vrot.slane %v2316_v3, 4  ;;  %v2479_v44 = vrot.slane %v2478_v39, 2  ;;  %v2224_v62 = vadd.f32 %v2223_v13, %v2222_v16  ;;  %v6358_v46 = vpack.c.bf16 %v5977_v24, %v5977_v24 }
 0x428   :  { %v2629_v34 = vunpack.c.l.b16 %v2526_v45  ;;  %v2631_v2 = vunpack.c.l.b16 %v2528_v26  ;;  %v2662_v23 = vsel %vm2648_vm0, %v5808_v50, %v5806_v35  ;;  %v2657_v18 = vsel %vm2656_vm4, %v6010_v55, %v5997_v58 }
 0x429   :  { %v2627_v5 = vunpack.c.l.b16 %v6358_v46  ;;  %v2484_v37 = vadd.f32 %v2483_v51, %v2316_v3  ;;  %4689 = vrcp.f32 %v2224_v62  ;;  %v2663_v0 = vsel %vm2650_vm1, %v5879_v20, %v2662_v23  ;;  %v6360_v62 = vld [vmem:[#allocation49_spill] sm:$0xff] }
 0x42a   :  { %v2664_v42 = vsel %vm2652_vm2, %v5988_v10, %v2663_v0  ;;  %v2659_v38 = vsel %vm2658_vm5, %v2628_v43, %v2657_v18  ;;  %v2529_v59 = vpack.c.bf16 %v5937_v4, %v5937_v4  ;;  %v2530_v20 = vpack.c.bf16 %v5945_v47, %v5945_v47 }
 0x42b   :  { %v2485_v57 = vrot.slane %v2484_v37, 2  ;;  %v2665_v35 = vsel %vm2654_vm3, %v5999_v49, %v2664_v42  ;;  %v6060_v50 = vsel %vm2660_vm6, %v2630_v19, %v2659_v38  ;;  %v2457_v58 = vrot.slane %v2456_v33, 1  ;;  %v6361_v42 = vld [vmem:[#allocation50_spill] sm:$0xff] }
 0x42c   :  { %v2462_v55 = vadd.f32 %v2461_v27, %v2460_v8  ;;  %v2666_v40 = vsel %vm2656_vm4, %v2627_v5, %v2665_v35  ;;  %v2634_v31 = vunpack.c.l.b16 %v2531_v32  ;;  %v2468_v10 = vadd.f32 %v2467_v12, %v2466_v28  ;;  %v6359_v12 = vld [vmem:[#allocation52_spill] sm:$0xff] }
 0x42d   :  { %v2474_v16 = vadd.f32 %v2473_v48, %v2472_v54  ;;  %v2667_v43 = vsel %vm2658_vm5, %v2629_v34, %v2666_v40  ;;  %v2480_v4 = vadd.f32 %v2479_v44, %v2478_v39  ;;  %v2486_v15 = vadd.f32 %v2485_v57, %v2484_v37 }
 0x42e   :  { %v6067_v49 = vsel %vm2660_vm6, %v2631_v2, %v2667_v43  ;;  %v2632_v1 = vunpack.c.l.b16 %v2529_v59  ;;  %v2532_v47 = vpack.c.bf16 %v5950_v30, %v5950_v30  ;;  %v2533_v8 = vpack.c.bf16 %v5957_v7, %v5957_v7 }
 0x42f   :  { %v4684_v45 = vpop.eup %4683  ;;  %v6074_v28 = vunpack.c.l.b16 %v2530_v20  ;;  %v6076_v54 = vadd.f32 %v2457_v58, %v2456_v33  ;;  %v2463_v26 = vrot.slane %v2462_v55, 1  ;;  %v2469_v13 = vrot.slane %v2468_v10, 1 }
 0x430   :  { %v4686_v19 = vpop.eup %4685  ;;  %v2285_v3 = vmul.f32 %v4684_v45, %v5840_v11  ;;  %v6080_v32 = vsel %vm2648_vm0, %v2634_v31, %v2632_v1  ;;  %v2475_v27 = vrot.slane %v2474_v16, 1  ;;  %v2481_v51 = vrot.slane %v2480_v4, 1 }
 0x431   :  { %v2286_v39 = vmul.f32 %v4686_v19, %v5845_v6  ;;  %v2487_v44 = vrot.slane %v2486_v15, 1  ;;  %v6084_v46 = vunpack.c.l.b16 %v2532_v47  ;;  %v6086_v33 = vunpack.c.l.b16 %v2533_v8 }
 0x432   :  { %v2317_v48 = vmul.f32 %v6359_v12, %v2285_v3  ;;  %v2534_v34 = vpack.c.bf16 %v5979_v53, %v5979_v53  ;;  %v2535_v37 = vpack.c.bf16 %v6076_v54, %v6076_v54  ;;  %v2464_v2 = vadd.f32 %v2463_v26, %v2462_v55 }
 0x433   :  { %v4688_v30 = vpop.eup %4687  ;;  %v3640_v7 = vmax.f32 %v2285_v3, %v2286_v39  ;;  %v2318_v11 = vmul.f32 %v6360_v62, %v2286_v39  ;;  %v2470_v0 = vadd.f32 %v2469_v13, %v2468_v10  ;;  %v6093_v18 = vadd.f32 %v2475_v27, %v2474_v16 }
 0x434   :  { %v2489_v5 = vrot.slane %v2317_v48, 4  ;;  %v2287_v6 = vmul.f32 %v4688_v30, %v5849_v17  ;;  %v2482_v35 = vadd.f32 %v2481_v51, %v2480_v4  ;;  %v2488_v20 = vadd.f32 %v2487_v44, %v2486_v15 }
 0x435   :  { %3641 = vmax.xlane.f32.xlu1 %v3640_v7  ;;  %v2495_v23 = vrot.slane %v2318_v11, 4  ;;  %v3068_v17 = vsel %vm2652_vm2, %v5816_v14, %v5765_v60  ;;  %v3075_v43 = vsel %vm2652_vm2, %v5894_v63, %v5775_v21  ;;  %v3082_v45 = vsel %vm2652_vm2, %v6076_v54, %v5974_v22 }
 0x436   :  { %v2490_v57 = vadd.f32 %v2489_v5, %v2317_v48  ;;  %v2319_v38 = vmul.f32 %v6361_v42, %v2287_v6  ;;  %v4690_v59 = vpop.eup %4689  ;;  %v3069_v31 = vsel %vm2654_vm3, %v5860_v9, %v3068_v17  ;;  %v3083_v1 = vsel %vm2654_vm3, %v2470_v0, %v3082_v45 }
 0x437   :  { %v2496_v58 = vadd.f32 %v2495_v23, %v2318_v11  ;;  %v2288_v40 = vmul.f32 %v4690_v59, %v5852_v25  ;;  %v3070_v16 = vsel %vm2656_vm4, %v5970_v29, %v3069_v31  ;;  %v6362_v25 = vld [vmem:[#allocation51_spill] sm:$0xff]  ;;  %v3076_v29 = vsel %vm2654_vm3, %v5902_v61, %v3075_v43 }
 0x438   :  { %v2491_v53 = vrot.slane %v2490_v57, 2  ;;  %v2501_v55 = vrot.slane %v2319_v38, 4  ;;  %v3071_v9 = vsel %vm2658_vm5, %v6001_v36, %v3070_v16  ;;  %v3077_v3 = vsel %vm2656_vm4, %v5977_v24, %v3076_v29  ;;  %v6363_v36 = vld [vmem:[#allocation53_spill] sm:$0xff] }
 0x439   :  { %v2497_v10 = vrot.slane %v2496_v58, 2  ;;  %v3643_v4 = vmax.f32 %v2287_v6, %v2288_v40  ;;  %v2320_v15 = vmul.f32 %v6362_v25, %v2288_v40  ;;  %v6118_v22 = vsel %vm2660_vm6, %v6024_v56, %v3071_v9 }
 0x43a   :  { %v2492_v60 = vadd.f32 %v2491_v53, %v2490_v57  ;;  %v2502_v14 = vadd.f32 %v2501_v55, %v2319_v38  ;;  %v3084_v54 = vsel %vm2656_vm4, %v2482_v35, %v3083_v1  ;;  %v3089_v26 = vsel %vm2652_vm2, %v2464_v2, %v6363_v36  ;;  %v4385_v36 = vld [vmem:[#allocation11 + $0x50] ss:$8 sps:$4 sm:$0xff]  }
 0x43b   :  { %v2498_v19 = vadd.f32 %v2497_v10, %v2496_v58  ;;  %3644 = vmax.xlane.f32.xlu1 %v3643_v4  ;;  %v2507_v63 = vrot.slane %v2320_v15, 4  ;;  %v3078_v27 = vsel %vm2658_vm5, %v6019_v52, %v3077_v3  ;;  %v2536_v12 = vpack.c.bf16 %v2464_v2, %v2464_v2 }
 0x43c   :  { %v2493_v47 = vrot.slane %v2492_v60, 1  ;;  %v2503_v21 = vrot.slane %v2502_v14, 2  ;;  %v6129_v56 = vsel %vm2660_vm6, %v6030_v41, %v3078_v27  ;;  %v3090_v24 = vsel %vm2654_vm3, %v6093_v18, %v3089_v26  ;;  %v4387_v26 = vld [vmem:[#allocation11 + $0x54] ss:$8 sps:$4 sm:$0xff]   ;;  %v4391_v27 = vld [vmem:[#allocation11 + $0x30] ss:$8 sps:$4 sm:$0xff]  }
 0x43d   :  { %v2499_v8 = vrot.slane %v2498_v19, 1  ;;  %v2508_v13 = vadd.f32 %v2507_v63, %v2320_v15  ;;  %v2537_v30 = vpack.c.bf16 %v2470_v0, %v2470_v0  ;;  %v2538_v62 = vpack.c.bf16 %v6093_v18, %v6093_v18  ;;  %v4384_v63 = vld [vmem:[#allocation11 + $0x64] ss:$8 sps:$4 sm:$0xff]  }
 0x43e   :  { %v2494_v61 = vadd.f32 %v2493_v47, %v2492_v60  ;;  %v2504_v39 = vadd.f32 %v2503_v21, %v2502_v14  ;;  %v2539_v11 = vpack.c.bf16 %v2482_v35, %v2482_v35  ;;  %v2540_v5 = vpack.c.bf16 %v2488_v20, %v2488_v20  ;;  %v4379_v47 = vld [vmem:[#allocation11 + $0x70] ss:$8 sps:$4 sm:$0xff]  }
 0x43f   :  { %v2500_v48 = vadd.f32 %v2499_v8, %v2498_v19  ;;  %v2509_v44 = vrot.slane %v2508_v13, 2  ;;  %v3091_v52 = vsel %vm2656_vm4, %v2488_v20, %v3090_v24  ;;  %v2637_v57 = vunpack.c.l.b16 %v2534_v34  ;;  %v4382_v8 = vld [vmem:[#allocation11 + $0x60] ss:$8 sps:$4 sm:$0xff]  }
 0x440   :  { %v2505_v51 = vrot.slane %v2504_v39, 1  ;;  %v3085_v7 = vsel %vm2658_vm5, %v2494_v61, %v3084_v54  ;;  %v2541_v6 = vpack.c.bf16 %v2494_v61, %v2494_v61  ;;  %v2638_v42 = vunpack.c.l.b16 %v2535_v37  ;;  %v4394_v24 = vld [vmem:[#allocation11 + $0x20] ss:$8 sps:$4 sm:$0xff]  }
 0x441   :  { %v2510_v23 = vadd.f32 %v2509_v44, %v2508_v13  ;;  %v3092_v41 = vsel %vm2658_vm5, %v2500_v48, %v3091_v52  ;;  %v2639_v38 = vunpack.c.l.b16 %v2536_v12  ;;  %v2542_v0 = vpack.c.bf16 %v2500_v48, %v2500_v48  ;;  %v4396_v12 = vld [vmem:[#allocation11 + $0x24] ss:$8 sps:$4 sm:$0xff]   ;;  %v4397_v44 = vld [vmem:[#allocation11 + $0x10] ss:$8 sps:$4 sm:$0xff]  }
 0x442   :  { %v2506_v2 = vadd.f32 %v2505_v51, %v2504_v39  ;;  %v2640_v59 = vunpack.c.l.b16 %v2537_v30  ;;  %v2670_v18 = vsel %vm2650_vm1, %v6086_v33, %v6080_v32  ;;  %v2641_v35 = vunpack.c.l.b16 %v2538_v62  ;;  %v4381_v33 = vld [vmem:[#allocation11 + $0x74] ss:$8 sps:$4 sm:$0xff]   ;;  %v4390_v39 = vld [vmem:[#allocation11 + $0x44] ss:$8 sps:$4 sm:$0xff]  }
 0x443   :  { %v2511_v17 = vrot.slane %v2510_v23, 1  ;;  %v2642_v20 = vunpack.c.l.b16 %v2539_v11  ;;  %v2644_v40 = vunpack.c.l.b16 %v2541_v6  ;;  %v2643_v31 = vunpack.c.l.b16 %v2540_v5  ;;  %2923 = vmatprep.subr.bf16.mxu1 %v4381_v33  ;;  %v4399_v51 = vld [vmem:[#allocation11 + $0x14] ss:$8 sps:$4 sm:$0xff]   ;;  %v4402_v62 = vld [vmem:[#allocation11 + $0x4] ss:$8 sps:$4 sm:$0xff]  }
 0x444   :  { %v2543_v58 = vpack.c.bf16 %v2506_v2, %v2506_v2  ;;  %v6139_v53 = vsel %vm2660_vm6, %v2506_v2, %v3085_v7  ;;  %v2676_v34 = vsel %vm2648_vm0, %v6084_v46, %v6074_v28  ;;  %v2671_v37 = vsel %vm2652_vm2, %v2638_v42, %v2670_v18  ;;  %v4400_v5 = vld [vmem:[#allocation11] ss:$8 sps:$4 sm:$0xff]  }
 0x445   :  { %v2512_v55 = vadd.f32 %v2511_v17, %v2510_v23  ;;  %v2645_v16 = vunpack.c.l.b16 %v2542_v0  ;;  %v2677_v43 = vsel %vm2650_vm1, %v2637_v57, %v2676_v34  ;;  %v2672_v45 = vsel %vm2654_vm3, %v2640_v59, %v2671_v37  ;;  %v6366_v17 = vld [vmem:[#allocation30_spill] sm:$0xff] }
 0x446   :  { %v2646_v10 = vunpack.c.l.b16 %v2543_v58  ;;  %v2678_v32 = vsel %vm2652_vm2, %v2639_v38, %v2677_v43  ;;  %v2673_v25 = vsel %vm2656_vm4, %v2642_v20, %v2672_v45  ;;  %v6364_v3 = vmov 0  }
 0x447   :  { %v2544_v60 = vpack.c.bf16 %v2512_v55, %v2512_v55  ;;  %v6152_v14 = vsel %vm2660_vm6, %v2512_v55, %v3092_v41  ;;  %v2679_v4 = vsel %vm2654_vm3, %v2641_v35, %v2678_v32  ;;  %v2674_v15 = vsel %vm2658_vm5, %v2644_v40, %v2673_v25 }
 0x448   :  { %v2680_v46 = vsel %vm2656_vm4, %v2643_v31, %v2679_v4  ;;  %v2675_v9 = vsel %vm2660_vm6, %v2646_v10, %v2674_v15  ;;  %v6365_v23 = vlaneseq }
 0x449   :  { %v2647_v28 = vunpack.c.l.b16 %v2544_v60  ;;  %v2681_v19 = vsel %vm2658_vm5, %v2645_v16, %v2680_v46  ;;  %v2683_v21 = vpack.c.b16 %v2675_v9, %v6060_v50  ;;  %v6164_v54 = vpop.xlane.xlu0 %3599  ;;  %v4393_v50 = vld [vmem:[#allocation11 + $0x34] ss:$8 sps:$4 sm:$0xff]  }
 0x44a   :  { %v3663_v41 = vand.u32 127, %v6365_v23 }
 0x44b   :  { %v2682_v29 = vsel %vm2660_vm6, %v2647_v28, %v2681_v19 }
 0x44c   :  { %v2684_v1 = vpack.c.b16 %v2682_v29, %v6067_v49  ;;  %v4388_v49 = vld [vmem:[#allocation11 + $0x40] ss:$8 sps:$4 sm:$0xff]   ;;  %v3668_v42 = vadd.s32 4294967288, %v3663_v41  ;;  %v3675_v38 = vadd.s32 4294967280, %v3663_v41  ;;  %v3682_v0 = vadd.s32 4294967272, %v3663_v41 }
 0x44d   :  { %v6168_v13 = vpop.xlane.xlu0 %3602  ;;  %v3689_v59 = vadd.s32 4294967264, %v3663_v41  ;;  %v3696_v35 = vadd.s32 4294967256, %v3663_v41  ;;  %v3703_v40 = vadd.s32 4294967248, %v3663_v41  ;;  %v3710_v31 = vadd.s32 4294967240, %v3663_v41 }
 0x44e   :  { %2815 = vmatprep.mubr.bf16.mxu1 %v2684_v1  ;;  %v3671_v18 = vsub.s32 %v3668_v42, %v6366_v17  ;;  %v3678_v20 = vsub.s32 %v3675_v38, %v6366_v17  ;;  %v6174_v34 = vsub.s32 %v3663_v41, %v6366_v17  ;;  %v3685_v37 = vsub.s32 %v3682_v0, %v6366_v17 }
 0x44f   :  { %2816 = vmatmul.mubr.bf16.vlgmr.msra.gmra.mxu1 %v2683_v21  ;;  %v3692_v10 = vsub.s32 %v3689_v59, %v6366_v17  ;;  %v3699_v43 = vsub.s32 %v3696_v35, %v6366_v17  ;;  %v3706_v32 = vsub.s32 %v3703_v40, %v6366_v17  ;;  %v3713_v33 = vsub.s32 %v3710_v31, %v6366_v17  ;;  %v4408_v35 = vld [vmem:[#allocation13 + $0x64] ss:$8 sps:$4 sm:$0xff]   ;;  %v4411_v40 = vld [vmem:[#allocation13 + $0x54] ss:$8 sps:$4 sm:$0xff]  }
 0x450   :  { %2924 = vmatpush1.bf16.msra.mxu1 %v4379_v47  ;;  %2955 = vmatprep.mubr.bf16.mxu1 %v6364_v3  ;;  %v3672_v16 = vrot.slane %v6168_v13, %v3671_v18  ;;  %v3667_v28 = vrot.slane %v6164_v54, %v6174_v34  ;;  %v4414_v31 = vld [vmem:[#allocation13 + $0x44] ss:$8 sps:$4 sm:$0xff]  }
 0x451   :  { %2925 = vmatprep.subr.bf16.mxu1 %v4384_v63  ;;  %v3606_v30 = vpop.xlane.xlu0 %3605 }
 0x452   :  { %v3679_v60 = vrot.slane %v3606_v30, %v3678_v20  ;;  %v3674_v47 = vsel %vm3673_vm7, %v3672_v16, %v3667_v28  ;;  %v4415_v16 = vld [vmem:[#allocation13 + $0x30] ss:$8 sps:$4 sm:$0xff]  }
 0x453   :  { %v4427_v28 = vld [vmem:[#allocation13 + $0xf0] ss:$8 sps:$4 sm:$0xff]  }
 0x454   :  { %2926 = vmatpush1.bf16.msra.mxu1 %v4382_v8  ;;  %v3681_v3 = vsel %vm3680_vm8, %v3679_v60, %v3674_v47  ;;  %v4423_v60 = vld [vmem:[#allocation13 + $0x14] ss:$8 sps:$4 sm:$0xff]   ;;  %v4439_v47 = vld [vmem:[#allocation13 + $0xb0] ss:$8 sps:$4 sm:$0xff]  }
 0x455   :  { %2927 = vmatprep.subr.bf16.mxu1 %v4387_v26  ;;  %v3609_v11 = vpop.xlane.xlu0 %3608 }
 0x456   :  { %v3686_v46 = vrot.slane %v3609_v11, %v3685_v37 }
 0x458   :  { %2928 = vmatpush1.bf16.msra.mxu1 %v4385_v36 }
 0x459   :  { %2929 = vmatprep.subr.bf16.mxu1 %v4390_v39 }
 0x45c   :  { %2930 = vmatpush1.bf16.msra.mxu1 %v4388_v49 }
 0x45d   :  { %2931 = vmatprep.subr.bf16.mxu1 %v4393_v50 }
 0x45f   :  { %v3612_v6 = vpop.xlane.xlu0 %3611 }
 0x460   :  { %2932 = vmatpush1.bf16.msra.mxu1 %v4391_v27  ;;  %v3693_v9 = vrot.slane %v3612_v6, %v3692_v10 }
 0x461   :  { %2933 = vmatprep.subr.bf16.mxu1 %v4396_v12 }
 0x464   :  { %2934 = vmatpush1.bf16.msra.mxu1 %v4394_v24  ;;  %v3615_v57 = vpop.xlane.xlu0 %3614 }
 0x465   :  { %2935 = vmatprep.subr.bf16.mxu1 %v4399_v51  ;;  %v3700_v21 = vrot.slane %v3615_v57, %v3699_v43 }
 0x468   :  { %2936 = vmatpush1.bf16.msra.mxu1 %v4397_v44  ;;  %v3618_v55 = vpop.xlane.xlu0 %3617 }
 0x469   :  { %2937 = vmatprep.subr.bf16.mxu1 %v4402_v62  ;;  %v3707_v36 = vrot.slane %v3618_v55, %v3706_v32  ;;  %v4409_v55 = vld [vmem:[#allocation13 + $0x50] ss:$8 sps:$4 sm:$0xff]  }
 0x46c   :  { %2938 = vmatpush1.bf16.msra.mxu1 %v4400_v5 }
 0x485   :  { %v3621_v29 = vpop.xlane.xlu0 %3620 }
 0x486   :  { %v3714_v49 = vrot.slane %v3621_v29, %v3713_v33  ;;  %v4436_v29 = vld [vmem:[#allocation13 + $0xc0] ss:$8 sps:$4 sm:$0xff]  }
 0x48b   :  { %v6166_v61 = vpop.xlane.xlu1 %3623 }
 0x48c   :  { %v3720_v15 = vrot.slane %v6166_v61, %v6174_v34  ;;  %v3688_v61 = vsel %vm3687_vm9, %v3686_v46, %v3681_v3  ;;  %v4432_v46 = vld [vmem:[#allocation13 + $0xe4] ss:$8 sps:$4 sm:$0xff]   ;;  %v4447_v3 = vld [vmem:[#allocation13 + $0x94] ss:$8 sps:$4 sm:$0xff]  }
 0x48d   :  { %v3695_v50 = vsel %vm3694_vm10, %v3693_v9, %v3688_v61  ;;  %v4433_v9 = vld [vmem:[#allocation13 + $0xd0] ss:$8 sps:$4 sm:$0xff]  }
 0x48e   :  { %v3702_v12 = vsel %vm3701_vm11, %v3700_v21, %v3695_v50  ;;  %v4441_v21 = vld [vmem:[#allocation13 + $0xb4] ss:$8 sps:$4 sm:$0xff]  }
 0x48f   :  { %v3627_v48 = vpop.xlane.xlu1 %3626  ;;  %v3709_v30 = vsel %vm3708_vm12, %v3707_v36, %v3702_v12  ;;  %v4445_v36 = vld [vmem:[#allocation13 + $0x90] ss:$8 sps:$4 sm:$0xff]  }
 0x490   :  { %v3724_v45 = vrot.slane %v3627_v48, %v3671_v18  ;;  %v3716_v44 = vsel %vm3715_vm13, %v3714_v49, %v3709_v30  ;;  %v4405_v18 = vld [vmem:[#allocation13 + $0x74] ss:$8 sps:$4 sm:$0xff]  }
 0x491   :  { %3348 = vmatprep.subr.bf16.mxu0 %v4405_v18 }
 0x492   :  { %v3725_v63 = vsel %vm3673_vm7, %v3724_v45, %v3720_v15  ;;  %v4418_v45 = vld [vmem:[#allocation13 + $0x20] ss:$8 sps:$4 sm:$0xff]  }
 0x493   :  { %v3630_v7 = vpop.xlane.xlu1 %3629  ;;  %v4430_v15 = vld [vmem:[#allocation13 + $0xe0] ss:$8 sps:$4 sm:$0xff]  }
 0x494   :  { %v3729_v4 = vrot.slane %v3630_v7, %v3678_v20  ;;  %v4406_v20 = vld [vmem:[#allocation13 + $0x60] ss:$8 sps:$4 sm:$0xff]  }
 0x496   :  { %v3730_v54 = vsel %vm3680_vm8, %v3729_v4, %v3725_v63  ;;  %v4424_v4 = vld [vmem:[#allocation13] ss:$8 sps:$4 sm:$0xff]   ;;  %v4444_v63 = vld [vmem:[#allocation13 + $0xa4] ss:$8 sps:$4 sm:$0xff]  }
 0x497   :  { %v3633_v52 = vpop.xlane.xlu1 %3632 }
 0x498   :  { %v3734_v19 = vrot.slane %v3633_v52, %v3685_v37  ;;  %v3969_v52 = vld [vmem:[%s6243_s7] ss:$0 sm:$0xff] }
 0x499   :  { %v4412_v37 = vld [vmem:[#allocation13 + $0x40] ss:$8 sps:$4 sm:$0xff]  }
 0x49a   :  { %v3735_v39 = vsel %vm3687_vm9, %v3734_v19, %v3730_v54  ;;  %v4435_v19 = vld [vmem:[#allocation13 + $0xd4] ss:$8 sps:$4 sm:$0xff]   ;;  %v4450_v54 = vld [vmem:[#allocation13 + $0x84] ss:$8 sps:$4 sm:$0xff]  }
 0x4a2   :  { %v3636_v2 = vpop.xlane.xlu1 %3635 }
 0x4a3   :  { %v3739_v1 = vrot.slane %v3636_v2, %v3692_v10  ;;  %v4417_v10 = vld [vmem:[#allocation13 + $0x34] ss:$8 sps:$4 sm:$0xff]  }
 0x4a5   :  { %v3740_v13 = vsel %vm3694_vm10, %v3739_v1, %v3735_v39  ;;  %v4438_v1 = vld [vmem:[#allocation13 + $0xc4] ss:$8 sps:$4 sm:$0xff]  }
 0x4b0   :  { %v3639_v58 = vpop.xlane.xlu1 %3638 }
 0x4b1   :  { %v3744_v8 = vrot.slane %v3639_v58, %v3699_v43  ;;  %v4403_v58 = vld [vmem:[#allocation13 + $0x70] ss:$8 sps:$4 sm:$0xff]   ;;  %v4420_v43 = vld [vmem:[#allocation13 + $0x24] ss:$8 sps:$4 sm:$0xff]  }
 0x4b2   :  { %3349 = vmatpush1.bf16.msra.mxu0 %v4403_v58 }
 0x4b3   :  { %v3745_v48 = vsel %vm3701_vm11, %v3744_v8, %v3740_v13  ;;  %3350 = vmatprep.subr.bf16.mxu0 %v4408_v35  ;;  %v4442_v8 = vld [vmem:[#allocation13 + $0xa0] ss:$8 sps:$4 sm:$0xff]  }
 0x4b6   :  { %3351 = vmatpush1.bf16.msra.mxu0 %v4406_v20 }
 0x4b7   :  { %3352 = vmatprep.subr.bf16.mxu0 %v4411_v40 }
 0x4ba   :  { %3353 = vmatpush1.bf16.msra.mxu0 %v4409_v55 }
 0x4bb   :  { %3354 = vmatprep.subr.bf16.mxu0 %v4414_v31 }
 0x4be   :  { %v3642_v25 = vpop.xlane.xlu1 %3641  ;;  %3355 = vmatpush1.bf16.msra.mxu0 %v4412_v37 }
 0x4bf   :  { %v3749_v26 = vrot.slane %v3642_v25, %v3706_v32  ;;  %3356 = vmatprep.subr.bf16.mxu0 %v4417_v10  ;;  %v4421_v32 = vld [vmem:[#allocation13 + $0x10] ss:$8 sps:$4 sm:$0xff]   ;;  %v4429_v25 = vld [vmem:[#allocation13 + $0xf4] ss:$8 sps:$4 sm:$0xff]  }
 0x4c1   :  { %v3750_v51 = vsel %vm3708_vm12, %v3749_v26, %v3745_v48  ;;  %v4448_v26 = vld [vmem:[#allocation13 + $0x80] ss:$8 sps:$4 sm:$0xff]  }
 0x4c2   :  { %3357 = vmatpush1.bf16.msra.mxu0 %v4415_v16 }
 0x4c3   :  { %3358 = vmatprep.subr.bf16.mxu0 %v4420_v43 }
 0x4c4   :  { %v3645_v27 = vpop.xlane.xlu1 %3644 }
 0x4c5   :  { %v3754_v24 = vrot.slane %v3645_v27, %v3713_v33  ;;  %v4426_v33 = vld [vmem:[#allocation13 + $0x4] ss:$8 sps:$4 sm:$0xff]  }
 0x4c6   :  { %3359 = vmatpush1.bf16.msra.mxu0 %v4418_v45 }
 0x4c7   :  { %v3755_v7 = vsel %vm3715_vm13, %v3754_v24, %v3750_v51  ;;  %3360 = vmatprep.subr.bf16.mxu0 %v4423_v60 }
 0x4c8   :  { %v3756_v62 = vsel %vm2648_vm0, %v3755_v7, %v3716_v44 }
 0x4c9   :  { %3759 = vst.msk [vmem:[#allocation19] sm:$0x3] %vm3758_vm14, %v3756_v62 }
 0x4ca   :  { %3361 = vmatpush1.bf16.msra.mxu0 %v4421_v32 }
 0x4cb   :  { %3362 = vmatprep.subr.bf16.mxu0 %v4426_v33 }
 0x4ce   :  { %3363 = vmatpush1.bf16.msra.mxu0 %v4424_v4 }
 0x4cf   :  { %3364 = vmatprep.subr.bf16.mxu0 %v4429_v25 }
 0x4d2   :  { %3365 = vmatpush2.bf16.msra.mxu0 %v4427_v28 }
 0x4d3   :  { %3366 = vmatprep.subr.bf16.mxu0 %v4432_v46 }
 0x4d6   :  { %3367 = vmatpush2.bf16.msra.mxu0 %v4430_v15 }
 0x4d7   :  { %3368 = vmatprep.subr.bf16.mxu0 %v4435_v19 }
 0x4da   :  { %3369 = vmatpush2.bf16.msra.mxu0 %v4433_v9 }
 0x4db   :  { %3370 = vmatprep.subr.bf16.mxu0 %v4438_v1 }
 0x4de   :  { %3371 = vmatpush2.bf16.msra.mxu0 %v4436_v29 }
 0x4df   :  { %3372 = vmatprep.subr.bf16.mxu0 %v4441_v21 }
 0x4e2   :  { %3373 = vmatpush2.bf16.msra.mxu0 %v4439_v47 }
 0x4e3   :  { %3374 = vmatprep.subr.bf16.mxu0 %v4444_v63 }
 0x4e6   :  { %3375 = vmatpush2.bf16.msra.mxu0 %v4442_v8 }
 0x4e7   :  { %3376 = vmatprep.subr.bf16.mxu0 %v4447_v3 }
 0x4ea   :  { %3377 = vmatpush2.bf16.msra.mxu0 %v4445_v36 }
 0x4eb   :  { %3378 = vmatprep.subr.bf16.mxu0 %v4450_v54 }
 0x4ee   :  { %3379 = vmatpush2.bf16.msra.mxu0 %v4448_v26 }
 0x50f   :  { %v4131_v11 = vpop.f32.mrf.mxu1 }
 0x511   :  { %v4132_v5 = vpop.f32.mrf.mxu1 }
 0x512   :  { %v4133_v6 = vadd.f32 %v4132_v5, %v4131_v11 }
 0x513   :  { %v4134_v2 = vpop.f32.mrf.mxu1 }
 0x514   :  { %v2818_v23 = vadd.f32 %v4133_v6, %v3969_v52 }
 0x515   :  { %v4135_v41 = vpop.f32.mrf.mxu1 }
 0x516   :  { %v4136_v57 = vadd.f32 %v4135_v41, %v4134_v2  ;;  %4691 = vtanh.f32 %v2818_v23 }
 0x518   :  { %v2821_v42 = vadd.f32 %v4136_v57, %v3969_v52 }
 0x51a   :  { %4693 = vtanh.f32 %v2821_v42 }
 0x523   :  { %v4692_v38 = vpop.eup %4691 }
 0x527   :  { %v4694_v0 = vpop.eup %4693 }
 0x528   :  { %v2826_v59 = vpack.c.bf16 %v4694_v0, %v4692_v38 }
 0x52a   :  { %2956 = vmatmul.mubr.bf16.vlgmr.msra.gmra.mxu1 %v2826_v59 }
 0x5ea   :  { %v2957_v61 = vpop.f32.mrf.mxu1 }
 0x5eb   :  { %v2966_v49 = vrot.slane %v2957_v61, 4 }
 0x5ec   :  { %v2959_v39 = vpop.f32.mrf.mxu1 }
 0x5ed   :  { %v2967_v50 = vmax.f32 %v2957_v61, %v2966_v49  ;;  %v2972_v13 = vrot.slane %v2959_v39, 4 }
 0x5ee   :  { %v2961_v27 = vpop.f32.mrf.mxu1 }
 0x5ef   :  { %v2968_v12 = vrot.slane %v2967_v50, 2  ;;  %v2973_v48 = vmax.f32 %v2959_v39, %v2972_v13  ;;  %v2978_v24 = vrot.slane %v2961_v27, 4 }
 0x5f0   :  { %v2963_v30 = vpop.f32.mrf.mxu1 }
 0x5f1   :  { %v2969_v51 = vmax.f32 %v2967_v50, %v2968_v12  ;;  %v2974_v44 = vrot.slane %v2973_v48, 2  ;;  %v2979_v7 = vmax.f32 %v2961_v27, %v2978_v24  ;;  %v2984_v62 = vrot.slane %v2963_v30, 4 }
 0x5f3   :  { %v2970_v11 = vrot.slane %v2969_v51, 1  ;;  %v2975_v5 = vmax.f32 %v2973_v48, %v2974_v44  ;;  %v2980_v52 = vrot.slane %v2979_v7, 2  ;;  %v2985_v6 = vmax.f32 %v2963_v30, %v2984_v62 }
 0x5f5   :  { %v2971_v2 = vmax.f32 %v2969_v51, %v2970_v11  ;;  %v2976_v23 = vrot.slane %v2975_v5, 1  ;;  %v2981_v41 = vmax.f32 %v2979_v7, %v2980_v52  ;;  %v2986_v57 = vrot.slane %v2985_v6, 2 }
 0x5f7   :  { %v2990_v42 = vsub.f32 %v2957_v61, %v2971_v2  ;;  %v2977_v38 = vmax.f32 %v2975_v5, %v2976_v23  ;;  %v2982_v0 = vrot.slane %v2981_v41, 1  ;;  %v2987_v59 = vmax.f32 %v2985_v6, %v2986_v57 }
 0x5f9   :  { %v2994_v58 = vmul.f32 1.442695, %v2990_v42  ;;  %v2991_v18 = vsub.f32 %v2959_v39, %v2977_v38  ;;  %v2983_v35 = vmax.f32 %v2981_v41, %v2982_v0  ;;  %v2988_v20 = vrot.slane %v2987_v59, 1 }
 0x5fb   :  { %4695 = vpow2.f32 %v2994_v58  ;;  %v2996_v40 = vmul.f32 1.442695, %v2991_v18  ;;  %v2992_v55 = vsub.f32 %v2961_v27, %v2983_v35  ;;  %v2989_v31 = vmax.f32 %v2987_v59, %v2988_v20 }
 0x5fd   :  { %4697 = vpow2.f32 %v2996_v40  ;;  %v2998_v37 = vmul.f32 1.442695, %v2992_v55  ;;  %v2993_v10 = vsub.f32 %v2963_v30, %v2989_v31 }
 0x5ff   :  { %4699 = vpow2.f32 %v2998_v37  ;;  %v3000_v16 = vmul.f32 1.442695, %v2993_v10 }
 0x601   :  { %4701 = vpow2.f32 %v3000_v16 }
 0x608   :  { %v4696_v43 = vpop.eup %4695 }
 0x609   :  { %v3002_v45 = vrot.slane %v4696_v43, 4 }
 0x60a   :  { %v4698_v60 = vpop.eup %4697 }
 0x60b   :  { %v3003_v32 = vadd.f32 %v4696_v43, %v3002_v45  ;;  %v3008_v33 = vrot.slane %v4698_v60, 4 }
 0x60c   :  { %v4700_v4 = vpop.eup %4699 }
 0x60d   :  { %v3004_v25 = vrot.slane %v3003_v32, 2  ;;  %v3009_v28 = vadd.f32 %v4698_v60, %v3008_v33  ;;  %v3014_v46 = vrot.slane %v4700_v4, 4 }
 0x60e   :  { %v4702_v15 = vpop.eup %4701 }
 0x60f   :  { %v3005_v19 = vadd.f32 %v3004_v25, %v3003_v32  ;;  %v3010_v9 = vrot.slane %v3009_v28, 2  ;;  %v3015_v29 = vadd.f32 %v4700_v4, %v3014_v46  ;;  %v3020_v1 = vrot.slane %v4702_v15, 4 }
 0x611   :  { %v3006_v47 = vrot.slane %v3005_v19, 1  ;;  %v3011_v21 = vadd.f32 %v3010_v9, %v3009_v28  ;;  %v3016_v63 = vrot.slane %v3015_v29, 2  ;;  %v3021_v8 = vadd.f32 %v4702_v15, %v3020_v1  ;;  %v4453_v9 = vld [vmem:[#allocation14 + $0x70] sm:$0xff]  }
 0x613   :  { %v3007_v3 = vadd.f32 %v3006_v47, %v3005_v19  ;;  %v3012_v36 = vrot.slane %v3011_v21, 1  ;;  %v3017_v54 = vadd.f32 %v3016_v63, %v3015_v29  ;;  %v3022_v26 = vrot.slane %v3021_v8, 2  ;;  %v4452_v19 = vld [vmem:[#allocation14 + $0x38] sm:$0xff]  }
 0x615   :  { %v3013_v61 = vadd.f32 %v3012_v36, %v3011_v21  ;;  %4703 = vrcp.f32 %v3007_v3  ;;  %v3018_v49 = vrot.slane %v3017_v54, 1  ;;  %v3023_v39 = vadd.f32 %v3022_v26, %v3021_v8  ;;  %v4454_v8 = vld [vmem:[#allocation14 + $0x30] sm:$0xff]   ;;  %v4455_v26 = vld [vmem:[#allocation14 + $0x68] sm:$0xff]  }
 0x617   :  { %4705 = vrcp.f32 %v3013_v61  ;;  %v3019_v50 = vadd.f32 %v3018_v49, %v3017_v54  ;;  %v3024_v13 = vrot.slane %v3023_v39, 1 }
 0x619   :  { %v3025_v27 = vadd.f32 %v3024_v13, %v3023_v39  ;;  %4707 = vrcp.f32 %v3019_v50  ;;  %v4456_v13 = vld [vmem:[#allocation14 + $0x28] sm:$0xff]  }
 0x61b   :  { %4709 = vrcp.f32 %v3025_v27 }
 0x622   :  { %v4704_v12 = vpop.eup %4703 }
 0x623   :  { %v3030_v48 = vmul.f32 %v4704_v12, %v4696_v43 }
 0x624   :  { %v4706_v24 = vpop.eup %4705 }
 0x625   :  { %v3031_v30 = vmul.f32 %v4706_v24, %v4698_v60  ;;  %v3098_v51 = vmul.f32 %v6118_v22, %v3030_v48  ;;  %v4457_v24 = vld [vmem:[#allocation14 + $0x60] sm:$0xff]  }
 0x626   :  { %v4708_v44 = vpop.eup %4707 }
 0x627   :  { %v3102_v7 = vrot.slane %v3098_v51, 4  ;;  %v3760_v62 = vmax.f32 %v3030_v48, %v3031_v30  ;;  %v3099_v11 = vmul.f32 %v6129_v56, %v3031_v30  ;;  %v3032_v5 = vmul.f32 %v4708_v44, %v4700_v4 }
 0x628   :  { %v4710_v52 = vpop.eup %4709 }
 0x629   :  { %v3103_v6 = vadd.f32 %v3102_v7, %v3098_v51  ;;  %3761 = vmax.xlane.f32.xlu0 %v3760_v62  ;;  %v3108_v2 = vrot.slane %v3099_v11, 4  ;;  %v3033_v23 = vmul.f32 %v4710_v52, %v4702_v15  ;;  %v3100_v41 = vmul.f32 %v6139_v53, %v3032_v5  ;;  %v4451_v15 = vld [vmem:[#allocation14 + $0x78] sm:$0xff]   ;;  %v4458_v7 = vld [vmem:[#allocation14 + $0x20] sm:$0xff]  }
 0x62a   :  { %v4982_v53 = vmov 1983009808   ;;  %4137 = vmatprep.subr.bf16.mxu1 %v4451_v15  ;;  %v4460_v52 = vld [vmem:[#allocation14 + $0x18] sm:$0xff]  }
 0x62b   :  { %v3104_v57 = vrot.slane %v3103_v6, 2  ;;  %v3109_v42 = vadd.f32 %v3108_v2, %v3099_v11  ;;  %v3114_v38 = vrot.slane %v3100_v41, 4  ;;  %v3763_v0 = vmax.f32 %v3032_v5, %v3033_v23  ;;  %4138 = vmatpush3.bf16.msra.mxu1 %v4452_v19  ;;  %v4459_v11 = vld [vmem:[#allocation14 + $0x58] sm:$0xff]   ;;  %v4462_v2 = vld [vmem:[#allocation14 + $0x10] sm:$0xff]  }
 0x62c   :  { %v3101_v59 = vmul.f32 %v6152_v14, %v3033_v23  ;;  %v3574_v43 = vunpack.c.l.s4 %v4982_v53  ;;  %4139 = vmatprep.subr.bf16.mxu1 %v4453_v9  ;;  %v4463_v23 = vld [vmem:[#allocation14 + $0x48] sm:$0xff]  }
 0x62d   :  { %v3105_v22 = vadd.f32 %v3104_v57, %v3103_v6  ;;  %v3110_v58 = vrot.slane %v3109_v42, 2  ;;  %v3115_v18 = vadd.f32 %v3114_v38, %v3100_v41  ;;  %3764 = vmax.xlane.f32.xlu1 %v3763_v0  ;;  %v4461_v6 = vld [vmem:[#allocation14 + $0x50] sm:$0xff]   ;;  %v4464_v41 = vld [vmem:[#allocation14 + $0x8] sm:$0xff]   ;;  %v4465_v57 = vld [vmem:[#allocation14 + $0x40] sm:$0xff]  }
 0x62e   :  { %v3120_v35 = vrot.slane %v3101_v59, 4  ;;  %v3575_v28 = vunpack.c.0.s8 %v3574_v43 }
 0x62f   :  { %v3106_v56 = vrot.slane %v3105_v22, 1  ;;  %v3111_v20 = vadd.f32 %v3110_v58, %v3109_v42  ;;  %v3116_v40 = vrot.slane %v3115_v18, 2  ;;  %4140 = vmatpush3.bf16.msra.mxu1 %v4454_v8  ;;  %v4466_v42 = vld [vmem:[#allocation14] sm:$0xff]  }
 0x630   :  { %v3121_v55 = vadd.f32 %v3120_v35, %v3101_v59  ;;  %v3578_v3 = vsub.s32 %v3575_v28, %v6366_v17  ;;  %4141 = vmatprep.subr.bf16.mxu1 %v4455_v26  ;;  %v6367_v35 = vsub.s32 0, %v6366_v17 }
 0x631   :  { %v3107_v31 = vadd.f32 %v3106_v56, %v3105_v22  ;;  %v3112_v37 = vrot.slane %v3111_v20, 1  ;;  %v3117_v10 = vadd.f32 %v3116_v40, %v3115_v18  ;;  %v3162_v18 = vld [vmem:[%s6246_s10] sm:$0x3]  ;;  %s3786_s10 = sshll.u32 %s4983_s19, 4  ;;  %s3787_s10 = int_to_ptr.vmem [resolvable:$true] %s3786_s10 }
 0x632   :  { %v3122_v16 = vrot.slane %v3121_v55, 2  ;;  %v3167_v56 = vrot.slane %v3162_v18, %v6367_v35  ;;  %s4871_s20 = scalar_lea.vmem %s3787_s10, 64  ;;  %p4876_p13 = scmp.lt.s32.totalorder %s3787_s10, %s3787_s10 }
 0x633   :  { %v3118_v45 = vrot.slane %v3117_v10, 1  ;;  %v3113_v60 = vadd.f32 %v3112_v37, %v3111_v20  ;;  %v3126_v33 = vpack.c.bf16 %v3107_v31, %v3107_v31  ;;  %4142 = vmatpush3.bf16.msra.mxu1 %v4456_v13  ;;  %v6368_v20 = vsub.s32 1, %v6366_v17  ;;  %p4872_p12 = scmp.ne.s32.totalorder %s3787_s10, %s4871_s20  ;;  %p4877_p0 = scmp.lt.s32.totalorder %s4871_s20, %s4871_s20 }
 0x634   :  { %v3123_v32 = vadd.f32 %v3122_v16, %v3121_v55  ;;  %4143 = vmatprep.subr.bf16.mxu1 %v4457_v24 }
 0x635   :  { %v3119_v14 = vadd.f32 %v3118_v45, %v3117_v10  ;;  %v3572_v4 = vcombine.low %v3107_v31, %v3113_v60  ;;  %v3127_v1 = vpack.c.bf16 %v3113_v60, %v3113_v60  ;;  %v3178_v47 = vunpack.c.l.b16 %v3126_v33  ;;  %p4878_p1 = por %p4877_p0, %p4876_p13 }
 0x636   :  { %v3124_v25 = vrot.slane %v3123_v32, 1  ;;  %v3171_v40 = vrot.slane %v3162_v18, %v6368_v20 }
 0x637   :  { %v3128_v46 = vpack.c.bf16 %v3119_v14, %v3119_v14  ;;  %v3179_v61 = vunpack.c.l.b16 %v3127_v1  ;;  %v3579_v27 = vrot.slane %v3572_v4, %v3578_v3  ;;  %4144 = vmatpush3.bf16.msra.mxu1 %v4458_v7  ;;  %p4879_p2 = pnand %p4878_p1, %p4872_p12 }
 0x638   :  { %v3125_v29 = vadd.f32 %v3124_v25, %v3123_v32  ;;  %4145 = vmatprep.subr.bf16.mxu1 %v4459_v11 }
 0x639   :  { %v3180_v21 = vunpack.c.l.b16 %v3128_v46 }
 0x63a   :  { %v3129_v63 = vpack.c.bf16 %v3125_v29, %v3125_v29  ;;  %v3580_v36 = vcombine.low %v3119_v14, %v3125_v29 }
 0x63b   :  { %v3182_v54 = vsel %vm2648_vm0, %v3180_v21, %v3178_v47  ;;  %4146 = vmatpush3.bf16.msra.mxu1 %v4460_v52 }
 0x63c   :  { %v3181_v49 = vunpack.c.l.b16 %v3129_v63  ;;  %v3587_v39 = vrot.slane %v3580_v36, %v3578_v3  ;;  %v3184_v30 = vpack.c.b16 %v3182_v54, %v3182_v54  ;;  %4147 = vmatprep.subr.bf16.mxu1 %v4461_v6 }
 0x63e   :  { %v3183_v50 = vsel %vm2648_vm0, %v3181_v49, %v3179_v61  ;;  %v3590_v12 = vrot.slane %v3587_v39, 7 }
 0x63f   :  { %v3185_v48 = vpack.c.b16 %v3183_v50, %v3183_v50  ;;  %4148 = vmatpush3.bf16.msra.mxu1 %v4462_v2 }
 0x640   :  { %v3591_v51 = vsel %vm2648_vm0, %v3590_v12, %v3579_v27  ;;  %4149 = vmatprep.subr.bf16.mxu1 %v4463_v23 }
 0x641   :  { %3380 = vmatprep.mubr.bf16.mxu0 %v3185_v48  ;;  %v3592_v44 = vsel %vm2652_vm2, %v3590_v12, %v3591_v51 }
 0x642   :  { %3381 = vmatmul.mubr.bf16.vlgmr.msra.gmra.mxu0 %v3184_v30  ;;  %v3593_v62 = vsel %vm2656_vm4, %v3590_v12, %v3592_v44 }
 0x643   :  { %v3594_v5 = vsel %vm2660_vm6, %v3590_v12, %v3593_v62  ;;  %4150 = vmatpush3.bf16.msra.mxu1 %v4464_v41 }
 0x644   :  { %3596 = vst [vmem:[#allocation16] sm:$0xf] %v3594_v5  ;;  %4151 = vmatprep.subr.bf16.mxu1 %v4465_v57 }
 0x647   :  { %4152 = vmatpush3.bf16.msra.mxu1 %v4466_v42 }
 0x6b2   :  { %v3762_v38 = vpop.xlane.xlu0 %3761 }
 0x6b3   :  { %v3771_v59 = vrot.slane %v3762_v38, %v6174_v34 }
 0x6b6   :  { %v3765_v0 = vpop.xlane.xlu1 %3764 }
 0x6b7   :  { %v3775_v22 = vrot.slane %v3765_v0, %v6174_v34 }
 0x6b9   :  { %v3776_v58 = vsel %vm2648_vm0, %v3775_v22, %v3771_v59 }
 0x6ba   :  { %3779 = vst.msk [vmem:[#allocation20] sm:$0x3] %vm3778_vm15, %v3776_v58 }
 0x702   :  { %v3382_v55 = vpop.f32.mrf.mxu0 }
 0x703   :  { %v3383_v31 = vadd.f32 %v3382_v55, %v3167_v56 }
 0x704   :  { %v3384_v37 = vpop.f32.mrf.mxu0 }
 0x705   :  { %v3385_v10 = vadd.f32 %v3384_v37, %v3171_v40  ;;  %v3389_v16 = vmax.f32 %v3383_v31, 0.0 }
 0x706   :  { %v3386_v34 = vpop.f32.mrf.mxu0 }
 0x707   :  { %v3390_v53 = vmax.f32 %v3385_v10, 0.0  ;;  %v3391_v60 = vpack.c.bf16 %v3389_v16, %v3389_v16 }
 0x708   :  { %v3387_v43 = vpop.f32.mrf.mxu0 }
 0x709   :  { %v3392_v45 = vpack.c.bf16 %v3390_v53, %v3390_v53 }
 0x70b   :  { %3560 = vmatprep.mubr.bf16.mxu1 %v3392_v45 }
 0x70c   :  { %3561 = vmatmul.mubr.bf16.vlgmr.msra.gmra.mxu1 %v3391_v60 }
 0x70d   :  { %4882 = shalt.err (!%p4879_p2)
}
 0x70e   :  { %3789 = dma.vmem_to_hbm [thread:$0]  %s3787_s10, 64, %s6249_s13, [#allocation4]  }
 0x70f   :  { %s4984_s23 = smov [#allocation20]  }
 0x710   :  { %s3816_s26 = sshll.u32 %s4984_s23, 4  ;;  %s3817_s26 = int_to_ptr.vmem [resolvable:$true] %s3816_s26 }
 0x711   :  { %s4891_s5 = scalar_lea.vmem %s3817_s26, 32  ;;  %p4896_p4 = scmp.lt.s32.totalorder %s3817_s26, %s3817_s26 }
 0x712   :  { %p4892_p3 = scmp.ne.s32.totalorder %s3817_s26, %s4891_s5  ;;  %p4897_p5 = scmp.lt.s32.totalorder %s4891_s5, %s4891_s5 }
 0x714   :  { %p4898_p6 = por %p4897_p5, %p4896_p4 }
 0x716   :  { %p4899_p7 = pnand %p4898_p6, %p4892_p3 }
 0x718   :  { %4902 = shalt.err (!%p4899_p7)
}
 0x719   :  { %3819 = dma.vmem_to_hbm [thread:$0]  %s3817_s26, 32, %s6252_s16, [#allocation21]   ;;  %v4034_v32 = vld [vmem:[%s6248_s12] ss:$0 sm:$0xff] }
 0x71a   :  { %s4985_s13 = smov [#allocation17]   ;;  %s4986_s17 = smov [#allocation19]  }
 0x71b   :  { %s3796_s30 = sshll.u32 %s4985_s13, 4  ;;  %s3806_s18 = sshll.u32 %s4986_s17, 4  ;;  %s3797_s30 = int_to_ptr.vmem [resolvable:$true] %s3796_s30  ;;  %s3807_s18 = int_to_ptr.vmem [resolvable:$true] %s3806_s18 }
 0x71c   :  { %s4911_s8 = scalar_lea.vmem %s3797_s30, 32  ;;  %p4916_p9 = scmp.lt.s32.totalorder %s3797_s30, %s3797_s30 }
 0x71d   :  { %p4912_p8 = scmp.ne.s32.totalorder %s3797_s30, %s4911_s8  ;;  %p4917_p10 = scmp.lt.s32.totalorder %s4911_s8, %s4911_s8 }
 0x71f   :  { %p4918_p11 = por %p4917_p10, %p4916_p9 }
 0x721   :  { %p4919_p12 = pnand %p4918_p11, %p4912_p8 }
 0x7cc   :  { %v4153_v17 = vpop.f32.mrf.mxu1 }
 0x7ce   :  { %v4154_v33 = vpop.f32.mrf.mxu1 }
 0x7cf   :  { %v4155_v14 = vadd.f32 %v4154_v33, %v4153_v17 }
 0x7d0   :  { %v4156_v4 = vpop.f32.mrf.mxu1 }
 0x7d1   :  { %v3563_v25 = vadd.f32 %v4155_v14, %v4034_v32 }
 0x7d2   :  { %v4157_v28 = vpop.f32.mrf.mxu1 }
 0x7d3   :  { %3597 = vst [vmem:[#allocation17] sm:$0x3] %v3563_v25 }
 0x7d4   :  { %4922 = shalt.err (!%p4919_p12)
}
 0x7d5   :  { %3799 = dma.vmem_to_hbm [thread:$0]  %s3797_s30, 32, %s6250_s14, [#allocation18]  }
 0x7d6   :  { %s4931_s6 = scalar_lea.vmem %s3807_s18, 32  ;;  %p4936_p0 = scmp.lt.s32.totalorder %s3807_s18, %s3807_s18 }
 0x7d7   :  { %p4932_p13 = scmp.ne.s32.totalorder %s3807_s18, %s4931_s6  ;;  %p4937_p1 = scmp.lt.s32.totalorder %s4931_s6, %s4931_s6 }
 0x7d9   :  { %p4938_p2 = por %p4937_p1, %p4936_p0 }
 0x7db   :  { %p4939_p3 = pnand %p4938_p2, %p4932_p13 }
 0x7dd   :  { %4942 = shalt.err (!%p4939_p3)
}
 0x7de   :  { %3809 = dma.vmem_to_hbm [thread:$0]  %s3807_s18, 32, %s6251_s15, [#allocation18]  }
 0x7df   :  { %4961 = dma.done.wait [#allocation4], 64  }
 0x7e0   :  { %4962 = vsyncadd [#allocation4], 4294967232 }
 0x7e1   :  { %4963 = dma.done.wait [#allocation18], 64  }
 0x7e2   :  { %4964 = vsyncadd [#allocation18], 4294967232 }
 0x7e3   :  { %4965 = dma.done.wait [#allocation21], 32  }
 0x7e4   :  { %4966 = vsyncadd [#allocation21], 4294967264 }
 0x7e5   :  { %3832 = vsyncpa [#allocation3], 1 }
 0x7e6   :  { %3833 = vsyncpa [#allocation6], 1 }
 0x7e7   :  { %3834 = vsyncpa [#allocation9], 1 }
 0x7e8   :  { %3835 = vsyncpa [#allocation12], 1 }
 0x7e9   :  { %3836 = vsyncpa [#allocation15], 1 }
 0x7ea   :  { %3837 = vsyncpa [#allocation4], 1 }
 0x7eb   :  { %3838 = vsyncpa [#allocation18], 1 }
 0x7ec   :  { %3839 = vsyncpa [#allocation21], 1 }

</bundles_post_ra>
